<compile_context>
chip_gen: v7x
topology: tpu7x:2x2x1
jax: 0.10.0
libtpu: 0.0.40
codegen_flags: <defaults>
</compile_context>

<pallas_src>
import functools

import jax
import jax.numpy as jnp
from jax.experimental import pallas as pl
from jax.experimental.pallas import tpu as pltpu


def _encoder_layer_kernel(
    x_ref, src_ref, mask_ref,
    wq_ref, bq_ref, wk_ref, bk_ref, wv_ref, bv_ref, wo_ref, bo_ref,
    w1_ref, b1_ref, w2_ref, b2_ref,
    g1_ref, be1_ref, g2_ref, be2_ref,
    o_ref,
    *, eps_attn, eps_ln, compute_dtype,
):
    B, L, D = x_ref.shape          # D = d_model
    _, S, _ = src_ref.shape
    Dq = wq_ref.shape[1]           # n_heads * d_keys
    Dv = wv_ref.shape[1]           # n_heads * d_values
    cd = compute_dtype

    x2 = x_ref[...].reshape(B * L, D)      # (B*L, D) f32
    s2 = src_ref[...].reshape(B * S, D)    # (B*S, D) f32
    mask = mask_ref[...]                   # (Dq, Dv) block-diagonal head mask, f32

    # Hoisted biases / LayerNorm params (loaded once per grid step).
    bq = bq_ref[...]; bk = bk_ref[...]; bv = bv_ref[...]; bo = bo_ref[...]
    b1 = b1_ref[...]; b2 = b2_ref[...]
    g1 = g1_ref[...]; be1 = be1_ref[...]
    g2 = g2_ref[...]; be2 = be2_ref[...]

    def mm(a, w_ref):
        # bf16 (or f32) MXU operands, f32 accumulation.
        return jnp.dot(a.astype(cd), w_ref[...],
                       preferred_element_type=jnp.float32)

    def elu_plus_one(t):
        # F.elu(t) + 1 == t + 1 (t > 0) / exp(t) (t <= 0)
        return jnp.where(t > 0, t + 1.0, jnp.exp(t))

    # --- projections (full-width MXU matmuls, M = B*L rows) ---
    q = elu_plus_one(mm(x2, wq_ref) + bq)      # (B*L, Dq) f32
    k = elu_plus_one(mm(s2, wk_ref) + bk)      # (B*S, Dq) f32
    v = mm(s2, wv_ref) + bv                    # (B*S, Dv) f32

    q3 = q.reshape(B, L, Dq)
    k3 = k.reshape(B, S, Dq)
    v3 = v.reshape(B, S, Dv)

    # --- linear attention, full-width with block-diagonal head mask ---
    # KV_full[b] = K_b^T @ V_b, zeroed on cross-head (dk x dv) blocks.
    kv = jnp.einsum("bsd,bse->bde", k3.astype(cd), v3.astype(cd),
                    preferred_element_type=jnp.float32)        # (B, Dq, Dv)
    kv = kv * mask[None]
    num = jnp.einsum("bld,bde->ble", q3.astype(cd), kv.astype(cd),
                     preferred_element_type=jnp.float32)       # (B, L, Dv)

    # Denominator stays in f32; mask matmul expands per-head sums to Dv lanes.
    ksum = jnp.sum(k3, axis=1)                                  # (B, Dq)
    qk2 = (q3 * ksum[:, None, :]).reshape(B * L, Dq)
    den = jnp.dot(qk2, mask, preferred_element_type=jnp.float32) + eps_attn
    z = pl.reciprocal(den, approx=True)                         # EUP, not VALU
    attn = num.reshape(B * L, Dv) * z                           # (B*L, Dv)

    attn = mm(attn, wo_ref) + bo                                # (B*L, D)

    # --- residual + LayerNorm1 (dropout p=0.0 is identity) ---
    def layernorm(t, gamma, beta):
        mu = jnp.mean(t, axis=-1, keepdims=True)
        var = jnp.mean((t - mu) * (t - mu), axis=-1, keepdims=True)
        return (t - mu) * jax.lax.rsqrt(var + eps_ln) * gamma + beta

    xn = layernorm(x2 + attn, g1, be1)

    # --- feed-forward ---
    y = jnp.maximum(mm(xn, w1_ref) + b1, 0.0)                   # relu
    y = mm(y, w2_ref) + b2

    # --- residual + LayerNorm2 ---
    o_ref[...] = layernorm(xn + y, g2, be2).reshape(B, L, D)


def encoder_layer_pallas(x, source, params, *, n_heads,
                         block_batch=8, use_bf16=True):
    """x: (N, L, D), source: (N, S, D).  Returns (N, L, D) float32."""
    N, L, D = x.shape
    _, S, _ = source.shape
    Dq = params["wq"].shape[1]
    Dv = params["wv"].shape[1]
    dk = Dq // n_heads
    dv = Dv // n_heads

    # Static block-diagonal head mask (Dq, Dv): 1 where key-dim i and value-dim j
    # belong to the same head.
    head_q = jnp.repeat(jnp.arange(n_heads), dk)
    head_v = jnp.repeat(jnp.arange(n_heads), dv)
    mask = (head_q[:, None] == head_v[None, :]).astype(jnp.float32)

    # Largest divisor of N not exceeding block_batch (keeps >=1 full block/step).
    Bb = max(1, min(block_batch, N))
    while N % Bb:
        Bb -= 1
    grid = (N // Bb,)

    cd = jnp.bfloat16 if use_bf16 else jnp.float32
    mat_keys = ("wq", "wk", "wv", "wo", "w1", "w2")
    weight_order = ["wq", "bq", "wk", "bk", "wv", "bv", "wo", "bo",
                    "w1", "b1", "w2", "b2", "g1", "be1", "g2", "be2"]
    weight_args = [params[k].astype(cd) if k in mat_keys else params[k]
                   for k in weight_order]

    def full_spec(shape):
        # Whole-array block, no grid dependence (resident across grid steps).
        return pl.BlockSpec(shape, lambda n: (0,) * len(shape))

    weight_specs = [full_spec(a.shape) for a in weight_args]

    kernel = functools.partial(
        _encoder_layer_kernel,
        eps_attn=1e-6, eps_ln=1e-5, compute_dtype=cd)

    grid_spec = pl.GridSpec(
        grid=grid,
        in_specs=[
            pl.BlockSpec((Bb, L, D), lambda n: (n, 0, 0)),
            pl.BlockSpec((Bb, S, D), lambda n: (n, 0, 0)),
            full_spec(mask.shape),
        ] + weight_specs,
        out_specs=pl.BlockSpec((Bb, L, D), lambda n: (n, 0, 0)),
    )

    return pl.pallas_call(
        kernel,
        out_shape=jax.ShapeDtypeStruct((N, L, D), jnp.float32),
        grid_spec=grid_spec,
        compiler_params=pltpu.CompilerParams(
            dimension_semantics=("parallel",)),
    )(x, source, mask, *weight_args)


def encoder_layer_ref(x, source, params, *, n_heads):
    """Pure-JAX f32 reference mirroring the PyTorch forward (dropout=0)."""
    N, L, D = x.shape
    _, S, _ = source.shape
    H = n_heads
    dk = params["wq"].shape[1] // H
    dv = params["wv"].shape[1] // H

    def elu1(t):
        return jnp.where(t > 0, t + 1.0, jnp.exp(t))

    q = elu1(x @ params["wq"] + params["bq"]).reshape(N, L, H, dk)
    k = elu1(source @ params["wk"] + params["bk"]).reshape(N, S, H, dk)
    v = (source @ params["wv"] + params["bv"]).reshape(N, S, H, dv)

    kv = jnp.einsum("nshd,nshm->nhmd", k, v)
    z = 1.0 / (jnp.einsum("nlhd,nhd->nlh", q, k.sum(axis=1)) + 1e-6)
    attn = jnp.einsum("nlhd,nhmd,nlh->nlhm", q, kv, z).reshape(N, L, H * dv)
    attn = attn @ params["wo"] + params["bo"]

    def ln(t, g, b):
        mu = jnp.mean(t, axis=-1, keepdims=True)
        var = jnp.mean((t - mu) ** 2, axis=-1, keepdims=True)
        return (t - mu) / jnp.sqrt(var + 1e-5) * g + b

    x1 = ln(x + attn, params["g1"], params["be1"])
    y = jnp.maximum(x1 @ params["w1"] + params["b1"], 0.0)
    y = y @ params["w2"] + params["b2"]
    return ln(x1 + y, params["g2"], params["be2"])


def make_params(key, d_model, n_heads, d_ff):
    dk = d_model // n_heads
    dv = d_model // n_heads
    ks = jax.random.split(key, 12)
    s = 0.1
    return {
        "wq": jax.random.normal(ks[0], (d_model, dk * n_heads), jnp.float32) * s,
        "bq": jax.random.normal(ks[1], (1, dk * n_heads), jnp.float32) * s,
        "wk": jax.random.normal(ks[2], (d_model, dk * n_heads), jnp.float32) * s,
        "bk": jax.random.normal(ks[3], (1, dk * n_heads), jnp.float32) * s,
        "wv": jax.random.normal(ks[4], (d_model, dv * n_heads), jnp.float32) * s,
        "bv": jax.random.normal(ks[5], (1, dv * n_heads), jnp.float32) * s,
        "wo": jax.random.normal(ks[6], (dv * n_heads, d_model), jnp.float32) * s,
        "bo": jax.random.normal(ks[7], (1, d_model), jnp.float32) * s,
        "w1": jax.random.normal(ks[8], (d_model, d_ff), jnp.float32) * s,
        "b1": jax.random.normal(ks[9], (1, d_ff), jnp.float32) * s,
        "w2": jax.random.normal(ks[10], (d_ff, d_model), jnp.float32) * s,
        "b2": jax.random.normal(ks[11], (1, d_model), jnp.float32) * s,
        # LayerNorm params: PyTorch default init (ones / zeros)
        "g1": jnp.ones((1, d_model), jnp.float32),
        "be1": jnp.zeros((1, d_model), jnp.float32),
        "g2": jnp.ones((1, d_model), jnp.float32),
        "be2": jnp.zeros((1, d_model), jnp.float32),
    }


if __name__ == "__main__":
    # Shapes consistent with EncoderLayer.forward: x (N, L, d_model),
    # source (N, S, d_model), with L = S = h*w (h, w unused by LinearAttention).
    # d_model = 128 keeps loads/stores lane-dense; N = 16 with 8 sequences per
    # grid step gives 2 parallel grid steps (both v7x TensorCores busy) and
    # M = 128 matmul rows per step.
    N, h, w = 16, 4, 4
    L = S = h * w                 # 16 tokens
    d_model, n_heads = 128, 8
    d_ff = 2 * d_model

    key = jax.random.PRNGKey(0)
    kx, ksrc, kp = jax.random.split(key, 3)
    x = jax.random.normal(kx, (N, L, d_model), jnp.float32)
    source = jax.random.normal(ksrc, (N, S, d_model), jnp.float32)
    params = make_params(kp, d_model, n_heads, d_ff)

    ref = encoder_layer_ref(x, source, params, n_heads=n_heads)

    # f32 path: tight check of the kernel math (approx reciprocal is the only
    # non-exact step).
    out_f32 = jax.block_until_ready(
        encoder_layer_pallas(x, source, params, n_heads=n_heads,
                             block_batch=8, use_bf16=False))
    assert out_f32.shape == (N, L, d_model)
    err_f32 = float(jnp.max(jnp.abs(out_f32 - ref)))
    assert err_f32 < 5e-3, err_f32

    # bf16-MXU path (performance default): f32 accumulation, looser tolerance
    # commensurate with bf16 operand rounding.
    out = jax.block_until_ready(
        encoder_layer_pallas(x, source, params, n_heads=n_heads,
                             block_batch=8, use_bf16=True))
    assert out.shape == (N, L, d_model)
    err_bf16 = float(jnp.max(jnp.abs(out - ref)))
    assert err_bf16 < 1e-1, err_bf16

    print("KERNEL_OK")
</pallas_src>

<mosaic_0001>
module attributes {stable_mosaic.version = 11 : i64} {
  func.func @_encoder_layer_kernel(%arg0: i32, %arg1: memref<8x16x128xf32, #tpu.memory_space<vmem>>, %arg2: memref<8x16x128xf32, #tpu.memory_space<vmem>>, %arg3: memref<128x128xf32, #tpu.memory_space<vmem>>, %arg4: memref<128x128xf32, #tpu.memory_space<vmem>>, %arg5: memref<1x128xf32, #tpu.memory_space<vmem>>, %arg6: memref<128x128xf32, #tpu.memory_space<vmem>>, %arg7: memref<1x128xf32, #tpu.memory_space<vmem>>, %arg8: memref<128x128xf32, #tpu.memory_space<vmem>>, %arg9: memref<1x128xf32, #tpu.memory_space<vmem>>, %arg10: memref<128x128xf32, #tpu.memory_space<vmem>>, %arg11: memref<1x128xf32, #tpu.memory_space<vmem>>, %arg12: memref<128x256xf32, #tpu.memory_space<vmem>>, %arg13: memref<1x256xf32, #tpu.memory_space<vmem>>, %arg14: memref<256x128xf32, #tpu.memory_space<vmem>>, %arg15: memref<1x128xf32, #tpu.memory_space<vmem>>, %arg16: memref<1x128xf32, #tpu.memory_space<vmem>>, %arg17: memref<1x128xf32, #tpu.memory_space<vmem>>, %arg18: memref<1x128xf32, #tpu.memory_space<vmem>>, %arg19: memref<1x128xf32, #tpu.memory_space<vmem>>, %arg20: memref<8x16x128xf32, #tpu.memory_space<vmem>>) attributes {dimension_semantics = [#tpu.dimension_semantics<parallel>], iteration_bounds = array<i64: 2>, scalar_prefetch = 0 : i64, scratch_operands = 0 : i64, tpu.core_type = #tpu.core_type<tc>, window_params = [{transform_indices = @transform_0, window_bounds = array<i64: 8, 16, 128>}, {transform_indices = @transform_1, window_bounds = array<i64: 8, 16, 128>}, {pipeline_mode = #tpu.pipeline_mode<synchronous>, transform_indices = @transform_2, window_bounds = array<i64: 128, 128>}, {pipeline_mode = #tpu.pipeline_mode<synchronous>, transform_indices = @transform_3, window_bounds = array<i64: 128, 128>}, {pipeline_mode = #tpu.pipeline_mode<synchronous>, transform_indices = @transform_4, window_bounds = array<i64: 1, 128>}, {pipeline_mode = #tpu.pipeline_mode<synchronous>, transform_indices = @transform_5, window_bounds = array<i64: 128, 128>}, {pipeline_mode = #tpu.pipeline_mode<synchronous>, transform_indices = @transform_6, window_bounds = array<i64: 1, 128>}, {pipeline_mode = #tpu.pipeline_mode<synchronous>, transform_indices = @transform_7, window_bounds = array<i64: 128, 128>}, {pipeline_mode = #tpu.pipeline_mode<synchronous>, transform_indices = @transform_8, window_bounds = array<i64: 1, 128>}, {pipeline_mode = #tpu.pipeline_mode<synchronous>, transform_indices = @transform_9, window_bounds = array<i64: 128, 128>}, {pipeline_mode = #tpu.pipeline_mode<synchronous>, transform_indices = @transform_10, window_bounds = array<i64: 1, 128>}, {pipeline_mode = #tpu.pipeline_mode<synchronous>, transform_indices = @transform_11, window_bounds = array<i64: 128, 256>}, {pipeline_mode = #tpu.pipeline_mode<synchronous>, transform_indices = @transform_12, window_bounds = array<i64: 1, 256>}, {pipeline_mode = #tpu.pipeline_mode<synchronous>, transform_indices = @transform_13, window_bounds = array<i64: 256, 128>}, {pipeline_mode = #tpu.pipeline_mode<synchronous>, transform_indices = @transform_14, window_bounds = array<i64: 1, 128>}, {pipeline_mode = #tpu.pipeline_mode<synchronous>, transform_indices = @transform_15, window_bounds = array<i64: 1, 128>}, {pipeline_mode = #tpu.pipeline_mode<synchronous>, transform_indices = @transform_16, window_bounds = array<i64: 1, 128>}, {pipeline_mode = #tpu.pipeline_mode<synchronous>, transform_indices = @transform_17, window_bounds = array<i64: 1, 128>}, {pipeline_mode = #tpu.pipeline_mode<synchronous>, transform_indices = @transform_18, window_bounds = array<i64: 1, 128>}, {transform_indices = @transform_19, window_bounds = array<i64: 8, 16, 128>}]} {
    %c0 = arith.constant 0 : index
    %c0_0 = arith.constant 0 : index
    %c0_1 = arith.constant 0 : index
    %0 = vector.load %arg1[%c0, %c0_0, %c0_1] : memref<8x16x128xf32, #tpu.memory_space<vmem>>, vector<8x16x128xf32>
    %1 = vector.shape_cast %0 : vector<8x16x128xf32> to vector<128x128xf32>
    %c0_2 = arith.constant 0 : index
    %c0_3 = arith.constant 0 : index
    %c0_4 = arith.constant 0 : index
    %2 = vector.load %arg2[%c0_2, %c0_3, %c0_4] : memref<8x16x128xf32, #tpu.memory_space<vmem>>, vector<8x16x128xf32>
    %3 = vector.shape_cast %2 : vector<8x16x128xf32> to vector<128x128xf32>
    %c0_5 = arith.constant 0 : index
    %c0_6 = arith.constant 0 : index
    %4 = vector.load %arg3[%c0_5, %c0_6] : memref<128x128xf32, #tpu.memory_space<vmem>>, vector<128x128xf32>
    %c0_7 = arith.constant 0 : index
    %c0_8 = arith.constant 0 : index
    %5 = vector.load %arg5[%c0_7, %c0_8] : memref<1x128xf32, #tpu.memory_space<vmem>>, vector<1x128xf32>
    %c0_9 = arith.constant 0 : index
    %c0_10 = arith.constant 0 : index
    %6 = vector.load %arg7[%c0_9, %c0_10] : memref<1x128xf32, #tpu.memory_space<vmem>>, vector<1x128xf32>
    %c0_11 = arith.constant 0 : index
    %c0_12 = arith.constant 0 : index
    %7 = vector.load %arg9[%c0_11, %c0_12] : memref<1x128xf32, #tpu.memory_space<vmem>>, vector<1x128xf32>
    %c0_13 = arith.constant 0 : index
    %c0_14 = arith.constant 0 : index
    %8 = vector.load %arg11[%c0_13, %c0_14] : memref<1x128xf32, #tpu.memory_space<vmem>>, vector<1x128xf32>
    %c0_15 = arith.constant 0 : index
    %c0_16 = arith.constant 0 : index
    %9 = vector.load %arg13[%c0_15, %c0_16] : memref<1x256xf32, #tpu.memory_space<vmem>>, vector<1x256xf32>
    %c0_17 = arith.constant 0 : index
    %c0_18 = arith.constant 0 : index
    %10 = vector.load %arg15[%c0_17, %c0_18] : memref<1x128xf32, #tpu.memory_space<vmem>>, vector<1x128xf32>
    %c0_19 = arith.constant 0 : index
    %c0_20 = arith.constant 0 : index
    %11 = vector.load %arg16[%c0_19, %c0_20] : memref<1x128xf32, #tpu.memory_space<vmem>>, vector<1x128xf32>
    %c0_21 = arith.constant 0 : index
    %c0_22 = arith.constant 0 : index
    %12 = vector.load %arg17[%c0_21, %c0_22] : memref<1x128xf32, #tpu.memory_space<vmem>>, vector<1x128xf32>
    %c0_23 = arith.constant 0 : index
    %c0_24 = arith.constant 0 : index
    %13 = vector.load %arg18[%c0_23, %c0_24] : memref<1x128xf32, #tpu.memory_space<vmem>>, vector<1x128xf32>
    %c0_25 = arith.constant 0 : index
    %c0_26 = arith.constant 0 : index
    %14 = vector.load %arg19[%c0_25, %c0_26] : memref<1x128xf32, #tpu.memory_space<vmem>>, vector<1x128xf32>
    %c0_27 = arith.constant 0 : index
    %c0_28 = arith.constant 0 : index
    %15 = vector.load %arg4[%c0_27, %c0_28] : memref<128x128xf32, #tpu.memory_space<vmem>>, vector<128x128xf32>
    %cst = arith.constant dense<0.000000e+00> : vector<128x128xf32>
    %16 = tpu.matmul %1, %15, %cst {dimension_numbers = #tpu.dot_dimension_numbers<[1], [0], [0], [1], [0, 0, 1, 1], [], []>} : vector<128x128xf32>, vector<128x128xf32>, vector<128x128xf32> -> vector<128x128xf32>
    %17 = vector.broadcast %5 : vector<1x128xf32> to vector<128x128xf32>
    %18 = arith.addf %16, %17 : vector<128x128xf32>
    %cst_29 = arith.constant 0.000000e+00 : f32
    %19 = vector.broadcast %cst_29 : f32 to vector<128x128xf32>
    %20 = arith.cmpf ogt, %18, %19 : vector<128x128xf32>
    %cst_30 = arith.constant 1.000000e+00 : f32
    %21 = vector.broadcast %cst_30 : f32 to vector<128x128xf32>
    %22 = arith.addf %18, %21 : vector<128x128xf32>
    %23 = math.exp %18 : vector<128x128xf32>
    %24 = arith.select %20, %22, %23 : vector<128x128xi1>, vector<128x128xf32>
    %c0_31 = arith.constant 0 : index
    %c0_32 = arith.constant 0 : index
    %25 = vector.load %arg6[%c0_31, %c0_32] : memref<128x128xf32, #tpu.memory_space<vmem>>, vector<128x128xf32>
    %cst_33 = arith.constant dense<0.000000e+00> : vector<128x128xf32>
    %26 = tpu.matmul %3, %25, %cst_33 {dimension_numbers = #tpu.dot_dimension_numbers<[1], [0], [0], [1], [0, 0, 1, 1], [], []>} : vector<128x128xf32>, vector<128x128xf32>, vector<128x128xf32> -> vector<128x128xf32>
    %27 = vector.broadcast %6 : vector<1x128xf32> to vector<128x128xf32>
    %28 = arith.addf %26, %27 : vector<128x128xf32>
    %cst_34 = arith.constant 0.000000e+00 : f32
    %29 = vector.broadcast %cst_34 : f32 to vector<128x128xf32>
    %30 = arith.cmpf ogt, %28, %29 : vector<128x128xf32>
    %cst_35 = arith.constant 1.000000e+00 : f32
    %31 = vector.broadcast %cst_35 : f32 to vector<128x128xf32>
    %32 = arith.addf %28, %31 : vector<128x128xf32>
    %33 = math.exp %28 : vector<128x128xf32>
    %34 = arith.select %30, %32, %33 : vector<128x128xi1>, vector<128x128xf32>
    %c0_36 = arith.constant 0 : index
    %c0_37 = arith.constant 0 : index
    %35 = vector.load %arg8[%c0_36, %c0_37] : memref<128x128xf32, #tpu.memory_space<vmem>>, vector<128x128xf32>
    %cst_38 = arith.constant dense<0.000000e+00> : vector<128x128xf32>
    %36 = tpu.matmul %3, %35, %cst_38 {dimension_numbers = #tpu.dot_dimension_numbers<[1], [0], [0], [1], [0, 0, 1, 1], [], []>} : vector<128x128xf32>, vector<128x128xf32>, vector<128x128xf32> -> vector<128x128xf32>
    %37 = vector.broadcast %7 : vector<1x128xf32> to vector<128x128xf32>
    %38 = arith.addf %36, %37 : vector<128x128xf32>
    %39 = vector.shape_cast %24 : vector<128x128xf32> to vector<8x16x128xf32>
    %40 = vector.shape_cast %34 : vector<128x128xf32> to vector<8x16x128xf32>
    %41 = vector.shape_cast %38 : vector<128x128xf32> to vector<8x16x128xf32>
    "tpu.trace_start"() <{level = 10 : i32, message = "bsd,bse->bde"}> : () -> ()
    %cst_39 = arith.constant dense<0.000000e+00> : vector<8x128x128xf32>
    %42 = tpu.matmul %40, %41, %cst_39 {dimension_numbers = #tpu.dot_dimension_numbers<[1], [1], [2], [2], [0, 0, 0, 2, 1, 2], [0], [0]>} : vector<8x16x128xf32>, vector<8x16x128xf32>, vector<8x128x128xf32> -> vector<8x128x128xf32>
    "tpu.trace_stop"() : () -> ()
    %43 = vector.shape_cast %4 : vector<128x128xf32> to vector<1x128x128xf32>
    %44 = vector.broadcast %43 : vector<1x128x128xf32> to vector<8x128x128xf32>
    %45 = arith.mulf %42, %44 : vector<8x128x128xf32>
    "tpu.trace_start"() <{level = 10 : i32, message = "bld,bde->ble"}> : () -> ()
    %cst_40 = arith.constant dense<0.000000e+00> : vector<8x16x128xf32>
    %46 = tpu.matmul %39, %45, %cst_40 {dimension_numbers = #tpu.dot_dimension_numbers<[2], [1], [1], [2], [0, 0, 0, 1, 1, 2], [0], [0]>} : vector<8x16x128xf32>, vector<8x128x128xf32>, vector<8x16x128xf32> -> vector<8x16x128xf32>
    "tpu.trace_stop"() : () -> ()
    %cst_41 = arith.constant dense<0.000000e+00> : vector<8x128xf32>
    %47 = vector.multi_reduction <add>, %40, %cst_41 [1] : vector<8x16x128xf32> to vector<8x128xf32>
    %48 = vector.shape_cast %47 : vector<8x128xf32> to vector<8x1x128xf32>
    %49 = vector.broadcast %48 : vector<8x1x128xf32> to vector<8x16x128xf32>
    %50 = arith.mulf %39, %49 : vector<8x16x128xf32>
    %51 = vector.shape_cast %50 : vector<8x16x128xf32> to vector<128x128xf32>
    %cst_42 = arith.constant dense<0.000000e+00> : vector<128x128xf32>
    %52 = tpu.matmul %51, %4, %cst_42 {dimension_numbers = #tpu.dot_dimension_numbers<[1], [0], [0], [1], [0, 0, 1, 1], [], []>} : vector<128x128xf32>, vector<128x128xf32>, vector<128x128xf32> -> vector<128x128xf32>
    %cst_43 = arith.constant 9.99999997E-7 : f32
    %53 = vector.broadcast %cst_43 : f32 to vector<128x128xf32>
    %54 = arith.addf %52, %53 : vector<128x128xf32>
    %55 = tpu.reciprocal %54 {approx = true} : vector<128x128xf32> -> vector<128x128xf32>
    %56 = vector.shape_cast %46 : vector<8x16x128xf32> to vector<128x128xf32>
    %57 = arith.mulf %56, %55 : vector<128x128xf32>
    %c0_44 = arith.constant 0 : index
    %c0_45 = arith.constant 0 : index
    %58 = vector.load %arg10[%c0_44, %c0_45] : memref<128x128xf32, #tpu.memory_space<vmem>>, vector<128x128xf32>
    %cst_46 = arith.constant dense<0.000000e+00> : vector<128x128xf32>
    %59 = tpu.matmul %57, %58, %cst_46 {dimension_numbers = #tpu.dot_dimension_numbers<[1], [0], [0], [1], [0, 0, 1, 1], [], []>} : vector<128x128xf32>, vector<128x128xf32>, vector<128x128xf32> -> vector<128x128xf32>
    %60 = vector.broadcast %8 : vector<1x128xf32> to vector<128x128xf32>
    %61 = arith.addf %59, %60 : vector<128x128xf32>
    %62 = arith.addf %1, %61 : vector<128x128xf32>
    %cst_47 = arith.constant dense<0.000000e+00> : vector<128xf32>
    %63 = vector.multi_reduction <add>, %62, %cst_47 [1] : vector<128x128xf32> to vector<128xf32>
    %64 = vector.shape_cast %63 : vector<128xf32> to vector<128x1xf32>
    %cst_48 = arith.constant 1.280000e+02 : f32
    %65 = vector.broadcast %cst_48 : f32 to vector<128x1xf32>
    %66 = arith.divf %64, %65 : vector<128x1xf32>
    %67 = vector.broadcast %66 : vector<128x1xf32> to vector<128x128xf32>
    %68 = arith.subf %62, %67 : vector<128x128xf32>
    %69 = vector.broadcast %66 : vector<128x1xf32> to vector<128x128xf32>
    %70 = arith.subf %62, %69 : vector<128x128xf32>
    %71 = arith.mulf %68, %70 : vector<128x128xf32>
    %cst_49 = arith.constant dense<0.000000e+00> : vector<128xf32>
    %72 = vector.multi_reduction <add>, %71, %cst_49 [1] : vector<128x128xf32> to vector<128xf32>
    %73 = vector.shape_cast %72 : vector<128xf32> to vector<128x1xf32>
    %cst_50 = arith.constant 1.280000e+02 : f32
    %74 = vector.broadcast %cst_50 : f32 to vector<128x1xf32>
    %75 = arith.divf %73, %74 : vector<128x1xf32>
    %76 = vector.broadcast %66 : vector<128x1xf32> to vector<128x128xf32>
    %77 = arith.subf %62, %76 : vector<128x128xf32>
    %cst_51 = arith.constant 9.99999974E-6 : f32
    %78 = vector.broadcast %cst_51 : f32 to vector<128x1xf32>
    %79 = arith.addf %75, %78 : vector<128x1xf32>
    %80 = math.rsqrt %79 : vector<128x1xf32>
    %81 = vector.broadcast %80 : vector<128x1xf32> to vector<128x128xf32>
    %82 = arith.mulf %77, %81 : vector<128x128xf32>
    %83 = vector.broadcast %11 : vector<1x128xf32> to vector<128x128xf32>
    %84 = arith.mulf %82, %83 : vector<128x128xf32>
    %85 = vector.broadcast %12 : vector<1x128xf32> to vector<128x128xf32>
    %86 = arith.addf %84, %85 : vector<128x128xf32>
    %c0_52 = arith.constant 0 : index
    %c0_53 = arith.constant 0 : index
    %87 = vector.load %arg12[%c0_52, %c0_53] : memref<128x256xf32, #tpu.memory_space<vmem>>, vector<128x256xf32>
    %cst_54 = arith.constant dense<0.000000e+00> : vector<128x256xf32>
    %88 = tpu.matmul %86, %87, %cst_54 {dimension_numbers = #tpu.dot_dimension_numbers<[1], [0], [0], [1], [0, 0, 1, 1], [], []>} : vector<128x128xf32>, vector<128x256xf32>, vector<128x256xf32> -> vector<128x256xf32>
    %89 = vector.broadcast %9 : vector<1x256xf32> to vector<128x256xf32>
    %90 = arith.addf %88, %89 : vector<128x256xf32>
    %cst_55 = arith.constant 0.000000e+00 : f32
    %91 = vector.broadcast %cst_55 : f32 to vector<128x256xf32>
    %92 = arith.maximumf %90, %91 : vector<128x256xf32>
    %c0_56 = arith.constant 0 : index
    %c0_57 = arith.constant 0 : index
    %93 = vector.load %arg14[%c0_56, %c0_57] : memref<256x128xf32, #tpu.memory_space<vmem>>, vector<256x128xf32>
    %cst_58 = arith.constant dense<0.000000e+00> : vector<128x128xf32>
    %94 = tpu.matmul %92, %93, %cst_58 {dimension_numbers = #tpu.dot_dimension_numbers<[1], [0], [0], [1], [0, 0, 1, 1], [], []>} : vector<128x256xf32>, vector<256x128xf32>, vector<128x128xf32> -> vector<128x128xf32>
    %95 = vector.broadcast %10 : vector<1x128xf32> to vector<128x128xf32>
    %96 = arith.addf %94, %95 : vector<128x128xf32>
    %97 = arith.addf %86, %96 : vector<128x128xf32>
    %cst_59 = arith.constant dense<0.000000e+00> : vector<128xf32>
    %98 = vector.multi_reduction <add>, %97, %cst_59 [1] : vector<128x128xf32> to vector<128xf32>
    %99 = vector.shape_cast %98 : vector<128xf32> to vector<128x1xf32>
    %cst_60 = arith.constant 1.280000e+02 : f32
    %100 = vector.broadcast %cst_60 : f32 to vector<128x1xf32>
    %101 = arith.divf %99, %100 : vector<128x1xf32>
    %102 = vector.broadcast %101 : vector<128x1xf32> to vector<128x128xf32>
    %103 = arith.subf %97, %102 : vector<128x128xf32>
    %104 = vector.broadcast %101 : vector<128x1xf32> to vector<128x128xf32>
    %105 = arith.subf %97, %104 : vector<128x128xf32>
    %106 = arith.mulf %103, %105 : vector<128x128xf32>
    %cst_61 = arith.constant dense<0.000000e+00> : vector<128xf32>
    %107 = vector.multi_reduction <add>, %106, %cst_61 [1] : vector<128x128xf32> to vector<128xf32>
    %108 = vector.shape_cast %107 : vector<128xf32> to vector<128x1xf32>
    %cst_62 = arith.constant 1.280000e+02 : f32
    %109 = vector.broadcast %cst_62 : f32 to vector<128x1xf32>
    %110 = arith.divf %108, %109 : vector<128x1xf32>
    %111 = vector.broadcast %101 : vector<128x1xf32> to vector<128x128xf32>
    %112 = arith.subf %97, %111 : vector<128x128xf32>
    %cst_63 = arith.constant 9.99999974E-6 : f32
    %113 = vector.broadcast %cst_63 : f32 to vector<128x1xf32>
    %114 = arith.addf %110, %113 : vector<128x1xf32>
    %115 = math.rsqrt %114 : vector<128x1xf32>
    %116 = vector.broadcast %115 : vector<128x1xf32> to vector<128x128xf32>
    %117 = arith.mulf %112, %116 : vector<128x128xf32>
    %118 = vector.broadcast %13 : vector<1x128xf32> to vector<128x128xf32>
    %119 = arith.mulf %117, %118 : vector<128x128xf32>
    %120 = vector.broadcast %14 : vector<1x128xf32> to vector<128x128xf32>
    %121 = arith.addf %119, %120 : vector<128x128xf32>
    %122 = vector.shape_cast %121 : vector<128x128xf32> to vector<8x16x128xf32>
    %c0_64 = arith.constant 0 : index
    %c0_65 = arith.constant 0 : index
    %c0_66 = arith.constant 0 : index
    %123 = vector.load %arg20[%c0_64, %c0_65, %c0_66] : memref<8x16x128xf32, #tpu.memory_space<vmem>>, vector<8x16x128xf32>
    tpu.vector_store %arg20[%c0_64, %c0_65, %c0_66], %122 {strides = array<i32>} : memref<8x16x128xf32, #tpu.memory_space<vmem>>, vector<8x16x128xf32>,
    return
  }
  func.func @transform_0(%arg0: i32) -> (i32, i32, i32) {
    %c0_i32 = arith.constant 0 : i32
    %c0_i32_0 = arith.constant 0 : i32
    %c0_i32_1 = arith.constant 0 : i32
    return %arg0, %c0_i32, %c0_i32_0 : i32, i32, i32
  }
  func.func @transform_1(%arg0: i32) -> (i32, i32, i32) {
    %c0_i32 = arith.constant 0 : i32
    %c0_i32_0 = arith.constant 0 : i32
    %c0_i32_1 = arith.constant 0 : i32
    return %arg0, %c0_i32, %c0_i32_0 : i32, i32, i32
  }
  func.func @transform_2(%arg0: i32) -> (i32, i32) {
    %c0_i32 = arith.constant 0 : i32
    %c0_i32_0 = arith.constant 0 : i32
    %c0_i32_1 = arith.constant 0 : i32
    return %c0_i32, %c0_i32_0 : i32, i32
  }
  func.func @transform_3(%arg0: i32) -> (i32, i32) {
    %c0_i32 = arith.constant 0 : i32
    %c0_i32_0 = arith.constant 0 : i32
    %c0_i32_1 = arith.constant 0 : i32
    return %c0_i32, %c0_i32_0 : i32, i32
  }
  func.func @transform_4(%arg0: i32) -> (i32, i32) {
    %c0_i32 = arith.constant 0 : i32
    %c0_i32_0 = arith.constant 0 : i32
    %c0_i32_1 = arith.constant 0 : i32
    return %c0_i32, %c0_i32_0 : i32, i32
  }
  func.func @transform_5(%arg0: i32) -> (i32, i32) {
    %c0_i32 = arith.constant 0 : i32
    %c0_i32_0 = arith.constant 0 : i32
    %c0_i32_1 = arith.constant 0 : i32
    return %c0_i32, %c0_i32_0 : i32, i32
  }
  func.func @transform_6(%arg0: i32) -> (i32, i32) {
    %c0_i32 = arith.constant 0 : i32
    %c0_i32_0 = arith.constant 0 : i32
    %c0_i32_1 = arith.constant 0 : i32
    return %c0_i32, %c0_i32_0 : i32, i32
  }
  func.func @transform_7(%arg0: i32) -> (i32, i32) {
    %c0_i32 = arith.constant 0 : i32
    %c0_i32_0 = arith.constant 0 : i32
    %c0_i32_1 = arith.constant 0 : i32
    return %c0_i32, %c0_i32_0 : i32, i32
  }
  func.func @transform_8(%arg0: i32) -> (i32, i32) {
    %c0_i32 = arith.constant 0 : i32
    %c0_i32_0 = arith.constant 0 : i32
    %c0_i32_1 = arith.constant 0 : i32
    return %c0_i32, %c0_i32_0 : i32, i32
  }
  func.func @transform_9(%arg0: i32) -> (i32, i32) {
    %c0_i32 = arith.constant 0 : i32
    %c0_i32_0 = arith.constant 0 : i32
    %c0_i32_1 = arith.constant 0 : i32
    return %c0_i32, %c0_i32_0 : i32, i32
  }
  func.func @transform_10(%arg0: i32) -> (i32, i32) {
    %c0_i32 = arith.constant 0 : i32
    %c0_i32_0 = arith.constant 0 : i32
    %c0_i32_1 = arith.constant 0 : i32
    return %c0_i32, %c0_i32_0 : i32, i32
  }
  func.func @transform_11(%arg0: i32) -> (i32, i32) {
    %c0_i32 = arith.constant 0 : i32
    %c0_i32_0 = arith.constant 0 : i32
    %c0_i32_1 = arith.constant 0 : i32
    return %c0_i32, %c0_i32_0 : i32, i32
  }
  func.func @transform_12(%arg0: i32) -> (i32, i32) {
    %c0_i32 = arith.constant 0 : i32
    %c0_i32_0 = arith.constant 0 : i32
    %c0_i32_1 = arith.constant 0 : i32
    return %c0_i32, %c0_i32_0 : i32, i32
  }
  func.func @transform_13(%arg0: i32) -> (i32, i32) {
    %c0_i32 = arith.constant 0 : i32
    %c0_i32_0 = arith.constant 0 : i32
    %c0_i32_1 = arith.constant 0 : i32
    return %c0_i32, %c0_i32_0 : i32, i32
  }
  func.func @transform_14(%arg0: i32) -> (i32, i32) {
    %c0_i32 = arith.constant 0 : i32
    %c0_i32_0 = arith.constant 0 : i32
    %c0_i32_1 = arith.constant 0 : i32
    return %c0_i32, %c0_i32_0 : i32, i32
  }
  func.func @transform_15(%arg0: i32) -> (i32, i32) {
    %c0_i32 = arith.constant 0 : i32
    %c0_i32_0 = arith.constant 0 : i32
    %c0_i32_1 = arith.constant 0 : i32
    return %c0_i32, %c0_i32_0 : i32, i32
  }
  func.func @transform_16(%arg0: i32) -> (i32, i32) {
    %c0_i32 = arith.constant 0 : i32
    %c0_i32_0 = arith.constant 0 : i32
    %c0_i32_1 = arith.constant 0 : i32
    return %c0_i32, %c0_i32_0 : i32, i32
  }
  func.func @transform_17(%arg0: i32) -> (i32, i32) {
    %c0_i32 = arith.constant 0 : i32
    %c0_i32_0 = arith.constant 0 : i32
    %c0_i32_1 = arith.constant 0 : i32
    return %c0_i32, %c0_i32_0 : i32, i32
  }
  func.func @transform_18(%arg0: i32) -> (i32, i32) {
    %c0_i32 = arith.constant 0 : i32
    %c0_i32_0 = arith.constant 0 : i32
    %c0_i32_1 = arith.constant 0 : i32
    return %c0_i32, %c0_i32_0 : i32, i32
  }
  func.func @transform_19(%arg0: i32) -> (i32, i32, i32) {
    %c0_i32 = arith.constant 0 : i32
    %c0_i32_0 = arith.constant 0 : i32
    %c0_i32_1 = arith.constant 0 : i32
    return %arg0, %c0_i32, %c0_i32_0 : i32, i32, i32
  }
}

</mosaic_0001>

<bundles_post_ra>
// kernel: tpu_custom_call.1
= control target key start
LH: loop header
LB: loop body
LE: loop exit
PB: predicated region body
PF: predicated region fallthrough
CT: control target
= control target key end

     0   :  { %s10078_s0 = inlined_call_operand.hbm [shape: f32[16,16,128], index: 0, kind: input, shape index: {}]   ;;  %s10079_s1 = inlined_call_operand.hbm [shape: f32[16,16,128], index: 1, kind: input, shape index: {}]   ;;  %s10080_s2 = inlined_call_operand.hbm [shape: f32[128,128], index: 2, kind: input, shape index: {}]   ;;  %s10081_s3 = inlined_call_operand.hbm [shape: f32[128,128], index: 3, kind: input, shape index: {}]   ;;  %s10082_s4 = inlined_call_operand.vmem [shape: f32[1,128], index: 4, kind: input, shape index: {}]   ;;  %s10083_s5 = inlined_call_operand.hbm [shape: f32[128,128], index: 5, kind: input, shape index: {}]   ;;  %s10084_s6 = inlined_call_operand.vmem [shape: f32[1,128], index: 6, kind: input, shape index: {}]   ;;  %s10085_s7 = inlined_call_operand.hbm [shape: f32[128,128], index: 7, kind: input, shape index: {}]   ;;  %s10086_s8 = inlined_call_operand.vmem [shape: f32[1,128], index: 8, kind: input, shape index: {}]   ;;  %s10087_s9 = inlined_call_operand.hbm [shape: f32[128,128], index: 9, kind: input, shape index: {}]   ;;  %s10088_s10 = inlined_call_operand.vmem [shape: f32[1,128], index: 10, kind: input, shape index: {}]   ;;  %s10089_s11 = inlined_call_operand.hbm [shape: f32[128,256], index: 11, kind: input, shape index: {}]   ;;  %s10090_s12 = inlined_call_operand.vmem [shape: f32[1,256], index: 12, kind: input, shape index: {}]   ;;  %s10091_s13 = inlined_call_operand.hbm [shape: f32[256,128], index: 13, kind: input, shape index: {}]   ;;  %s10092_s14 = inlined_call_operand.vmem [shape: f32[1,128], index: 14, kind: input, shape index: {}]   ;;  %s10093_s15 = inlined_call_operand.vmem [shape: f32[1,128], index: 15, kind: input, shape index: {}]   ;;  %s10094_s16 = inlined_call_operand.vmem [shape: f32[1,128], index: 16, kind: input, shape index: {}]   ;;  %s10095_s17 = inlined_call_operand.vmem [shape: f32[1,128], index: 17, kind: input, shape index: {}]   ;;  %s10096_s18 = inlined_call_operand.vmem [shape: f32[1,128], index: 18, kind: input, shape index: {}]   ;;  %s10097_s19 = inlined_call_operand.hbm [shape: f32[16,16,128], index: 19, kind: output, shape index: {}]  }
   0x1   :  { %10113 = sst [smem:[#allocation27_spill]] %s10078_s0 }
   0x2   :  { %10114 = sst [smem:[#allocation28_spill]] %s10079_s1 }
   0x3   :  { %10115 = sst [smem:[#allocation29_spill]] %s10080_s2 }
   0x4   :  { %10116 = sst [smem:[#allocation30_spill]] %s10081_s3 }
   0x5   :  { %10117 = sst [smem:[#allocation31_spill]] %s10083_s5 }
   0x6   :  { %10118 = sst [smem:[#allocation32_spill]] %s10085_s7 }
   0x7   :  { %10119 = sst [smem:[#allocation33_spill]] %s10086_s8 }
   0x8   :  { %10120 = sst [smem:[#allocation34_spill]] %s10087_s9 }
   0x9   :  { %10121 = sst [smem:[#allocation35_spill]] %s10088_s10 }
   0xa   :  { %10122 = sst [smem:[#allocation36_spill]] %s10089_s11 }
   0xb   :  { %10123 = sst [smem:[#allocation37_spill]] %s10090_s12 }
   0xc   :  { %10124 = sst [smem:[#allocation38_spill]] %s10091_s13 }
   0xd   :  { %10125 = sst [smem:[#allocation39_spill]] %s10092_s14 }
   0xe   :  { %10126 = sst [smem:[#allocation40_spill]] %s10093_s15 }
   0xf   :  { %10127 = sst [smem:[#allocation41_spill]] %s10094_s16 }
  0x10   :  { %10128 = sst [smem:[#allocation42_spill]] %s10095_s17 }
  0x11   :  { %10129 = sst [smem:[#allocation43_spill]] %s10096_s18 }
  0x12   :  { %10130 = sst [smem:[#allocation44_spill]] %s10097_s19 }
  0x13   :  { %24 = vsyncpa [#allocation3], 0 }
  0x14   :  { %26 = vsyncpa [#allocation3 + $0x1], 0 }
  0x15   :  { %27 = vsyncpa [#allocation6], 0 }
  0x16   :  { %29 = vsyncpa [#allocation6 + $0x1], 0 }
  0x17   :  { %30 = vsyncpa [#allocation9], 0 }
  0x18   :  { %31 = vsyncpa [#allocation12], 0 }
  0x19   :  { %32 = vsyncpa [#allocation15], 0 }
  0x1a   :  { %33 = vsyncpa [#allocation4], 0 }
  0x1b   :  { %35 = vsyncpa [#allocation4 + $0x1], 0  ;;  %s8316_s0 = smov 0   ;;  %s8318_s30 = smov 0  }
  0x1c   :  { %s8320_s20 = smov 0   ;;  %s8322_s21 = smov 0  }
  0x1d LB: > { %10131 = sst [smem:[#allocation25_spill]] %s8193_s20  ;;  %s8199_s1 = smov [#allocation7]   ;;  %s8197_s21 = sphi %s8322_s21, %s10177_s21   ;;  %s8193_s20 = sphi %s8320_s20, %s10174_s20   ;;  %s8189_s30 = sphi %s8318_s30, %s10176_s30   ;;  %s8185_s0 = sphi %s8316_s0, %s10175_s0  }
  0x1e   : > { %s493_s22 = sshll.u32 %s8199_s1, 4  ;;  %s8337_s2 = sadd.s32 4294967295, %s8197_s21   ;;  %s8342_s22 = int_to_ptr.vmem [resolvable:$true] %s493_s22 }
  0x1f   : > { %p5517_p0 = scmp.ge.s32.totalorder %s8197_s21, 1  ;;  %p10103_p1 = scmp.eq.s32.totalorder %s8337_s2, 0 }
  0x20   : > { %p481_p2 = scmp.lt.s32.totalorder %s8197_s21, 3  ;;  %s8200_s24 = smov [#allocation8]  }
  0x21   : > { %s506_s25 = sshll.u32 %s8200_s24, 4  ;;  %s8201_s26 = smov [#allocation11]   ;;  %s8357_s25 = int_to_ptr.vmem [resolvable:$true] %s506_s25 }
  0x22   : > { %p8344_p3 = pnand %p5517_p0, %p481_p2  ;;  %s538_s27 = sshll.u32 %s8201_s26, 4  ;;  %s8359_s27 = int_to_ptr.vmem [resolvable:$true] %s538_s27 }
  0x23   : > { %s10134_s1 = sld [smem:[#allocation29_spill]] }
  0x24   : > { %s10132_s23 = scalar_select %p8344_p3, 1, 0 }
  0x25   : > { %p7568_p5 = pneg %p8344_p3 }
  0x27   : > { %p8353_p6 = pnand %p7568_p5, %p10103_p1 }
  0x29   : > { %s7855_s19 = scalar_lea.hbm %s10134_s1, 2048  ;;  %p8369_p8 = pneg %p8353_p6 }
  0x2a   : > { %p7856_p7 = scmp.ne.s32.totalorder %s10134_s1, %s7855_s19  ;;  %p7862_p11 = scmp.lt.u32.totalorder %s7855_s19, %s10134_s1 }
  0x2c   : > { %p7858_p9 = pnand %p8369_p8, %p7856_p7 }
  0x2e   : > { %p7859_p10 = pneg %p7858_p9 }
  0x30   : > { %p7864_p12 = pnand %p7862_p11, %p7859_p10 }
  0x32   : > { %7867 = shalt.err (!%p7864_p12)
}
  0x33   : > { %s7868_s17 = scalar_lea.vmem %s8342_s22, 2048  ;;  %p7876_p5 = scmp.lt.s32.totalorder %s8342_s22, %s8342_s22 }
  0x34   : > { %p7869_p13 = scmp.ne.s32.totalorder %s8342_s22, %s7868_s17  ;;  %p7877_p4 = scmp.lt.s32.totalorder %s7868_s17, %s7868_s17 }
  0x36   : > { %p7871_p0 = pnand %p7869_p13, %p8369_p8  ;;  %p7878_p7 = por %p7877_p4, %p7876_p5 }
  0x38   : > { %p7872_p2 = pneg %p7871_p0 }
  0x3a   : > { %p7879_p9 = pnand %p7878_p7, %p7872_p2 }
  0x3c   : > { %7882 = shalt.err (!%p7879_p9)
}
  0x3d   : > { %s10105_s18 = smov 128   ;;  %s10107_s14 = smov 8  }
  0x3e   : > { %7571 = dma.hbm_to_vmem [thread:$0]  (!%p8353_p6), %s10134_s1, 2048, %s8342_s22, [#allocation6], %s10105_s18, %s10105_s18, %s10107_s14  }
  0x3f   : > { %s10136_s12 = sld [smem:[#allocation30_spill]] }
  0x45   : > { %s7883_s17 = scalar_lea.hbm %s10136_s12, 2048 }
  0x46   : > { %p7884_p4 = scmp.ne.s32.totalorder %s10136_s12, %s7883_s17  ;;  %p7890_p12 = scmp.lt.u32.totalorder %s7883_s17, %s10136_s12 }
  0x48   : > { %p7886_p10 = pnand %p7884_p4, %p8369_p8 }
  0x4a   : > { %p7887_p11 = pneg %p7886_p10 }
  0x4c   : > { %p7892_p13 = pnand %p7890_p12, %p7887_p11 }
  0x4e   : > { %7895 = shalt.err (!%p7892_p13)
}
  0x4f   : > { %s7896_s22 = scalar_lea.vmem %s8357_s25, 2048  ;;  %p7904_p7 = scmp.lt.s32.totalorder %s8357_s25, %s8357_s25 }
  0x50   : > { %p7897_p0 = scmp.ne.s32.totalorder %s8357_s25, %s7896_s22  ;;  %p7905_p9 = scmp.lt.s32.totalorder %s7896_s22, %s7896_s22 }
  0x52   : > { %p7899_p2 = pnand %p7897_p0, %p8369_p8  ;;  %p7906_p4 = por %p7905_p9, %p7904_p7 }
  0x54   : > { %p7900_p5 = pneg %p7899_p2 }
  0x56   : > { %p7907_p10 = pnand %p7906_p4, %p7900_p5 }
  0x58   : > { %7910 = shalt.err (!%p7907_p10)
}
  0x59   : > { %7574 = dma.hbm_to_vmem [thread:$0]  (!%p8353_p6), %s10136_s12, 2048, %s8357_s25, [#allocation9], %s10105_s18, %s10105_s18, %s10107_s14  }
  0x5a   : > { %s10137_s7 = sld [smem:[#allocation32_spill]] }
  0x60   : > { %s7911_s19 = scalar_lea.hbm %s10137_s7, 2048 }
  0x61   : > { %p7912_p11 = scmp.ne.s32.totalorder %s10137_s7, %s7911_s19  ;;  %p7918_p0 = scmp.lt.u32.totalorder %s7911_s19, %s10137_s7 }
  0x63   : > { %p7914_p12 = pnand %p7912_p11, %p8369_p8 }
  0x65   : > { %p7915_p13 = pneg %p7914_p12 }
  0x67   : > { %p7920_p2 = pnand %p7918_p0, %p7915_p13 }
  0x69   : > { %7923 = shalt.err (!%p7920_p2)
}
  0x6a   : > { %s7924_s25 = scalar_lea.vmem %s8359_s27, 2048  ;;  %p7932_p4 = scmp.lt.s32.totalorder %s8359_s27, %s8359_s27 }
  0x6b   : > { %p7925_p5 = scmp.ne.s32.totalorder %s8359_s27, %s7924_s25  ;;  %p7933_p10 = scmp.lt.s32.totalorder %s7924_s25, %s7924_s25 }
  0x6d   : > { %p7927_p7 = pnand %p7925_p5, %p8369_p8  ;;  %p7934_p11 = por %p7933_p10, %p7932_p4 }
  0x6f   : > { %p7928_p9 = pneg %p7927_p7 }
  0x71   : > { %p7935_p12 = pnand %p7934_p11, %p7928_p9 }
  0x73   : > { %7938 = shalt.err (!%p7935_p12)
}
  0x74   : > { %7580 = dma.hbm_to_vmem [thread:$0]  (!%p8353_p6), %s10137_s7, 2048, %s8359_s27, [#allocation12], %s10105_s18, %s10105_s18, %s10107_s14  }
  0x75   : > { %s8204_s10 = smov [#allocation14]   ;;  %s10138_s11 = sld [smem:[#allocation36_spill]] }
  0x76   : > { %s570_s15 = sshll.u32 %s8204_s10, 4  ;;  %s571_s15 = int_to_ptr.vmem [resolvable:$true] %s570_s15 }
  0x7b   : > { %s7939_s28 = scalar_lea.hbm %s10138_s11, 4096 }
  0x7c   : > { %p7940_p13 = scmp.ne.s32.totalorder %s10138_s11, %s7939_s28  ;;  %p7946_p5 = scmp.lt.u32.totalorder %s7939_s28, %s10138_s11 }
  0x7e   : > { %p7942_p0 = pnand %p7940_p13, %p8369_p8 }
  0x80   : > { %p7943_p2 = pneg %p7942_p0 }
  0x82   : > { %p7948_p7 = pnand %p7946_p5, %p7943_p2 }
  0x84   : > { %7951 = shalt.err (!%p7948_p7)
}
  0x85   : > { %s7952_s27 = scalar_lea.vmem %s571_s15, 4096  ;;  %p7960_p11 = scmp.lt.s32.totalorder %s571_s15, %s571_s15 }
  0x86   : > { %p7953_p9 = scmp.ne.s32.totalorder %s571_s15, %s7952_s27  ;;  %p7961_p12 = scmp.lt.s32.totalorder %s7952_s27, %s7952_s27 }
  0x88   : > { %p7955_p4 = pnand %p7953_p9, %p8369_p8  ;;  %p7962_p1 = por %p7961_p12, %p7960_p11 }
  0x8a   : > { %p7956_p10 = pneg %p7955_p4 }
  0x8c   : > { %p7963_p3 = pnand %p7962_p1, %p7956_p10 }
  0x8e   : > { %7966 = shalt.err (!%p7963_p3)
}
  0x8f   : > { %s8205_s22 = smov 256   ;;  %s8206_s8 = smov 16  }
  0x90   : > { %7586 = dma.hbm_to_vmem [thread:$0]  (!%p8353_p6), %s10138_s11, 4096, %s571_s15, [#allocation15], %s8205_s22, %s8205_s22, %s8206_s8  }
  0x91   : > { %s8207_s19 = smov [#allocation10]   ;;  %s8208_s29 = smov [#allocation13]  }
  0x92   : > { %s522_s28 = sshll.u32 %s8207_s19, 4  ;;  %s554_s26 = sshll.u32 %s8208_s29, 4  ;;  %s523_s28 = int_to_ptr.vmem [resolvable:$true] %s522_s28  ;;  %s8463_s26 = int_to_ptr.vmem [resolvable:$true] %s554_s26 }
  0x93   : > { %s10139_s5 = sld [smem:[#allocation31_spill]] }
  0x99   : > { %s7967_s27 = scalar_lea.hbm %s10139_s5, 2048 }
  0x9a   : > { %p7968_p1 = scmp.ne.s32.totalorder %s10139_s5, %s7967_s27  ;;  %p7974_p0 = scmp.lt.u32.totalorder %s7967_s27, %s10139_s5 }
  0x9c   : > { %p7970_p3 = pnand %p7968_p1, %p8369_p8 }
  0x9e   : > { %p7971_p13 = pneg %p7970_p3 }
  0xa0   : > { %p7976_p2 = pnand %p7974_p0, %p7971_p13 }
  0xa2   : > { %7979 = shalt.err (!%p7976_p2)
}
  0xa3   : > { %s7980_s22 = scalar_lea.vmem %s523_s28, 2048  ;;  %p7988_p4 = scmp.lt.s32.totalorder %s523_s28, %s523_s28 }
  0xa4   : > { %p7981_p5 = scmp.ne.s32.totalorder %s523_s28, %s7980_s22  ;;  %p7989_p10 = scmp.lt.s32.totalorder %s7980_s22, %s7980_s22 }
  0xa6   : > { %p7983_p7 = pnand %p7981_p5, %p8369_p8  ;;  %p7990_p11 = por %p7989_p10, %p7988_p4 }
  0xa8   : > { %p7984_p9 = pneg %p7983_p7 }
  0xaa   : > { %p7991_p12 = pnand %p7990_p11, %p7984_p9 }
  0xac   : > { %7994 = shalt.err (!%p7991_p12)
}
  0xad   : > { %s10140_s18 = smov 8   ;;  %s10141_s14 = smov 128  }
  0xae   : > { %7577 = dma.hbm_to_vmem [thread:$0]  (!%p8353_p6), %s10139_s5, 2048, %s523_s28, [#allocation9], %s10141_s14, %s10141_s14, %s10140_s18  }
  0xaf   : > { %s10142_s9 = sld [smem:[#allocation34_spill]] }
  0xb5   : > { %s7995_s17 = scalar_lea.hbm %s10142_s9, 2048 }
  0xb6   : > { %p7996_p1 = scmp.ne.s32.totalorder %s10142_s9, %s7995_s17  ;;  %p8002_p0 = scmp.lt.u32.totalorder %s7995_s17, %s10142_s9 }
  0xb8   : > { %p7998_p3 = pnand %p7996_p1, %p8369_p8 }
  0xba   : > { %p7999_p13 = pneg %p7998_p3 }
  0xbc   : > { %p8004_p2 = pnand %p8002_p0, %p7999_p13 }
  0xbe   : > { %8007 = shalt.err (!%p8004_p2)
}
  0xbf   : > { %s8008_s28 = scalar_lea.vmem %s8463_s26, 2048  ;;  %p8016_p4 = scmp.lt.s32.totalorder %s8463_s26, %s8463_s26 }
  0xc0   : > { %p8009_p5 = scmp.ne.s32.totalorder %s8463_s26, %s8008_s28  ;;  %p8017_p10 = scmp.lt.s32.totalorder %s8008_s28, %s8008_s28 }
  0xc2   : > { %p8011_p7 = pnand %p8009_p5, %p8369_p8  ;;  %p8018_p11 = por %p8017_p10, %p8016_p4 }
  0xc4   : > { %p8012_p9 = pneg %p8011_p7 }
  0xc6   : > { %p8019_p12 = pnand %p8018_p11, %p8012_p9 }
  0xc8   : > { %8022 = shalt.err (!%p8019_p12)
}
  0xc9   : > { %7583 = dma.hbm_to_vmem [thread:$0]  (!%p8353_p6), %s10142_s9, 2048, %s8463_s26, [#allocation12], %s10141_s14, %s10141_s14, %s10140_s18  }
  0xca   : > { %s8209_s16 = smov [#allocation16]   ;;  %s10143_s13 = sld [smem:[#allocation38_spill]] }
  0xcb   : > { %s586_s19 = sshll.u32 %s8209_s16, 4  ;;  %s587_s19 = int_to_ptr.vmem [resolvable:$true] %s586_s19 }
  0xd0   : > { %s8023_s25 = scalar_lea.hbm %s10143_s13, 4096 }
  0xd1   : > { %p8024_p1 = scmp.ne.s32.totalorder %s10143_s13, %s8023_s25  ;;  %p8030_p0 = scmp.lt.u32.totalorder %s8023_s25, %s10143_s13 }
  0xd3   : > { %p8026_p3 = pnand %p8024_p1, %p8369_p8 }
  0xd5   : > { %p8027_p13 = pneg %p8026_p3 }
  0xd7   : > { %p8032_p2 = pnand %p8030_p0, %p8027_p13 }
  0xd9   : > { %8035 = shalt.err (!%p8032_p2)
}
  0xda   : > { %s8036_s26 = scalar_lea.vmem %s587_s19, 4096  ;;  %p8044_p4 = scmp.lt.s32.totalorder %s587_s19, %s587_s19 }
  0xdb   : > { %p8037_p5 = scmp.ne.s32.totalorder %s587_s19, %s8036_s26  ;;  %p8045_p10 = scmp.lt.s32.totalorder %s8036_s26, %s8036_s26 }
  0xdd   : > { %p8039_p7 = pnand %p8037_p5, %p8369_p8  ;;  %p8046_p11 = por %p8045_p10, %p8044_p4 }
  0xdf   : > { %p8040_p9 = pneg %p8039_p7 }
  0xe1   : > { %p8047_p12 = pnand %p8046_p11, %p8040_p9 }
  0xe3   : > { %8050 = shalt.err (!%p8047_p12)
}
  0xe4   : > { %7589 = dma.hbm_to_vmem [thread:$0]  (!%p8353_p6), %s10143_s13, 4096, %s587_s19, [#allocation15], %s10141_s14, %s10141_s14, %s10140_s18  }
  0xe5   : > { %s5516_s3 = sadd.s32 4294967294, %s8197_s21   ;;  %s8535_s24 = sadd.s32 1, %s8197_s21  }
  0xe6   : > { %s48_s16 = sadd.s32 1, %s8193_s20  ;;  %s45_s29 = ssub.s32 %s8197_s21, %s8535_s24 }
  0xe7   : > { %p55_p8 = scmp.ne.s32.totalorder %s8193_s20, %s8189_s30  ;;  %p46_p1 = scmp.eq.s32.totalorder %s45_s29, 0 }
  0xe8   : > { %p56_p3 = scmp.eq.s32.totalorder %s8197_s21, 0  ;;  %p61_p13 = scmp.ne.s32.totalorder %s8189_s30, %s8185_s0 }
  0xe9   : > { %p468_p0 = scmp.eq.s32.totalorder %s8337_s2, 1  ;;  %p10145_p5 = scmp.eq.s32.totalorder %s8337_s2, 0 }
  0xea   : > { %s8547_s17 = scalar_select %p46_p1, %s8193_s20, %s48_s16  }
  0xeb   : > { %p57_p2 = por %p56_p3, %p55_p8  ;;  %p8551_p7 = por %p10145_p5, %p61_p13 }
  0xec   : > { %10144 = sst [smem:[#allocation26_spill]] %s8547_s17  ;;  %p8555_p6 = por %p468_p0, %p55_p8 }
  0xed   : > { %p474_p9 = scmp.eq.s32.totalorder %s5516_s3, 1  ;;  %p7608_p4 = scmp.lt.s32.totalorder %s8197_s21, 2 }
  0xee   : > { %s10147_s19 = scalar_select %p8555_p6, 1, 0 }
  0xef   : > { %s615_s27 = sand.u32 1, %s8193_s20   ;;  %p8561_p10 = por %p474_p9, %p61_p13 }
  0xf0   : > { %s8565_s15 = sshll.u32 %s615_s27, 7  ;;  %s5689_s28 = sshll.u32 %s8197_s21, 11 }
  0xf1   : > { %s10148_s10 = scalar_select %p8561_p10, 1, 0 }
  0xf2   : > { %s10149_s8 = sld [smem:[#allocation27_spill]]  ;;  %s619_s3 = scalar_lea.vmem [#allocation2], %s8565_s15 }
  0xf3   : > { %s627_s29 = sshll.u32 %s619_s3, 4  ;;  %p8574_p11 = pnand %p7608_p4, %p57_p2  ;;  %s8578_s29 = int_to_ptr.vmem [resolvable:$true] %s627_s29 }
  0xf4   : > { %s10151_s9 = sld [smem:[#allocation28_spill]]  ;;  %s8585_s22 = scalar_lea.sflag [#allocation3], %s615_s27 }
  0xf5   : > { %p8053_p8 = pneg %p8574_p11 }
  0xf8   : > { %s8571_s16 = scalar_lea.hbm %s10149_s8, %s5689_s28  ;;  %s8056_s13 = scalar_lea.hbm %s10149_s8, 4096 }
  0xf9   : > { %s8051_s11 = scalar_lea.hbm %s8571_s16, 2048  ;;  %p8057_p13 = scmp.lt.u32.totalorder %s8571_s16, %s10149_s8 }
  0xfa   : > { %s8583_s26 = scalar_lea.hbm %s10151_s9, %s5689_s28  ;;  %p8052_p12 = scmp.ne.s32.totalorder %s8571_s16, %s8051_s11 }
  0xfb   : > { %p8058_p0 = scmp.lt.u32.totalorder %s8056_s13, %s8051_s11  ;;  %p8060_p5 = scmp.lt.u32.totalorder %s8051_s11, %s8571_s16 }
  0xfc   : > { %p8054_p1 = pnand %p8053_p8, %p8052_p12 }
  0xfd   : > { %p8059_p2 = por %p8058_p0, %p8057_p13 }
  0xfe   : > { %p8055_p3 = pneg %p8054_p1 }
  0xff   : > { %p8061_p9 = por %p8060_p5, %p8059_p2 }
 0x101   : > { %p8062_p4 = pnand %p8061_p9, %p8055_p3 }
 0x103   : > { %8065 = shalt.err (!%p8062_p4)
}
 0x104   : > { %s8066_s5 = scalar_lea.vmem %s8578_s29, 2048  ;;  %s8210_s7 = smov [#allocation2]  }
 0x105   : > { %p8067_p12 = scmp.ne.s32.totalorder %s8578_s29, %s8066_s5  ;;  %s8071_s12 = sshll.u32 %s8210_s7, 4  ;;  %s8072_s12 = int_to_ptr.vmem [resolvable:$false] %s8071_s12 }
 0x106   : > { %s8073_s20 = scalar_lea.vmem %s8072_s12, 4096  ;;  %p8074_p6 = scmp.lt.s32.totalorder %s8578_s29, %s8072_s12 }
 0x107   : > { %p8069_p1 = pnand %p8067_p12, %p8053_p8  ;;  %p8075_p13 = scmp.lt.s32.totalorder %s8073_s20, %s8066_s5 }
 0x109   : > { %p8070_p10 = pneg %p8069_p1  ;;  %p8076_p0 = por %p8075_p13, %p8074_p6 }
 0x10b   : > { %p8077_p2 = pnand %p8076_p0, %p8070_p10 }
 0x10d   : > { %8080 = shalt.err (!%p8077_p2)
}
 0x10e   : > { %7593 = dma.hbm_to_vmem [thread:$0]  (!%p8574_p11), %s8571_s16, 2048, %s8578_s29, %s8585_s22, %s10141_s14, %s10141_s14, %s10140_s18  }
 0x10f   : > { %s641_s11 = scalar_lea.vmem [#allocation5], %s8565_s15  ;;  %s637_s17 = sand.u32 1, %s8197_s21  }
 0x110   : > { %s649_s13 = sshll.u32 %s641_s11, 4  ;;  %s8620_s27 = scalar_lea.sflag [#allocation6], %s637_s17  ;;  %s8618_s13 = int_to_ptr.vmem [resolvable:$true] %s649_s13 }
 0x111   : > { %s8081_s28 = scalar_lea.hbm %s8583_s26, 2048  ;;  %s8086_s7 = scalar_lea.hbm %s10151_s9, 4096 }
 0x112   : > { %p8082_p6 = scmp.ne.s32.totalorder %s8583_s26, %s8081_s28  ;;  %p8087_p5 = scmp.lt.u32.totalorder %s8583_s26, %s10151_s9 }
 0x113   : > { %p8088_p9 = scmp.lt.u32.totalorder %s8086_s7, %s8081_s28  ;;  %p8090_p12 = scmp.lt.u32.totalorder %s8081_s28, %s8583_s26 }
 0x114   : > { %p8084_p10 = pnand %p8082_p6, %p8053_p8 }
 0x115   : > { %p8089_p4 = por %p8088_p9, %p8087_p5 }
 0x116   : > { %p8085_p3 = pneg %p8084_p10 }
 0x117   : > { %p8091_p1 = por %p8090_p12, %p8089_p4 }
 0x119   : > { %p8092_p13 = pnand %p8091_p1, %p8085_p3 }
 0x11b   : > { %8095 = shalt.err (!%p8092_p13)
}
 0x11c   : > { %s8096_s15 = scalar_lea.vmem %s8618_s13, 2048  ;;  %s8211_s16 = smov [#allocation5]  }
 0x11d   : > { %p8097_p0 = scmp.ne.s32.totalorder %s8618_s13, %s8096_s15  ;;  %s8101_s29 = sshll.u32 %s8211_s16, 4  ;;  %s8102_s29 = int_to_ptr.vmem [resolvable:$false] %s8101_s29 }
 0x11e   : > { %s8103_s22 = scalar_lea.vmem %s8102_s29, 4096  ;;  %p8104_p10 = scmp.lt.s32.totalorder %s8618_s13, %s8102_s29 }
 0x11f   : > { %p8099_p2 = pnand %p8097_p0, %p8053_p8  ;;  %p8105_p5 = scmp.lt.s32.totalorder %s8103_s22, %s8096_s15 }
 0x121   : > { %p8100_p6 = pneg %p8099_p2  ;;  %p8106_p9 = por %p8105_p5, %p8104_p10 }
 0x123   : > { %p8107_p4 = pnand %p8106_p9, %p8100_p6 }
 0x125   : > { %8110 = shalt.err (!%p8107_p4)
}
 0x126   : > { %7596 = dma.hbm_to_vmem [thread:$0]  (!%p8574_p11), %s8583_s26, 2048, %s8618_s13, %s8620_s27, %s10141_s14, %s10141_s14, %s10140_s18  }
 0x127   : > { %p10152_p8 = scmp.ne.s32.totalorder %s10132_s23, 0 }
 0x128   : > { %s8652_s11 = sand.u32 (!%p10152_p8), 1, %s8189_s30  }
 0x129   : > { %661 = sbr.rel (%p10152_p8) target bundleno = 2730 (0xaaa), region = 96  ;;  %s8655_s17 = sshll.u32 (!%p10152_p8), %s8652_s11, 7 }
 0x12a   : > { %s664_s1 = scalar_lea.sflag (!%p10152_p8), [#allocation3], %s8652_s11  ;;  %s8659_s28 = scalar_lea.vmem (!%p10152_p8), [#allocation2], %s8655_s17 }
 0x130   : > { %8156 = dma.done.wait (%p8551_p7), %s664_s1, 2048  }
 0x131   : > { %8158 = vsyncadd (%p8551_p7), %s664_s1, 4294965248  ;;  %s672_s23 = sand.u32 1, %s8337_s2   ;;  %s8667_s14 = scalar_lea.vmem [#allocation5], %s8655_s17 }
 0x132   : > { %s673_s18 = scalar_lea.sflag [#allocation6], %s672_s23 }
 0x133   : > { %8160 = dma.done.wait (%p8551_p7), %s673_s18, 2048  }
 0x134   : > { %8162 = vsyncadd (%p8551_p7), %s673_s18, 4294965248  ;;  %p10153_p11 = scmp.eq.s32.totalorder %s8337_s2, 0 }
 0x136   : > { %8164 = dma.done.wait (%p10153_p11), [#allocation6], 2048   ;;  %p10154_p3 = pmov %p10153_p11 }
 0x138   : > { %8166 = vsyncadd (%p10154_p3), [#allocation6], 4294965248  ;;  %p10155_p12 = pmov %p10154_p3 }
 0x139   : > { %p10156_p1 = pmov %p10154_p3 }
 0x13a   : > { %8168 = dma.done.wait (%p10155_p12), [#allocation9], 4096  }
 0x13b   : > { %8170 = vsyncadd (%p10156_p1), [#allocation9], 4294963200  ;;  %p10157_p13 = pmov %p10156_p1 }
 0x13c   : > { %p10158_p0 = pmov %p10156_p1 }
 0x13d   : > { %8172 = dma.done.wait (%p10157_p13), [#allocation12], 4096  }
 0x13e   : > { %8174 = vsyncadd (%p10158_p0), [#allocation12], 4294963200  ;;  %p10159_p7 = pmov %p10158_p0 }
 0x13f   : > { %p10160_p2 = pmov %p10158_p0 }
 0x140   : > { %8176 = dma.done.wait (%p10159_p7), [#allocation15], 8192  }
 0x141   : > { %8178 = vsyncadd (%p10160_p2), [#allocation15], 4294959104  ;;  %v1072_v0 = vld [vmem:[#allocation10] sm:$0xff]  ;;  %v1073_v1 = vld [vmem:[#allocation10 + $0x8] sm:$0xff]  ;;  %s10161_s7 = sld [smem:[#allocation33_spill]]  ;;  %vm1518_vm11 = vcmask 130048  }
 0x142   : > { %v1074_v2 = vld [vmem:[#allocation10 + $0x10] sm:$0xff]  ;;  %v7038_v3 = vpack.c.bf16 %v1073_v1, %v1072_v0  ;;  %v1075_v4 = vld [vmem:[#allocation10 + $0x18] sm:$0xff]  ;;  %v1076_v6 = vld [vmem:[#allocation10 + $0x20] sm:$0xff]  ;;  %s10162_s15 = sld [smem:[#allocation35_spill]]  ;;  %s10163_s22 = sld [smem:[#allocation40_spill]] }
 0x143   : > { %v7042_v5 = vpack.c.bf16 %v1075_v4, %v1074_v2  ;;  %v1077_v7 = vld [vmem:[#allocation10 + $0x28] sm:$0xff]  ;;  %v825_v8 = vld [vmem:[#allocation8] sm:$0xff]  ;;  %v827_v11 = vld [vmem:[#allocation8 + $0x10] sm:$0xff]  ;;  %s10164_s23 = sld [smem:[#allocation41_spill]]  ;;  %s10165_s25 = sld [smem:[#allocation37_spill]] }
 0x144   : > { %7039 = vmatprep.subr.bf16.mxu1 %v7038_v3  ;;  %v826_v9 = vld [vmem:[#allocation8 + $0x8] sm:$0xff]  ;;  %v828_v12 = vld [vmem:[#allocation8 + $0x18] sm:$0xff]  ;;  %v7046_v13 = vpack.c.bf16 %v1077_v7, %v1076_v6  ;;  %v829_v15 = vld [vmem:[#allocation8 + $0x20] sm:$0xff]  ;;  %s10166_s27 = sld [smem:[#allocation39_spill]]  ;;  %s9965_s16 = scalar_lea.vmem [#allocation17], %s8655_s17 }
 0x145   : > { %7041 = vmatpush3.bf16.msra.mxu1 %v7038_v3  ;;  %v7006_v10 = vpack.c.bf16 %v826_v9, %v825_v8  ;;  %v7010_v14 = vpack.c.bf16 %v828_v12, %v827_v11  ;;  %v830_v16 = vld [vmem:[#allocation8 + $0x28] sm:$0xff]  ;;  %v1078_v17 = vld [vmem:[#allocation10 + $0x30] sm:$0xff]  ;;  %v1079_v18 = vld [vmem:[#allocation10 + $0x38] sm:$0xff]  ;;  %s5693_s17 = sshll.u32 %s8337_s2, 11  ;;  %s5354_s29 = sshll.u32 %s9965_s16, 4  ;;  %s10032_s29 = int_to_ptr.vmem [resolvable:$true] %s5354_s29 }
 0x146   : > { %7043 = vmatprep.subr.bf16.mxu1 %v7042_v5  ;;  %v7014_v19 = vpack.c.bf16 %v830_v16, %v829_v15  ;;  %v8690_v20 = vld [vmem:[%s8667_s14] sm:$0xff]  ;;  %v7050_v21 = vpack.c.bf16 %v1079_v18, %v1078_v17  ;;  %v831_v22 = vld [vmem:[#allocation8 + $0x30] sm:$0xff]  ;;  %v832_v23 = vld [vmem:[#allocation8 + $0x38] sm:$0xff]  ;;  %s5340_s18 = scalar_lea.sflag [#allocation4], %s8652_s11  ;;  %p10170_p10 = scmp.ne.s32.totalorder %s10147_s19, 0 }
 0x147   : > { %7007 = vmatprep.subr.bf16.mxu0 %v7006_v10  ;;  %6310 = vmatprep.mubr.f32.mxu1 %v8690_v20  ;;  %v1080_v24 = vld [vmem:[#allocation10 + $0x40] sm:$0xff]  ;;  %v1081_v25 = vld [vmem:[#allocation10 + $0x48] sm:$0xff]  ;;  %v7018_v26 = vpack.c.bf16 %v832_v23, %v831_v22  ;;  %v1082_v31 = vld [vmem:[#allocation10 + $0x50] sm:$0xff]  ;;  %s8213_s2 = smov [#allocation17]  }
 0x148   : > { %7009 = vmatpush3.bf16.msra.mxu0 %v7006_v10  ;;  %v767_v27 = vld [vmem:[%s8659_s28] sm:$0xff]  ;;  %v7054_v28 = vpack.c.bf16 %v1081_v25, %v1080_v24  ;;  %v834_v30 = vld [vmem:[#allocation8 + $0x48] sm:$0xff]  ;;  %v1083_v32 = vld [vmem:[#allocation10 + $0x58] sm:$0xff] }
 0x149   : > { %7045 = vmatpush3.bf16.msra.mxu1 %v7042_v5  ;;  %7011 = vmatprep.subr.bf16.mxu0 %v7010_v14  ;;  %v833_v29 = vld [vmem:[#allocation8 + $0x40] sm:$0xff]  ;;  %v7058_v34 = vpack.c.bf16 %v1083_v32, %v1082_v31  ;;  %v835_v35 = vld [vmem:[#allocation8 + $0x50] sm:$0xff]  ;;  %v836_v36 = vld [vmem:[#allocation8 + $0x58] sm:$0xff] }
 0x14a   : > { %7047 = vmatprep.subr.bf16.mxu1 %v7046_v13  ;;  %6254 = vmatprep.mubr.f32.mxu0 %v767_v27  ;;  %v7022_v33 = vpack.c.bf16 %v834_v30, %v833_v29  ;;  %v1084_v37 = vld [vmem:[#allocation10 + $0x60] sm:$0xff]  ;;  %v1085_v38 = vld [vmem:[#allocation10 + $0x68] sm:$0xff]  ;;  %v7026_v39 = vpack.c.bf16 %v836_v36, %v835_v35  ;;  %v1086_v43 = vld [vmem:[#allocation10 + $0x70] sm:$0xff] }
 0x14b   : > { %v7062_v40 = vpack.c.bf16 %v1085_v38, %v1084_v37  ;;  %v837_v41 = vld [vmem:[#allocation8 + $0x60] sm:$0xff]  ;;  %v838_v42 = vld [vmem:[#allocation8 + $0x68] sm:$0xff]  ;;  %v1087_v44 = vld [vmem:[#allocation10 + $0x78] sm:$0xff] }
 0x14c   : > { %7013 = vmatpush3.bf16.msra.mxu0 %v7010_v14  ;;  %v7030_v45 = vpack.c.bf16 %v838_v42, %v837_v41  ;;  %v7066_v46 = vpack.c.bf16 %v1087_v44, %v1086_v43  ;;  %v839_v47 = vld [vmem:[#allocation8 + $0x70] sm:$0xff]  ;;  %v840_v48 = vld [vmem:[#allocation8 + $0x78] sm:$0xff]  ;;  %v1319_v50 = vld [vmem:[#allocation11] sm:$0xff] }
 0x14d   : > { %7049 = vmatpush3.bf16.msra.mxu1 %v7046_v13  ;;  %7015 = vmatprep.subr.bf16.mxu0 %v7014_v19  ;;  %v7034_v49 = vpack.c.bf16 %v840_v48, %v839_v47  ;;  %v1320_v51 = vld [vmem:[#allocation11 + $0x8] sm:$0xff]  ;;  %v8698_v54 = vld [vmem:[%s8667_s14 + $0x10] sm:$0xff]  ;;  %v1322_v56 = vld [vmem:[#allocation11 + $0x18] sm:$0xff] }
 0x14e   : > { %7051 = vmatprep.subr.bf16.mxu1 %v7050_v21  ;;  %v7070_v52 = vpack.c.bf16 %v1320_v51, %v1319_v50  ;;  %v8695_v53 = vld [vmem:[%s8667_s14 + $0x8] sm:$0xff]  ;;  %v1321_v55 = vld [vmem:[#allocation11 + $0x10] sm:$0xff]  ;;  %v8704_v58 = vld [vmem:[%s8667_s14 + $0x18] sm:$0xff] }
 0x14f   : > { %v768_v57 = vld [vmem:[%s8659_s28 + $0x8] sm:$0xff]  ;;  %v769_v59 = vld [vmem:[%s8659_s28 + $0x10] sm:$0xff]  ;;  %v7074_v60 = vpack.c.bf16 %v1322_v56, %v1321_v55  ;;  %v8708_v61 = vld [vmem:[%s8667_s14 + $0x20] sm:$0xff] }
 0x150   : > { %7017 = vmatpush3.bf16.msra.mxu0 %v7014_v19  ;;  %v1323_v62 = vld [vmem:[#allocation11 + $0x20] sm:$0xff]  ;;  %v1324_v63 = vld [vmem:[#allocation11 + $0x28] sm:$0xff]  ;;  %v770_v0 = vld [vmem:[%s8659_s28 + $0x18] sm:$0xff] }
 0x151   : > { %7053 = vmatpush3.bf16.msra.mxu1 %v7050_v21  ;;  %7019 = vmatprep.subr.bf16.mxu0 %v7018_v26  ;;  %v8714_v1 = vld [vmem:[%s8667_s14 + $0x28] sm:$0xff]  ;;  %v771_v2 = vld [vmem:[%s8659_s28 + $0x20] sm:$0xff]  ;;  %v7078_v3 = vpack.c.bf16 %v1324_v63, %v1323_v62  ;;  %v8718_v4 = vld [vmem:[%s8667_s14 + $0x30] sm:$0xff] }
 0x152   : > { %7055 = vmatprep.subr.bf16.mxu1 %v7054_v28  ;;  %v1325_v5 = vld [vmem:[#allocation11 + $0x30] sm:$0xff]  ;;  %v1326_v6 = vld [vmem:[#allocation11 + $0x38] sm:$0xff]  ;;  %v772_v7 = vld [vmem:[%s8659_s28 + $0x28] sm:$0xff] }
 0x153   : > { %v8724_v8 = vld [vmem:[%s8667_s14 + $0x38] sm:$0xff]  ;;  %v773_v9 = vld [vmem:[%s8659_s28 + $0x30] sm:$0xff]  ;;  %v7082_v10 = vpack.c.bf16 %v1326_v6, %v1325_v5  ;;  %v8728_v11 = vld [vmem:[%s8667_s14 + $0x40] sm:$0xff] }
 0x154   : > { %7021 = vmatpush3.bf16.msra.mxu0 %v7018_v26  ;;  %v1327_v12 = vld [vmem:[#allocation11 + $0x40] sm:$0xff]  ;;  %v1328_v13 = vld [vmem:[#allocation11 + $0x48] sm:$0xff]  ;;  %v774_v14 = vld [vmem:[%s8659_s28 + $0x38] sm:$0xff] }
 0x155   : > { %7057 = vmatpush3.bf16.msra.mxu1 %v7054_v28  ;;  %7023 = vmatprep.subr.bf16.mxu0 %v7022_v33  ;;  %v792_v15 = vld [vmem:[%s8667_s14 + $0x48] sm:$0xff]  ;;  %v775_v16 = vld [vmem:[%s8659_s28 + $0x40] sm:$0xff]  ;;  %v7086_v17 = vpack.c.bf16 %v1328_v13, %v1327_v12  ;;  %v793_v18 = vld [vmem:[%s8667_s14 + $0x50] sm:$0xff] }
 0x156   : > { %7059 = vmatprep.subr.bf16.mxu1 %v7058_v34  ;;  %v1329_v19 = vld [vmem:[#allocation11 + $0x50] sm:$0xff]  ;;  %v1330_v21 = vld [vmem:[#allocation11 + $0x58] sm:$0xff]  ;;  %v776_v22 = vld [vmem:[%s8659_s28 + $0x48] sm:$0xff] }
 0x157   : > { %v794_v23 = vld [vmem:[%s8667_s14 + $0x58] sm:$0xff]  ;;  %v777_v24 = vld [vmem:[%s8659_s28 + $0x50] sm:$0xff]  ;;  %v7090_v25 = vpack.c.bf16 %v1330_v21, %v1329_v19  ;;  %v795_v26 = vld [vmem:[%s8667_s14 + $0x60] sm:$0xff] }
 0x158   : > { %7025 = vmatpush3.bf16.msra.mxu0 %v7022_v33  ;;  %v1331_v27 = vld [vmem:[#allocation11 + $0x60] sm:$0xff]  ;;  %v1332_v28 = vld [vmem:[#allocation11 + $0x68] sm:$0xff]  ;;  %v778_v29 = vld [vmem:[%s8659_s28 + $0x58] sm:$0xff] }
 0x159   : > { %7061 = vmatpush3.bf16.msra.mxu1 %v7058_v34  ;;  %7027 = vmatprep.subr.bf16.mxu0 %v7026_v39  ;;  %v796_v30 = vld [vmem:[%s8667_s14 + $0x68] sm:$0xff]  ;;  %v779_v31 = vld [vmem:[%s8659_s28 + $0x60] sm:$0xff]  ;;  %v7094_v32 = vpack.c.bf16 %v1332_v28, %v1331_v27  ;;  %v1333_v33 = vld [vmem:[#allocation11 + $0x70] sm:$0xff] }
 0x15a   : > { %7063 = vmatprep.subr.bf16.mxu1 %v7062_v40  ;;  %v1334_v34 = vld [vmem:[#allocation11 + $0x78] sm:$0xff]  ;;  %v797_v35 = vld [vmem:[%s8667_s14 + $0x70] sm:$0xff]  ;;  %v780_v36 = vld [vmem:[%s8659_s28 + $0x68] sm:$0xff] }
 0x15b   : > { %v781_v37 = vld [vmem:[%s8659_s28 + $0x70] sm:$0xff]  ;;  %v7098_v38 = vpack.c.bf16 %v1334_v34, %v1333_v33  ;;  %v8766_v44 = vld [vmem:[%s10082_s4] ss:$0 sm:$0xff] }
 0x15c   : > { %7029 = vmatpush3.bf16.msra.mxu0 %v7026_v39  ;;  %v798_v39 = vld [vmem:[%s8667_s14 + $0x78] sm:$0xff]  ;;  %s8111_s14 = scalar_lea.vmem %s10032_s29, 2048 }
 0x15d   : > { %7065 = vmatpush3.bf16.msra.mxu1 %v7062_v40  ;;  %7031 = vmatprep.subr.bf16.mxu0 %v7030_v45  ;;  %v782_v40 = vld [vmem:[%s8659_s28 + $0x78] sm:$0xff]  ;;  %p8112_p6 = scmp.ne.s32.totalorder %s10032_s29, %s8111_s14 }
 0x15e   : > { %7067 = vmatprep.subr.bf16.mxu1 %v7066_v46 }
 0x15f   : > { %p8113_p5 = pnand %p8112_p6, %p10170_p10 }
 0x160   : > { %7033 = vmatpush3.bf16.msra.mxu0 %v7030_v45 }
 0x161   : > { %7069 = vmatpush3.bf16.msra.mxu1 %v7066_v46  ;;  %7035 = vmatprep.subr.bf16.mxu0 %v7034_v49  ;;  %p8114_p9 = pneg %p8113_p5 }
 0x162   : > { %7518 = vmatprep.subr.bf16.mxu1 %v7070_v52 }
 0x164   : > { %6311 = vmatmul.mubr.f32.vlgmr.msra.gmra.mrb[0].mxu1 %v8695_v53  ;;  %7037 = vmatpush3.bf16.msra.mxu0 %v7034_v49 }
 0x165   : > { %6313 = vmatprep.mubr.f32.mxu1 %v8698_v54  ;;  %7071 = vmatprep.subr.bf16.mxu0 %v7070_v52 }
 0x166   : > { %7526 = vmatpush3.bf16.msra.mxu1 %v7070_v52 }
 0x167   : > { %6255 = vmatmul.mubr.f32.vlgmr.msra.gmra.mrb[0].mxu0 %v768_v57  ;;  %7519 = vmatprep.subr.bf16.mxu1 %v7074_v60 }
 0x168   : > { %6314 = vmatmul.mubr.f32.gmra.mrb[2].mxu1 %v8704_v58  ;;  %6257 = vmatprep.mubr.f32.mxu0 %v769_v59 }
 0x169   : > { %6316 = vmatprep.mubr.f32.mxu1 %v8708_v61  ;;  %7073 = vmatpush3.bf16.msra.mxu0 %v7070_v52 }
 0x16a   : > { %7075 = vmatprep.subr.bf16.mxu0 %v7074_v60  ;;  %7527 = vmatpush3.bf16.msra.mxu1 %v7074_v60 }
 0x16b   : > { %6258 = vmatmul.mubr.f32.gmra.mrb[2].mxu0 %v770_v0  ;;  %7520 = vmatprep.subr.bf16.mxu1 %v7078_v3 }
 0x16c   : > { %6317 = vmatmul.mubr.f32.gmra.mrb[4].mxu1 %v8714_v1  ;;  %6260 = vmatprep.mubr.f32.mxu0 %v771_v2 }
 0x16d   : > { %6319 = vmatprep.mubr.f32.mxu1 %v8718_v4  ;;  %7077 = vmatpush3.bf16.msra.mxu0 %v7074_v60 }
 0x16e   : > { %7079 = vmatprep.subr.bf16.mxu0 %v7078_v3  ;;  %7528 = vmatpush3.bf16.msra.mxu1 %v7078_v3 }
 0x16f   : > { %6261 = vmatmul.mubr.f32.gmra.mrb[4].mxu0 %v772_v7  ;;  %7521 = vmatprep.subr.bf16.mxu1 %v7082_v10 }
 0x170   : > { %6320 = vmatmul.mubr.f32.gmra.mrb[6].mxu1 %v8724_v8  ;;  %6263 = vmatprep.mubr.f32.mxu0 %v773_v9 }
 0x171   : > { %6322 = vmatprep.mubr.f32.mxu1 %v8728_v11  ;;  %7081 = vmatpush3.bf16.msra.mxu0 %v7078_v3 }
 0x172   : > { %7083 = vmatprep.subr.bf16.mxu0 %v7082_v10  ;;  %7529 = vmatpush3.bf16.msra.mxu1 %v7082_v10 }
 0x173   : > { %6264 = vmatmul.mubr.f32.gmra.mrb[6].mxu0 %v774_v14  ;;  %7522 = vmatprep.subr.bf16.mxu1 %v7086_v17 }
 0x174   : > { %6323 = vmatmul.mubr.f32.gmra.mrb[8].mxu1 %v792_v15  ;;  %6266 = vmatprep.mubr.f32.mxu0 %v775_v16 }
 0x175   : > { %6325 = vmatprep.mubr.f32.mxu1 %v793_v18  ;;  %7085 = vmatpush3.bf16.msra.mxu0 %v7082_v10 }
 0x176   : > { %7087 = vmatprep.subr.bf16.mxu0 %v7086_v17  ;;  %7530 = vmatpush3.bf16.msra.mxu1 %v7086_v17 }
 0x177   : > { %6267 = vmatmul.mubr.f32.gmra.mrb[8].mxu0 %v776_v22  ;;  %7523 = vmatprep.subr.bf16.mxu1 %v7090_v25 }
 0x178   : > { %6326 = vmatmul.mubr.f32.gmra.mrb[10].mxu1 %v794_v23  ;;  %6269 = vmatprep.mubr.f32.mxu0 %v777_v24 }
 0x179   : > { %6328 = vmatprep.mubr.f32.mxu1 %v795_v26  ;;  %7089 = vmatpush3.bf16.msra.mxu0 %v7086_v17 }
 0x17a   : > { %7091 = vmatprep.subr.bf16.mxu0 %v7090_v25  ;;  %7531 = vmatpush3.bf16.msra.mxu1 %v7090_v25 }
 0x17b   : > { %6270 = vmatmul.mubr.f32.gmra.mrb[10].mxu0 %v778_v29  ;;  %7524 = vmatprep.subr.bf16.mxu1 %v7094_v32 }
 0x17c   : > { %6329 = vmatmul.mubr.f32.gmra.mrb[12].mxu1 %v796_v30  ;;  %6272 = vmatprep.mubr.f32.mxu0 %v779_v31 }
 0x17d   : > { %7093 = vmatpush3.bf16.msra.mxu0 %v7090_v25  ;;  %6331 = vmatprep.mubr.f32.mxu1 %v797_v35 }
 0x17e   : > { %7095 = vmatprep.subr.bf16.mxu0 %v7094_v32  ;;  %7532 = vmatpush3.bf16.msra.mxu1 %v7094_v32 }
 0x17f   : > { %6273 = vmatmul.mubr.f32.gmra.mrb[12].mxu0 %v780_v36  ;;  %7525 = vmatprep.subr.bf16.mxu1 %v7098_v38 }
 0x180   : > { %6275 = vmatprep.mubr.f32.mxu0 %v781_v37  ;;  %6332 = vmatmul.mubr.f32.gmra.mrb[14].mxu1 %v798_v39 }
 0x181   : > { %7097 = vmatpush3.bf16.msra.mxu0 %v7094_v32  ;;  %6378 = vmatprep.mubr.f32.mxu1 %v8728_v11 }
 0x182   : > { %7099 = vmatprep.subr.bf16.mxu0 %v7098_v38  ;;  %7533 = vmatpush3.bf16.msra.mxu1 %v7098_v38 }
 0x183   : > { %6276 = vmatmul.mubr.f32.gmra.mrb[14].mxu0 %v782_v40 }
 0x184   : > { %6366 = vmatprep.mubr.f32.mxu0 %v8690_v20  ;;  %v8760_v20 = vld [vmem:[%s10084_s6] ss:$0 sm:$0xff] }
 0x185   : > { %7101 = vmatpush3.bf16.msra.mxu0 %v7098_v38  ;;  %6379 = vmatmul.mubr.f32.vlgmr.msra.gmra.mrb[16].mxu1 %v792_v15 }
 0x186   : > { %6381 = vmatprep.mubr.f32.mxu1 %v793_v18 }
 0x188   : > { %6367 = vmatmul.mubr.f32.vlgmr.msra.gmra.mrb[16].mxu0 %v8695_v53 }
 0x189   : > { %6369 = vmatprep.mubr.f32.mxu0 %v8698_v54  ;;  %6382 = vmatmul.mubr.f32.gmra.mrb[18].mxu1 %v794_v23 }
 0x18a   : > { %6384 = vmatprep.mubr.f32.mxu1 %v795_v26 }
 0x18c   : > { %6370 = vmatmul.mubr.f32.gmra.mrb[18].mxu0 %v8704_v58 }
 0x18d   : > { %6372 = vmatprep.mubr.f32.mxu0 %v8708_v61  ;;  %6385 = vmatmul.mubr.f32.gmra.mrb[20].mxu1 %v796_v30 }
 0x18e   : > { %6387 = vmatprep.mubr.f32.mxu1 %v797_v35 }
 0x190   : > { %6373 = vmatmul.mubr.f32.gmra.mrb[20].mxu0 %v8714_v1 }
 0x191   : > { %6375 = vmatprep.mubr.f32.mxu0 %v8718_v4  ;;  %6388 = vmatmul.mubr.f32.gmra.mrb[22].mxu1 %v798_v39 }
 0x194   : > { %6376 = vmatmul.mubr.f32.gmra.mrb[22].mxu0 %v8724_v8 }
 0x237   : > { %v6312_v41 = vpop.f32.mrb[0].mxu1 }
 0x238   : > { %v1166_v42 = vadd.f32 %v6312_v41, %v8760_v20  ;;  %v1160_v43 = vpop.f32.mrb[1].mxu1 }
 0x239   : > { %v1161_v45 = vadd.f32 %v8760_v20, %v1160_v43 }
 0x23a   : > { %v1273_v46 = vmul.f32 1.442695, %v1166_v42  ;;  %v6256_v47 = vpop.f32.mrb[0].mxu0  ;;  %v1256_v4 = vadd.f32 1.0, %v1166_v42  ;;  %vm1240_vm0 = vcmp.gt.f32.partialorder %v1166_v42, 0.0 }
 0x23b   : > { %v1271_v48 = vmul.f32 1.442695, %v1161_v45  ;;  %v6315_v49 = vpop.f32.mrb[2].mxu1  ;;  %v8770_v50 = vadd.f32 %v6256_v47, %v8766_v44  ;;  %v8772_v51 = vpop.f32.mrb[1].mxu0  ;;  %v1255_v9 = vadd.f32 1.0, %v1161_v45  ;;  %vm1239_vm1 = vcmp.gt.f32.partialorder %v1161_v45, 0.0 }
 0x23c   : > { %7663 = vpow2.f32 %v1273_v46  ;;  %v8775_v52 = vadd.f32 %v6315_v49, %v8760_v20  ;;  %v1170_v53 = vpop.f32.mrb[3].mxu1 }
 0x23d   : > { %7665 = vpow2.f32 %v1271_v48  ;;  %v8778_v54 = vadd.f32 %v8760_v20, %v1170_v53 }
 0x23e   : > { %v6259_v56 = vpop.f32.mrb[2].mxu0  ;;  %vm1242_vm10 = vcmp.gt.f32.partialorder %v8775_v52, 0.0 }
 0x23f   : > { %v6318_v55 = vpop.f32.mrb[4].mxu1  ;;  %v8782_v59 = vadd.f32 %v6259_v56, %v8766_v44  ;;  %v923_v60 = vpop.f32.mrb[3].mxu0  ;;  %vm1241_vm9 = vcmp.gt.f32.partialorder %v8778_v54, 0.0 }
 0x240   : > { %v1186_v57 = vadd.f32 %v6318_v55, %v8760_v20  ;;  %v1180_v58 = vpop.f32.mrb[5].mxu1  ;;  %v8786_v62 = vadd.f32 %v8766_v44, %v923_v60 }
 0x241   : > { %v1181_v61 = vadd.f32 %v8760_v20, %v1180_v58 }
 0x242   : > { %v1281_v63 = vmul.f32 1.442695, %v1186_v57  ;;  %v6262_v0 = vpop.f32.mrb[4].mxu0  ;;  %v1260_v26 = vadd.f32 1.0, %v1186_v57  ;;  %vm1244_vm2 = vcmp.gt.f32.partialorder %v1186_v57, 0.0 }
 0x243   : > { %v1279_v1 = vmul.f32 1.442695, %v1181_v61  ;;  %v933_v2 = vpop.f32.mrb[5].mxu0  ;;  %v6321_v3 = vpop.f32.mrb[6].mxu1  ;;  %v8789_v5 = vadd.f32 %v6262_v0, %v8766_v44  ;;  %v1259_v25 = vadd.f32 1.0, %v1181_v61  ;;  %vm1243_vm3 = vcmp.gt.f32.partialorder %v1181_v61, 0.0 }
 0x244   : > { %7667 = vpow2.f32 %v1281_v63  ;;  %v8792_v6 = vadd.f32 %v8766_v44, %v933_v2  ;;  %v1190_v7 = vpop.f32.mrb[7].mxu1  ;;  %v8795_v10 = vadd.f32 %v6321_v3, %v8760_v20 }
 0x245   : > { %7669 = vpow2.f32 %v1279_v1  ;;  %v8798_v11 = vadd.f32 %v8760_v20, %v1190_v7 }
 0x246   : > { %v7664_v8 = vpop.eup %7663  ;;  %v6265_v12 = vpop.f32.mrb[6].mxu0  ;;  %vm1246_vm13 = vcmp.gt.f32.partialorder %v8795_v10, 0.0 }
 0x247   : > { %v7666_v13 = vpop.eup %7665  ;;  %v1304_v14 = vsel %vm1240_vm0, %v1256_v4, %v7664_v8  ;;  %v6324_v15 = vpop.f32.mrb[8].mxu1  ;;  %v8805_v23 = vadd.f32 %v6265_v12, %v8766_v44  ;;  %vm1245_vm12 = vcmp.gt.f32.partialorder %v8798_v11, 0.0 }
 0x248   : > { %v943_v16 = vpop.f32.mrb[7].mxu0  ;;  %v1303_v17 = vsel %vm1239_vm1, %v1255_v9, %v7666_v13  ;;  %v1200_v18 = vpop.f32.mrb[9].mxu1  ;;  %v1206_v21 = vadd.f32 %v6324_v15, %v8760_v20 }
 0x249   : > { %1486 = vxpose.xlu0.b32.start [1/2] (short) %v1303_v17, 128  ;;  %v8800_v19 = vadd.f32 %v1304_v14, %v1303_v17  ;;  %v1201_v22 = vadd.f32 %v8760_v20, %v1200_v18  ;;  %v8808_v27 = vadd.f32 %v8766_v44, %v943_v16  ;;  %v8844_v17 = vld [vmem:[%s10161_s7] ss:$0 sm:$0xff]  ;;  %s10167_s7 = sld [smem:[#allocation42_spill]] }
 0x24a   : > { %v6268_v24 = vpop.f32.mrb[8].mxu0  ;;  %v1289_v31 = vmul.f32 1.442695, %v1206_v21  ;;  %v1264_v56 = vadd.f32 1.0, %v1206_v21  ;;  %vm1248_vm4 = vcmp.gt.f32.partialorder %v1206_v21, 0.0 }
 0x24b   : > { %v8811_v28 = vadd.f32 %v6268_v24, %v8766_v44  ;;  %v953_v29 = vpop.f32.mrb[9].mxu0  ;;  %v6327_v30 = vpop.f32.mrb[10].mxu1  ;;  %v1287_v32 = vmul.f32 1.442695, %v1201_v22  ;;  %vm1247_vm5 = vcmp.gt.f32.partialorder %v1201_v22, 0.0  ;;  %v1263_v63 = vadd.f32 1.0, %v1201_v22 }
 0x24c   : > { %v1210_v33 = vpop.f32.mrb[11].mxu1  ;;  %7671 = vpow2.f32 %v1289_v31  ;;  %v8816_v43 = vadd.f32 %v8766_v44, %v953_v29  ;;  %v8819_v45 = vadd.f32 %v6327_v30, %v8760_v20 }
 0x24d   : > { %1487 = vxpose.xlu0.b32.end [2/2] (short) %v1304_v14, 128  ;;  %7673 = vpow2.f32 %v1287_v32  ;;  %v8822_v46 = vadd.f32 %v8760_v20, %v1210_v33 }
 0x24e   : > { %v7668_v34 = vpop.eup %7667  ;;  %v6271_v35 = vpop.f32.mrb[10].mxu0  ;;  %vm1250_vm15 = vcmp.gt.f32.partialorder %v8819_v45, 0.0 }
 0x24f   : > { %v7670_v36 = vpop.eup %7669  ;;  %v1308_v37 = vsel %vm1244_vm2, %v1260_v26, %v7668_v34  ;;  %v6330_v38 = vpop.f32.mrb[12].mxu1  ;;  %v8827_v2 = vadd.f32 %v6271_v35, %v8766_v44  ;;  %vm1249_vm14 = vcmp.gt.f32.partialorder %v8822_v46, 0.0 }
 0x250   : > { %v963_v39 = vpop.f32.mrb[11].mxu0  ;;  %v1307_v40 = vsel %vm1243_vm3, %v1259_v25, %v7670_v36  ;;  %v1220_v41 = vpop.f32.mrb[13].mxu1  ;;  %v1226_v47 = vadd.f32 %v6330_v38, %v8760_v20  ;;  %vm993_vm3 = vcmp.gt.f32.partialorder %v8770_v50, 0.0 }
 0x251   : > { %1937 = vxpose.xlu1.b32.start [1/2] (short) %v1307_v40, 128  ;;  %v8813_v42 = vadd.f32 %v1308_v37, %v1307_v40  ;;  %v1221_v49 = vadd.f32 %v8760_v20, %v1220_v41  ;;  %v8830_v7 = vadd.f32 %v8766_v44, %v963_v39 }
 0x252   : > { %v6274_v48 = vpop.f32.mrb[12].mxu0  ;;  %v1297_v57 = vmul.f32 1.442695, %v1226_v47  ;;  %v1268_v18 = vadd.f32 1.0, %v1226_v47  ;;  %vm1252_vm7 = vcmp.gt.f32.partialorder %v1226_v47, 0.0 }
 0x253   : > { %v973_v53 = vpop.f32.mrb[13].mxu0  ;;  %v6333_v55 = vpop.f32.mrb[14].mxu1  ;;  %v1295_v60 = vmul.f32 1.442695, %v1221_v49  ;;  %v979_v13 = vadd.f32 %v6274_v48, %v8766_v44  ;;  %v1267_v21 = vadd.f32 1.0, %v1221_v49  ;;  %vm1251_vm6 = vcmp.gt.f32.partialorder %v1221_v49, 0.0 }
 0x254   : > { %v1230_v58 = vpop.f32.mrb[15].mxu1  ;;  %7675 = vpow2.f32 %v1297_v57  ;;  %v8836_v14 = vadd.f32 %v8766_v44, %v973_v53  ;;  %v8852_v35 = vadd.f32 %v6333_v55, %v8760_v20 }
 0x255   : > { %1938 = vxpose.xlu1.b32.end [2/2] (short) %v1308_v37, 128  ;;  %7677 = vpow2.f32 %v1295_v60  ;;  %v1050_v32 = vmul.f32 1.442695, %v979_v13  ;;  %v8855_v36 = vadd.f32 %v8760_v20, %v1230_v58  ;;  %v1021_v41 = vadd.f32 1.0, %v979_v13 }
 0x256   : > { %v6277_v61 = vpop.f32.mrb[14].mxu0  ;;  %v7672_v1 = vpop.eup %7671  ;;  %vm1005_vm8 = vcmp.gt.f32.partialorder %v979_v13, 0.0  ;;  %vm1254_vm1 = vcmp.gt.f32.partialorder %v8852_v35, 0.0 }
 0x257   : > { %v983_v0 = vpop.f32.mrb[15].mxu0  ;;  %v7674_v3 = vpop.eup %7673  ;;  %v1312_v4 = vsel %vm1248_vm4, %v1264_v56, %v7672_v1  ;;  %v8839_v15 = vadd.f32 %v6277_v61, %v8766_v44  ;;  %7679 = vpow2.f32 %v1050_v32  ;;  %vm1253_vm0 = vcmp.gt.f32.partialorder %v8855_v36, 0.0 }
 0x258   : > { %v1311_v8 = vsel %vm1247_vm5, %v1263_v63, %v7674_v3  ;;  %v8847_v22 = vadd.f32 %v8766_v44, %v983_v0  ;;  %vm996_vm4 = vcmp.gt.f32.partialorder %v8792_v6, 0.0  ;;  %vm994_vm5 = vcmp.gt.f32.partialorder %v8786_v62, 0.0 }
 0x259   : > { %v8832_v9 = vadd.f32 %v1312_v4, %v1311_v8 }
 0x25b   : > { %v6368_v12 = vpop.f32.mrb[16].mxu0 }
 0x25c   : > { %v1407_v16 = vpop.f32.mrb[17].mxu0  ;;  %v1413_v24 = vadd.f32 %v6368_v12, %v8844_v17  ;;  %v6380_v12 = vpop.f32.mrb[16].mxu1 }
 0x25d   : > { %v1408_v29 = vadd.f32 %v8844_v17, %v1407_v16  ;;  %v1453_v13 = vadd.f32 %v6380_v12, %v8844_v17  ;;  %v1447_v16 = vpop.f32.mrb[17].mxu1 }
 0x25e   : > { %v7676_v25 = vpop.eup %7675 }
 0x25f   : > { %v7678_v26 = vpop.eup %7677  ;;  %v1316_v31 = vsel %vm1252_vm7, %v1268_v18, %v7676_v25  ;;  %v7102_v34 = vpack.c.bf16 %v1413_v24, %v1408_v29  ;;  %v6371_v55 = vpop.f32.mrb[18].mxu0  ;;  %v1448_v18 = vadd.f32 %v8844_v17, %v1447_v16  ;;  %v1275_v24 = vmul.f32 1.442695, %v8778_v54 }
 0x260   : > { %v1315_v30 = vsel %vm1251_vm6, %v1267_v21, %v7678_v26  ;;  %v1423_v56 = vadd.f32 %v6371_v55, %v8844_v17  ;;  %v1417_v57 = vpop.f32.mrb[19].mxu0  ;;  %v1277_v25 = vmul.f32 1.442695, %v8775_v52  ;;  %v6383_v26 = vpop.f32.mrb[18].mxu1  ;;  %vm997_vm6 = vcmp.gt.f32.partialorder %v8789_v5, 0.0 }
 0x261   : > { %v4057_v33 = vadd.f32 %v1316_v31, %v1315_v30  ;;  %7103 = vmatprep.subr.bf16.mxu1 %v7102_v34  ;;  %v7680_v47 = vpop.eup %7679  ;;  %v1418_v58 = vadd.f32 %v8844_v17, %v1417_v57  ;;  %v8871_v21 = vpack.c.bf16 %v1453_v13, %v1448_v18  ;;  %7681 = vpow2.f32 %v1275_v24 }
 0x262   : > { %7105 = vmatpush3.bf16.msra.mxu1 %v7102_v34  ;;  %v8859_v53 = vsel %vm1005_vm8, %v1021_v41, %v7680_v47  ;;  %v1463_v29 = vadd.f32 %v6383_v26, %v8844_v17  ;;  %7683 = vpow2.f32 %v1277_v25  ;;  %v1258_v47 = vadd.f32 1.0, %v8775_v52 }
 0x263   : > { %v4058_v37 = vrot.slane %v4057_v33, 4  ;;  %v6374_v60 = vpop.f32.mrb[20].mxu0  ;;  %v7106_v61 = vpack.c.bf16 %v1423_v56, %v1418_v58  ;;  %v1261_v57 = vadd.f32 1.0, %v8798_v11  ;;  %v1262_v52 = vadd.f32 1.0, %v8795_v10 }
 0x264   : > { %v1433_v63 = vadd.f32 %v6374_v60, %v8844_v17  ;;  %v1427_v0 = vpop.f32.mrb[21].mxu0  ;;  %vm1000_vm7 = vcmp.gt.f32.partialorder %v8816_v43, 0.0  ;;  %vm1001_vm8 = vcmp.gt.f32.partialorder %v8811_v28, 0.0 }
 0x265   : > { %v4059_v38 = vadd.f32 %v4058_v37, %v4057_v33  ;;  %v1428_v1 = vadd.f32 %v8844_v17, %v1427_v0  ;;  %7107 = vmatprep.subr.bf16.mxu0 %v7106_v61  ;;  %v1285_v37 = vmul.f32 1.442695, %v8795_v10 }
 0x266   : > { %7109 = vmatpush3.bf16.msra.mxu0 %v7106_v61 }
 0x267   : > { %v4060_v39 = vrot.slane %v4059_v38, 2  ;;  %v7110_v3 = vpack.c.bf16 %v1433_v63, %v1428_v1  ;;  %v6377_v58 = vpop.f32.mrb[22].mxu0 }
 0x268   : > { %v1437_v61 = vpop.f32.mrb[23].mxu0 }
 0x269   : > { %v4061_v40 = vadd.f32 %v4060_v39, %v4059_v38  ;;  %7111 = vmatprep.subr.bf16.mxu1 %v7110_v3  ;;  %v1257_v39 = vadd.f32 1.0, %v8778_v54  ;;  %v1443_v54 = vadd.f32 %v6377_v58, %v8844_v17  ;;  %v1438_v63 = vadd.f32 %v8844_v17, %v1437_v61 }
 0x26b   : > { %v4062_v48 = vrot.slane %v4061_v40, 1  ;;  %v8903_v12 = vpack.c.bf16 %v1443_v54, %v1438_v63  ;;  %v1299_v54 = vmul.f32 1.442695, %v8855_v36 }
 0x26d   : > { %v8857_v49 = vadd.f32 %v4062_v48, %v4061_v40  ;;  %v7682_v40 = vpop.eup %7681  ;;  %7115 = vmatprep.subr.bf16.mxu0 %v8903_v12 }
 0x26e   : > { %v8888_v48 = vsel %vm1241_vm9, %v1257_v39, %v7682_v40  ;;  %v7684_v55 = vpop.eup %7683  ;;  %v1291_v40 = vmul.f32 1.442695, %v8822_v46  ;;  %vm1004_vm9 = vcmp.gt.f32.partialorder %v8836_v14, 0.0 }
 0x26f   : > { %v8864_v20 = vmul.f32 %v8857_v49, %v8859_v53  ;;  %v8892_v56 = vsel %vm1242_vm10, %v1258_v47, %v7684_v55  ;;  %vm995_vm10 = vcmp.gt.f32.partialorder %v8782_v59, 0.0 }
 0x286   : > { %2387 = vxpose.xlu0.b32.start [1/2] (short) %v1311_v8, 128  ;;  %v1457_v8 = vpop.f32.mrb[19].mxu1 }
 0x28a   : > { %2388 = vxpose.xlu0.b32.end [2/2] (short) %v1312_v4, 128  ;;  %v1283_v4 = vmul.f32 1.442695, %v8798_v11 }
 0x28c   : > { %7685 = vpow2.f32 %v1283_v4 }
 0x28d   : > { %7687 = vpow2.f32 %v1285_v37 }
 0x28e   : > { %2837 = vxpose.xlu1.b32.start [1/2] (short) %v1315_v30, 128  ;;  %v1458_v30 = vadd.f32 %v8844_v17, %v1457_v8  ;;  %7689 = vpow2.f32 %v1291_v40 }
 0x290   : > { %v8878_v32 = vpack.c.bf16 %v1463_v29, %v1458_v30 }
 0x292   : > { %2838 = vxpose.xlu1.b32.end [2/2] (short) %v1316_v31, 128  ;;  %v6386_v31 = vpop.f32.mrb[20].mxu1 }
 0x293   : > { %v1473_v33 = vadd.f32 %v6386_v31, %v8844_v17  ;;  %v1467_v34 = vpop.f32.mrb[21].mxu1 }
 0x294   : > { %v1468_v38 = vadd.f32 %v8844_v17, %v1467_v34 }
 0x296   : > { %v8885_v41 = vpack.c.bf16 %v1473_v33, %v1468_v38  ;;  %v7686_v60 = vpop.eup %7685 }
 0x297   : > { %v8901_v1 = vsel %vm1245_vm12, %v1261_v57, %v7686_v60  ;;  %v7688_v13 = vpop.eup %7687  ;;  %v1293_v57 = vmul.f32 1.442695, %v8819_v45  ;;  %vm999_vm12 = vcmp.gt.f32.partialorder %v8805_v23, 0.0 }
 0x298   : > { %v8908_v16 = vsel %vm1246_vm13, %v1262_v52, %v7688_v13  ;;  %v1265_v52 = vadd.f32 1.0, %v8822_v46  ;;  %v7690_v13 = vpop.eup %7689  ;;  %vm1002_vm13 = vcmp.gt.f32.partialorder %v8830_v7, 0.0 }
 0x299   : > { %7691 = vpow2.f32 %v1293_v57 }
 0x29a   : > { %7693 = vpow2.f32 %v1299_v54 }
 0x2c3   : > { %1712 = vxpose.xlu0.b32.start [1/2] (short) %v8888_v48, 128 }
 0x2c7   : > { %1713 = vxpose.xlu0.b32.end [2/2] (short) %v8892_v56, 128 }
 0x2c9   : > { %v1502_v0 = vpop.trf.xlu0 }
 0x2ca   : > { %6394 = vmatprep.mubr.msk.f32.mxu1 %vm1518_vm11, %v1502_v0  ;;  %v1301_v0 = vmul.f32 1.442695, %v8852_v35 }
 0x2cb   : > { %2162 = vxpose.xlu1.b32.start [1/2] (short) %v8901_v1, 128 }
 0x2cc   : > { %7695 = vpow2.f32 %v1301_v0 }
 0x2cd   : > { %v1503_v11 = vpop.trf.xlu0 }
 0x2ce   : > { %6395 = vmatmul.mubr.msk.f32.vlgmr.msra.gmra.mrb[24].mxu1 %vm1518_vm11, %v1503_v11 }
 0x2cf   : > { %2163 = vxpose.xlu1.b32.end [2/2] (short) %v8908_v16, 128  ;;  %7113 = vmatpush3.bf16.msra.mxu1 %v7110_v3 }
 0x2d0   : > { %7119 = vmatprep.subr.bf16.mxu1 %v8871_v21 }
 0x2d1   : > { %v1504_v18 = vpop.trf.xlu0  ;;  %v1953_v24 = vpop.trf.xlu1 }
 0x2d2   : > { %6397 = vmatprep.mubr.msk.f32.mxu1 %vm1518_vm11, %v1504_v18 }
 0x2d5   : > { %v1505_v25 = vpop.trf.xlu0  ;;  %v8914_v10 = vpop.trf.xlu1 }
 0x2d6   : > { %6398 = vmatmul.mubr.msk.f32.gmra.mrb[26].mxu1 %vm1518_vm11, %v1505_v25  ;;  %v1266_v25 = vadd.f32 1.0, %v8819_v45  ;;  %v1270_v45 = vadd.f32 1.0, %v8852_v35 }
 0x2d9   : > { %v1506_v26 = vpop.trf.xlu0  ;;  %v8917_v29 = vpop.trf.xlu1 }
 0x2da   : > { %6400 = vmatprep.mubr.msk.f32.mxu1 %vm1518_vm11, %v1506_v26  ;;  %v8946_v26 = vsel %vm1249_vm14, %v1265_v52, %v7690_v13  ;;  %vm1003_vm14 = vcmp.gt.f32.partialorder %v8827_v2, 0.0 }
 0x2dd   : > { %v1507_v4 = vpop.trf.xlu0  ;;  %v8920_v8 = vpop.trf.xlu1 }
 0x2de   : > { %6401 = vmatmul.mubr.msk.f32.gmra.mrb[28].mxu1 %vm1518_vm11, %v1507_v4  ;;  %v7692_v4 = vpop.eup %7691 }
 0x2df   : > { %v8952_v46 = vsel %vm1250_vm15, %v1266_v25, %v7692_v4  ;;  %vm1006_vm15 = vcmp.gt.f32.partialorder %v8847_v22, 0.0 }
 0x2e1   : > { %v1508_v3 = vpop.trf.xlu0  ;;  %v8923_v30 = vpop.trf.xlu1 }
 0x2e2   : > { %6403 = vmatprep.mubr.msk.f32.mxu1 %vm1518_vm11, %v1508_v3 }
 0x2e5   : > { %v1509_v31 = vpop.trf.xlu0  ;;  %v8926_v33 = vpop.trf.xlu1 }
 0x2e6   : > { %6404 = vmatmul.mubr.msk.f32.gmra.mrb[30].mxu1 %vm1518_vm11, %v1509_v31 }
 0x2e9   : > { %v1510_v34 = vpop.trf.xlu0  ;;  %v8929_v37 = vpop.trf.xlu1 }
 0x2ea   : > { %6406 = vmatprep.mubr.msk.f32.mxu1 %vm1518_vm11, %v1510_v34  ;;  %v1269_v34 = vadd.f32 1.0, %v8855_v36 }
 0x2ed   : > { %v1511_v38 = vpop.trf.xlu0  ;;  %v8932_v39 = vpop.trf.xlu1 }
 0x2ee   : > { %6407 = vmatmul.mubr.msk.f32.gmra.mrb[32].mxu1 %vm1518_vm11, %v1511_v38  ;;  %v7694_v38 = vpop.eup %7693 }
 0x2ef   : > { %v8959_v57 = vsel %vm1253_vm0, %v1269_v34, %v7694_v38  ;;  %vm1007_vm0 = vcmp.gt.f32.partialorder %v8839_v15, 0.0 }
 0x2f1   : > { %v1512_v47 = vpop.trf.xlu0  ;;  %v1961_v55 = vpop.trf.xlu1 }
 0x2f2   : > { %6409 = vmatprep.mubr.msk.f32.mxu1 %vm1518_vm11, %v1512_v47 }
 0x2f5   : > { %v1513_v58 = vpop.trf.xlu0  ;;  %v1962_v60 = vpop.trf.xlu1 }
 0x2f6   : > { %6410 = vmatmul.mubr.msk.f32.gmra.mrb[34].mxu1 %vm1518_vm11, %v1513_v58  ;;  %v7696_v58 = vpop.eup %7695 }
 0x2f7   : > { %v8968_v36 = vsel %vm1254_vm1, %v1270_v45, %v7696_v58 }
 0x2f9   : > { %v1514_v61 = vpop.trf.xlu0  ;;  %v1963_v63 = vpop.trf.xlu1 }
 0x2fa   : > { %6412 = vmatprep.mubr.msk.f32.mxu1 %vm1518_vm11, %v1514_v61 }
 0x2fd   : > { %v1515_v11 = vpop.trf.xlu0  ;;  %v1964_v18 = vpop.trf.xlu1 }
 0x2fe   : > { %6413 = vmatmul.mubr.msk.f32.gmra.mrb[36].mxu1 %vm1518_vm11, %v1515_v11 }
 0x301   : > { %v1516_v3 = vpop.trf.xlu0  ;;  %2612 = vxpose.xlu0.b32.start [1/2] (short) %v8946_v26, 128  ;;  %v1965_v31 = vpop.trf.xlu1 }
 0x302   : > { %6415 = vmatprep.mubr.msk.f32.mxu1 %vm1518_vm11, %v1516_v3 }
 0x305   : > { %2613 = vxpose.xlu0.b32.end [2/2] (short) %v8952_v46, 128  ;;  %v1517_v40 = vpop.trf.xlu0  ;;  %v1966_v47 = vpop.trf.xlu1 }
 0x306   : > { %6416 = vmatmul.mubr.msk.f32.gmra.mrb[38].mxu1 %vm1518_vm11, %v1517_v40 }
 0x307   : > { %6450 = vmatprep.mubr.msk.f32.mxu1 %vm1518_vm11, %v1953_v24 }
 0x309   : > { %v2403_v54 = vpop.trf.xlu0  ;;  %v1967_v61 = vpop.trf.xlu1  ;;  %3062 = vxpose.xlu1.b32.start [1/2] (short) %v8959_v57, 128 }
 0x30a   : > { %6451 = vmatmul.mubr.msk.f32.vlgmr.msra.gmra.mrb[40].mxu1 %vm1518_vm11, %v8914_v10 }
 0x30b   : > { %6453 = vmatprep.mubr.msk.f32.mxu1 %vm1518_vm11, %v8917_v29  ;;  %7121 = vmatpush3.bf16.msra.mxu1 %v8871_v21 }
 0x30c   : > { %7127 = vmatprep.subr.bf16.mxu1 %v8885_v41 }
 0x30d   : > { %v2404_v24 = vpop.trf.xlu0  ;;  %3063 = vxpose.xlu1.b32.end [2/2] (short) %v8968_v36, 128  ;;  %v1968_v0 = vpop.trf.xlu1 }
 0x30e   : > { %6454 = vmatmul.mubr.msk.f32.gmra.mrb[42].mxu1 %vm1518_vm11, %v8920_v8 }
 0x30f   : > { %6456 = vmatprep.mubr.msk.f32.mxu1 %vm1518_vm11, %v8923_v30 }
 0x311   : > { %v2405_v35 = vpop.trf.xlu0  ;;  %v2853_v10 = vpop.trf.xlu1 }
 0x312   : > { %6457 = vmatmul.mubr.msk.f32.gmra.mrb[44].mxu1 %vm1518_vm11, %v8926_v33  ;;  %v6389_v33 = vpop.f32.mrb[22].mxu1 }
 0x313   : > { %6459 = vmatprep.mubr.msk.f32.mxu1 %vm1518_vm11, %v8929_v37  ;;  %v1483_v37 = vadd.f32 %v6389_v33, %v8844_v17  ;;  %v1477_v11 = vpop.f32.mrb[23].mxu1 }
 0x315   : > { %v2406_v21 = vpop.trf.xlu0  ;;  %v2854_v29 = vpop.trf.xlu1 }
 0x316   : > { %6460 = vmatmul.mubr.msk.f32.gmra.mrb[46].mxu1 %vm1518_vm11, %v8932_v39  ;;  %v1478_v39 = vadd.f32 %v8844_v17, %v1477_v11 }
 0x317   : > { %6462 = vmatprep.mubr.msk.f32.mxu1 %vm1518_vm11, %v1961_v55 }
 0x318   : > { %v8990_v4 = vpack.c.bf16 %v1483_v37, %v1478_v39 }
 0x319   : > { %v2407_v52 = vpop.trf.xlu0  ;;  %v2855_v8 = vpop.trf.xlu1 }
 0x31a   : > { %6463 = vmatmul.mubr.msk.f32.gmra.mrb[48].mxu1 %vm1518_vm11, %v1962_v60 }
 0x31b   : > { %6465 = vmatprep.mubr.msk.f32.mxu1 %vm1518_vm11, %v1963_v63 }
 0x31d   : > { %v2408_v30 = vpop.trf.xlu0  ;;  %v2856_v13 = vpop.trf.xlu1 }
 0x31e   : > { %6466 = vmatmul.mubr.msk.f32.gmra.mrb[50].mxu1 %vm1518_vm11, %v1964_v18 }
 0x31f   : > { %6468 = vmatprep.mubr.msk.f32.mxu1 %vm1518_vm11, %v1965_v31 }
 0x321   : > { %v2409_v25 = vpop.trf.xlu0  ;;  %v2857_v55 = vpop.trf.xlu1 }
 0x322   : > { %6469 = vmatmul.mubr.msk.f32.gmra.mrb[52].mxu1 %vm1518_vm11, %v1966_v47 }
 0x323   : > { %6471 = vmatprep.mubr.msk.f32.mxu1 %vm1518_vm11, %v1967_v61 }
 0x325   : > { %v2410_v60 = vpop.trf.xlu0  ;;  %v2858_v63 = vpop.trf.xlu1 }
 0x326   : > { %6472 = vmatmul.mubr.msk.f32.gmra.mrb[54].mxu1 %vm1518_vm11, %v1968_v0 }
 0x327   : > { %6506 = vmatprep.mubr.msk.f32.mxu1 %vm1518_vm11, %v2403_v54 }
 0x329   : > { %v2411_v18 = vpop.trf.xlu0  ;;  %v2859_v3 = vpop.trf.xlu1 }
 0x32a   : > { %6507 = vmatmul.mubr.msk.f32.vlgmr.msra.gmra.mrb[56].mxu1 %vm1518_vm11, %v2404_v24 }
 0x32b   : > { %6509 = vmatprep.mubr.msk.f32.mxu1 %vm1518_vm11, %v2405_v35  ;;  %7129 = vmatpush3.bf16.msra.mxu1 %v8885_v41 }
 0x32d   : > { %v2412_v17 = vpop.trf.xlu0  ;;  %v2860_v31 = vpop.trf.xlu1 }
 0x32e   : > { %6510 = vmatmul.mubr.msk.f32.gmra.mrb[58].mxu1 %vm1518_vm11, %v2406_v21 }
 0x32f   : > { %6512 = vmatprep.mubr.msk.f32.mxu1 %vm1518_vm11, %v2407_v52 }
 0x331   : > { %v2413_v34 = vpop.trf.xlu0  ;;  %v2861_v38 = vpop.trf.xlu1 }
 0x332   : > { %6513 = vmatmul.mubr.msk.f32.gmra.mrb[60].mxu1 %vm1518_vm11, %v2408_v30 }
 0x333   : > { %6515 = vmatprep.mubr.msk.f32.mxu1 %vm1518_vm11, %v2409_v25 }
 0x335   : > { %v2414_v40 = vpop.trf.xlu0  ;;  %v2862_v47 = vpop.trf.xlu1 }
 0x336   : > { %6516 = vmatmul.mubr.msk.f32.gmra.mrb[62].mxu1 %vm1518_vm11, %v2410_v60 }
 0x337   : > { %6518 = vmatprep.mubr.msk.f32.mxu1 %vm1518_vm11, %v2411_v18 }
 0x339   : > { %v2415_v45 = vpop.trf.xlu0  ;;  %v2863_v41 = vpop.trf.xlu1 }
 0x33a   : > { %6519 = vmatmul.mubr.msk.f32.gmra.mrb[64].mxu1 %vm1518_vm11, %v2412_v17 }
 0x33b   : > { %6521 = vmatprep.mubr.msk.f32.mxu1 %vm1518_vm11, %v2413_v34 }
 0x33d   : > { %v2416_v58 = vpop.trf.xlu0  ;;  %v2864_v54 = vpop.trf.xlu1 }
 0x33e   : > { %6522 = vmatmul.mubr.msk.f32.gmra.mrb[66].mxu1 %vm1518_vm11, %v2414_v40 }
 0x33f   : > { %6524 = vmatprep.mubr.msk.f32.mxu1 %vm1518_vm11, %v2415_v45 }
 0x341   : > { %v2417_v61 = vpop.trf.xlu0  ;;  %v2865_v24 = vpop.trf.xlu1 }
 0x342   : > { %6525 = vmatmul.mubr.msk.f32.gmra.mrb[68].mxu1 %vm1518_vm11, %v2416_v58 }
 0x343   : > { %6527 = vmatprep.mubr.msk.f32.mxu1 %vm1518_vm11, %v2417_v61 }
 0x345   : > { %v2418_v0 = vpop.trf.xlu0  ;;  %v2866_v35 = vpop.trf.xlu1 }
 0x346   : > { %6528 = vmatmul.mubr.msk.f32.gmra.mrb[70].mxu1 %vm1518_vm11, %v2418_v0 }
 0x347   : > { %6562 = vmatprep.mubr.msk.f32.mxu1 %vm1518_vm11, %v2853_v10  ;;  %v914_v10 = vadd.f32 %v8766_v44, %v8772_v51 }
 0x349   : > { %v1728_v21 = vpop.trf.xlu0  ;;  %v2867_v52 = vpop.trf.xlu1  ;;  %v1008_v60 = vadd.f32 1.0, %v914_v10  ;;  %vm992_vm2 = vcmp.gt.f32.partialorder %v914_v10, 0.0 }
 0x34a   : > { %6422 = vmatprep.mubr.msk.f32.mxu0 %vm1518_vm11, %v1728_v21  ;;  %6563 = vmatmul.mubr.msk.f32.vlgmr.msra.gmra.mrb[72].mxu1 %vm1518_vm11, %v2854_v29  ;;  %v1024_v29 = vmul.f32 1.442695, %v914_v10 }
 0x34b   : > { %6565 = vmatprep.mubr.msk.f32.mxu1 %vm1518_vm11, %v2855_v8 }
 0x34c   : > { %7697 = vpow2.f32 %v1024_v29 }
 0x34d   : > { %v1729_v30 = vpop.trf.xlu0  ;;  %v2868_v33 = vpop.trf.xlu1 }
 0x34e   : > { %6423 = vmatmul.mubr.msk.f32.vlgmr.msra.gmra.mrb[24].mxu0 %vm1518_vm11, %v1729_v30  ;;  %6566 = vmatmul.mubr.msk.f32.gmra.mrb[74].mxu1 %vm1518_vm11, %v2856_v13 }
 0x34f   : > { %7117 = vmatpush3.bf16.msra.mxu0 %v8903_v12  ;;  %6568 = vmatprep.mubr.msk.f32.mxu1 %vm1518_vm11, %v2857_v55 }
 0x350   : > { %7123 = vmatprep.subr.bf16.mxu0 %v8878_v32 }
 0x351   : > { %v1730_v37 = vpop.trf.xlu0  ;;  %v2178_v11 = vpop.trf.xlu1 }
 0x352   : > { %6425 = vmatprep.mubr.msk.f32.mxu0 %vm1518_vm11, %v1730_v37  ;;  %6569 = vmatmul.mubr.msk.f32.gmra.mrb[76].mxu1 %vm1518_vm11, %v2858_v63 }
 0x353   : > { %6571 = vmatprep.mubr.msk.f32.mxu1 %vm1518_vm11, %v2859_v3 }
 0x355   : > { %v1731_v8 = vpop.trf.xlu0  ;;  %v2179_v13 = vpop.trf.xlu1 }
 0x356   : > { %6426 = vmatmul.mubr.msk.f32.gmra.mrb[26].mxu0 %vm1518_vm11, %v1731_v8  ;;  %6572 = vmatmul.mubr.msk.f32.gmra.mrb[78].mxu1 %vm1518_vm11, %v2860_v31  ;;  %v7698_v63 = vpop.eup %7697 }
 0x357   : > { %6574 = vmatprep.mubr.msk.f32.mxu1 %vm1518_vm11, %v2861_v38  ;;  %v9039_v17 = vsel %vm992_vm2, %v1008_v60, %v7698_v63 }
 0x359   : > { %v1732_v12 = vpop.trf.xlu0  ;;  %v2180_v44 = vpop.trf.xlu1 }
 0x35a   : > { %6428 = vmatprep.mubr.msk.f32.mxu0 %vm1518_vm11, %v1732_v12  ;;  %6575 = vmatmul.mubr.msk.f32.gmra.mrb[80].mxu1 %vm1518_vm11, %v2862_v47 }
 0x35b   : > { %6577 = vmatprep.mubr.msk.f32.mxu1 %vm1518_vm11, %v2863_v41 }
 0x35d   : > { %v1733_v51 = vpop.trf.xlu0  ;;  %v2181_v39 = vpop.trf.xlu1 }
 0x35e   : > { %6429 = vmatmul.mubr.msk.f32.gmra.mrb[28].mxu0 %vm1518_vm11, %v1733_v51  ;;  %6578 = vmatmul.mubr.msk.f32.gmra.mrb[82].mxu1 %vm1518_vm11, %v2864_v54 }
 0x35f   : > { %6580 = vmatprep.mubr.msk.f32.mxu1 %vm1518_vm11, %v2865_v24 }
 0x361   : > { %v1734_v25 = vpop.trf.xlu0  ;;  %v2182_v55 = vpop.trf.xlu1 }
 0x362   : > { %6431 = vmatprep.mubr.msk.f32.mxu0 %vm1518_vm11, %v1734_v25  ;;  %6581 = vmatmul.mubr.msk.f32.gmra.mrb[84].mxu1 %vm1518_vm11, %v2866_v35  ;;  %v9073_v25 = vld [vmem:[#allocation7 + $0x8] sm:$0xff] }
 0x363   : > { %6583 = vmatprep.mubr.msk.f32.mxu1 %vm1518_vm11, %v2867_v52 }
 0x365   : > { %v1735_v18 = vpop.trf.xlu0  ;;  %v2183_v3 = vpop.trf.xlu1 }
 0x366   : > { %6432 = vmatmul.mubr.msk.f32.gmra.mrb[30].mxu0 %vm1518_vm11, %v1735_v18  ;;  %6584 = vmatmul.mubr.msk.f32.gmra.mrb[86].mxu1 %vm1518_vm11, %v2868_v33 }
 0x367   : > { %6646 = vmatprep.mubr.f32.mxu1 %v9039_v17 }
 0x369   : > { %v1736_v31 = vpop.trf.xlu0  ;;  %v2184_v34 = vpop.trf.xlu1 }
 0x36a   : > { %6434 = vmatprep.mubr.msk.f32.mxu0 %vm1518_vm11, %v1736_v31 }
 0x36d   : > { %v1737_v38 = vpop.trf.xlu0  ;;  %v2185_v40 = vpop.trf.xlu1 }
 0x36e   : > { %6435 = vmatmul.mubr.msk.f32.gmra.mrb[32].mxu0 %vm1518_vm11, %v1737_v38 }
 0x371   : > { %v1738_v47 = vpop.trf.xlu0  ;;  %v2186_v45 = vpop.trf.xlu1 }
 0x372   : > { %6437 = vmatprep.mubr.msk.f32.mxu0 %vm1518_vm11, %v1738_v47 }
 0x375   : > { %v1739_v41 = vpop.trf.xlu0  ;;  %v2187_v58 = vpop.trf.xlu1 }
 0x376   : > { %6438 = vmatmul.mubr.msk.f32.gmra.mrb[34].mxu0 %vm1518_vm11, %v1739_v41  ;;  %v9089_v41 = vld [vmem:[#allocation7 + $0x10] sm:$0xff] }
 0x379   : > { %v1740_v54 = vpop.trf.xlu0  ;;  %v2188_v61 = vpop.trf.xlu1 }
 0x37a   : > { %6440 = vmatprep.mubr.msk.f32.mxu0 %vm1518_vm11, %v1740_v54 }
 0x37d   : > { %v1741_v24 = vpop.trf.xlu0  ;;  %v2189_v0 = vpop.trf.xlu1 }
 0x37e   : > { %6441 = vmatmul.mubr.msk.f32.gmra.mrb[36].mxu0 %vm1518_vm11, %v1741_v24 }
 0x381   : > { %v1742_v35 = vpop.trf.xlu0  ;;  %v2190_v21 = vpop.trf.xlu1 }
 0x382   : > { %6443 = vmatprep.mubr.msk.f32.mxu0 %vm1518_vm11, %v1742_v35 }
 0x385   : > { %v1743_v52 = vpop.trf.xlu0  ;;  %v2191_v30 = vpop.trf.xlu1 }
 0x386   : > { %6444 = vmatmul.mubr.msk.f32.gmra.mrb[38].mxu0 %vm1518_vm11, %v1743_v52 }
 0x387   : > { %6478 = vmatprep.mubr.msk.f32.mxu0 %vm1518_vm11, %v2178_v11 }
 0x389   : > { %v2628_v33 = vpop.trf.xlu0  ;;  %v2192_v10 = vpop.trf.xlu1 }
 0x38a   : > { %6479 = vmatmul.mubr.msk.f32.vlgmr.msra.gmra.mrb[40].mxu0 %vm1518_vm11, %v2179_v13 }
 0x38b   : > { %7125 = vmatpush3.bf16.msra.mxu0 %v8878_v32  ;;  %6481 = vmatprep.mubr.msk.f32.mxu0 %vm1518_vm11, %v2180_v44 }
 0x38c   : > { %7131 = vmatprep.subr.bf16.mxu0 %v8990_v4 }
 0x38d   : > { %v2629_v37 = vpop.trf.xlu0  ;;  %v2193_v29 = vpop.trf.xlu1 }
 0x38e   : > { %6482 = vmatmul.mubr.msk.f32.gmra.mrb[42].mxu0 %vm1518_vm11, %v2181_v39 }
 0x38f   : > { %6484 = vmatprep.mubr.msk.f32.mxu0 %vm1518_vm11, %v2182_v55  ;;  %v9075_v55 = vld [vmem:[#allocation7] sm:$0xff] }
 0x391   : > { %v2630_v8 = vpop.trf.xlu0  ;;  %v9057_v12 = vpop.trf.xlu1 }
 0x392   : > { %6485 = vmatmul.mubr.msk.f32.gmra.mrb[44].mxu0 %vm1518_vm11, %v2183_v3 }
 0x393   : > { %6487 = vmatprep.mubr.msk.f32.mxu0 %vm1518_vm11, %v2184_v34 }
 0x395   : > { %v2631_v11 = vpop.trf.xlu0  ;;  %v9061_v13 = vpop.trf.xlu1 }
 0x396   : > { %6488 = vmatmul.mubr.msk.f32.gmra.mrb[46].mxu0 %vm1518_vm11, %v2185_v40 }
 0x397   : > { %6490 = vmatprep.mubr.msk.f32.mxu0 %vm1518_vm11, %v2186_v45  ;;  %v9087_v45 = vld [vmem:[#allocation7 + $0x18] sm:$0xff] }
 0x399   : > { %v2632_v32 = vpop.trf.xlu0  ;;  %v9065_v44 = vpop.trf.xlu1 }
 0x39a   : > { %6491 = vmatmul.mubr.msk.f32.gmra.mrb[48].mxu0 %vm1518_vm11, %v2187_v58 }
 0x39b   : > { %6493 = vmatprep.mubr.msk.f32.mxu0 %vm1518_vm11, %v2188_v61 }
 0x39d   : > { %v2633_v51 = vpop.trf.xlu0  ;;  %v9069_v39 = vpop.trf.xlu1 }
 0x39e   : > { %6494 = vmatmul.mubr.msk.f32.gmra.mrb[50].mxu0 %vm1518_vm11, %v2189_v0 }
 0x39f   : > { %6496 = vmatprep.mubr.msk.f32.mxu0 %vm1518_vm11, %v2190_v21 }
 0x3a1   : > { %v2634_v60 = vpop.trf.xlu0  ;;  %v6396_v63 = vpop.f32.mrb[24].mxu1 }
 0x3a2   : > { %v3288_v18 = vmul.f32 %v6396_v63, %v9073_v25  ;;  %v1633_v3 = vpop.f32.mrb[25].mxu1  ;;  %6497 = vmatmul.mubr.msk.f32.gmra.mrb[52].mxu0 %vm1518_vm11, %v2191_v30  ;;  %v9079_v31 = vpop.trf.xlu1  ;;  %v9100_v30 = vld [vmem:[#allocation7 + $0x28] sm:$0xff] }
 0x3a3   : > { %v3287_v34 = vmul.f32 %v1633_v3, %v9075_v55  ;;  %6499 = vmatprep.mubr.msk.f32.mxu0 %vm1518_vm11, %v2192_v10  ;;  %v9114_v3 = vld [vmem:[#allocation7 + $0x30] sm:$0xff] }
 0x3a5   : > { %v7134_v38 = vpack.c.bf16 %v3288_v18, %v3287_v34  ;;  %v2635_v40 = vpop.trf.xlu0  ;;  %v9112_v18 = vld [vmem:[#allocation7 + $0x38] sm:$0xff] }
 0x3a6   : > { %6500 = vmatmul.mubr.msk.f32.gmra.mrb[54].mxu0 %vm1518_vm11, %v2193_v29  ;;  %v9084_v47 = vpop.trf.xlu1 }
 0x3a7   : > { %6534 = vmatprep.mubr.msk.f32.mxu0 %vm1518_vm11, %v2628_v33  ;;  %7135 = vmatprep.subr.bf16.mxu1 %v7134_v38  ;;  %v9102_v33 = vld [vmem:[#allocation7 + $0x20] sm:$0xff] }
 0x3a8   : > { %7137 = vmatpush3.bf16.msra.mxu1 %v7134_v38 }
 0x3a9   : > { %v2636_v58 = vpop.trf.xlu0  ;;  %v6399_v54 = vpop.f32.mrb[26].mxu1 }
 0x3aa   : > { %v3290_v61 = vmul.f32 %v6399_v54, %v9087_v45  ;;  %v1643_v24 = vpop.f32.mrb[27].mxu1  ;;  %6535 = vmatmul.mubr.msk.f32.vlgmr.msra.gmra.mrb[56].mxu0 %vm1518_vm11, %v2629_v37  ;;  %v9096_v35 = vpop.trf.xlu1 }
 0x3ab   : > { %v3289_v0 = vmul.f32 %v1643_v24, %v9089_v41  ;;  %7133 = vmatpush3.bf16.msra.mxu0 %v8990_v4  ;;  %6537 = vmatprep.mubr.msk.f32.mxu0 %vm1518_vm11, %v2630_v8  ;;  %v9122_v24 = vld [vmem:[#allocation7 + $0x48] sm:$0xff] }
 0x3ad   : > { %v7138_v21 = vpack.c.bf16 %v3290_v61, %v3289_v0  ;;  %v2637_v52 = vpop.trf.xlu0 }
 0x3ae   : > { %6538 = vmatmul.mubr.msk.f32.gmra.mrb[58].mxu0 %vm1518_vm11, %v2631_v11  ;;  %v9106_v8 = vpop.trf.xlu1 }
 0x3af   : > { %6540 = vmatprep.mubr.msk.f32.mxu0 %vm1518_vm11, %v2632_v32  ;;  %7139 = vmatprep.subr.bf16.mxu1 %v7138_v21 }
 0x3b0   : > { %7141 = vmatpush3.bf16.msra.mxu1 %v7138_v21  ;;  %v9124_v21 = vld [vmem:[#allocation7 + $0x40] sm:$0xff] }
 0x3b1   : > { %v2638_v10 = vpop.trf.xlu0  ;;  %v6402_v37 = vpop.f32.mrb[28].mxu1 }
 0x3b2   : > { %v3292_v4 = vmul.f32 %v6402_v37, %v9100_v30  ;;  %v1653_v29 = vpop.f32.mrb[29].mxu1  ;;  %6541 = vmatmul.mubr.msk.f32.gmra.mrb[60].mxu0 %vm1518_vm11, %v2633_v51  ;;  %v3086_v34 = vpop.trf.xlu1 }
 0x3b3   : > { %v3291_v63 = vmul.f32 %v1653_v29, %v9102_v33  ;;  %6543 = vmatprep.mubr.msk.f32.mxu0 %vm1518_vm11, %v2634_v60 }
 0x3b5   : > { %v7142_v11 = vpack.c.bf16 %v3292_v4, %v3291_v63  ;;  %v2639_v32 = vpop.trf.xlu0 }
 0x3b6   : > { %6544 = vmatmul.mubr.msk.f32.gmra.mrb[62].mxu0 %vm1518_vm11, %v2635_v40  ;;  %v3087_v0 = vpop.trf.xlu1 }
 0x3b7   : > { %6546 = vmatprep.mubr.msk.f32.mxu0 %vm1518_vm11, %v2636_v58  ;;  %7143 = vmatprep.subr.bf16.mxu1 %v7142_v11 }
 0x3b8   : > { %7145 = vmatpush3.bf16.msra.mxu1 %v7142_v11 }
 0x3b9   : > { %v2640_v51 = vpop.trf.xlu0  ;;  %v6405_v38 = vpop.f32.mrb[30].mxu1 }
 0x3ba   : > { %v3294_v54 = vmul.f32 %v6405_v38, %v9112_v18  ;;  %v1663_v61 = vpop.f32.mrb[31].mxu1  ;;  %6547 = vmatmul.mubr.msk.f32.gmra.mrb[64].mxu0 %vm1518_vm11, %v2637_v52  ;;  %v9135_v38 = vld [vmem:[#allocation7 + $0x50] sm:$0xff] }
 0x3bb   : > { %v3293_v60 = vmul.f32 %v1663_v61, %v9114_v3  ;;  %6549 = vmatprep.mubr.msk.f32.mxu0 %vm1518_vm11, %v2638_v10 }
 0x3bd   : > { %v7146_v40 = vpack.c.bf16 %v3294_v54, %v3293_v60  ;;  %v2641_v58 = vpop.trf.xlu0 }
 0x3be   : > { %6550 = vmatmul.mubr.msk.f32.gmra.mrb[66].mxu0 %vm1518_vm11, %v2639_v32  ;;  %v3088_v32 = vpop.trf.xlu1 }
 0x3bf   : > { %6552 = vmatprep.mubr.msk.f32.mxu0 %vm1518_vm11, %v2640_v51  ;;  %7147 = vmatprep.subr.bf16.mxu1 %v7146_v40  ;;  %v9133_v51 = vld [vmem:[#allocation7 + $0x58] sm:$0xff] }
 0x3c0   : > { %7149 = vmatpush3.bf16.msra.mxu1 %v7146_v40 }
 0x3c1   : > { %v2642_v37 = vpop.trf.xlu0  ;;  %v6408_v4 = vpop.f32.mrb[32].mxu1 }
 0x3c2   : > { %v3296_v52 = vmul.f32 %v6408_v4, %v9122_v24  ;;  %v1673_v29 = vpop.f32.mrb[33].mxu1  ;;  %6553 = vmatmul.mubr.msk.f32.gmra.mrb[68].mxu0 %vm1518_vm11, %v2641_v58  ;;  %v3089_v58 = vpop.trf.xlu1  ;;  %v9149_v4 = vld [vmem:[#allocation7 + $0x60] sm:$0xff] }
 0x3c3   : > { %v3295_v10 = vmul.f32 %v1673_v29, %v9124_v21  ;;  %6555 = vmatprep.mubr.msk.f32.mxu0 %vm1518_vm11, %v2642_v37  ;;  %v9147_v37 = vld [vmem:[#allocation7 + $0x68] sm:$0xff] }
 0x3c5   : > { %v7150_v63 = vpack.c.bf16 %v3296_v52, %v3295_v10  ;;  %v2643_v11 = vpop.trf.xlu0 }
 0x3c6   : > { %6556 = vmatmul.mubr.msk.f32.gmra.mrb[70].mxu0 %vm1518_vm11, %v2643_v11  ;;  %v3090_v29 = vpop.trf.xlu1 }
 0x3c7   : > { %6590 = vmatprep.mubr.msk.f32.mxu0 %vm1518_vm11, %v9057_v12  ;;  %7151 = vmatprep.subr.bf16.mxu1 %v7150_v63 }
 0x3c8   : > { %7153 = vmatpush3.bf16.msra.mxu1 %v7150_v63 }
 0x3c9   : > { %v6411_v54 = vpop.f32.mrb[34].mxu1 }
 0x3ca   : > { %v3298_v61 = vmul.f32 %v6411_v54, %v9133_v51  ;;  %v1683_v60 = vpop.f32.mrb[35].mxu1  ;;  %6591 = vmatmul.mubr.msk.f32.vlgmr.msra.gmra.mrb[72].mxu0 %vm1518_vm11, %v9061_v13  ;;  %v1026_v13 = vmul.f32 1.442695, %v8770_v50  ;;  %v9163_v54 = vld [vmem:[#allocation7 + $0x78] sm:$0xff] }
 0x3cb   : > { %v3297_v40 = vmul.f32 %v1683_v60, %v9135_v38  ;;  %6593 = vmatprep.mubr.msk.f32.mxu0 %vm1518_vm11, %v9065_v44  ;;  %v1032_v44 = vmul.f32 1.442695, %v8792_v6 }
 0x3cc   : > { %7699 = vpow2.f32 %v1026_v13 }
 0x3cd   : > { %v7154_v12 = vpack.c.bf16 %v3298_v61, %v3297_v40  ;;  %7701 = vpow2.f32 %v1032_v44  ;;  %v3091_v61 = vpop.trf.xlu1 }
 0x3ce   : > { %6594 = vmatmul.mubr.msk.f32.gmra.mrb[74].mxu0 %vm1518_vm11, %v9069_v39 }
 0x3cf   : > { %6596 = vmatprep.mubr.msk.f32.mxu0 %vm1518_vm11, %v9079_v31  ;;  %7155 = vmatprep.subr.bf16.mxu1 %v7154_v12  ;;  %v1028_v31 = vmul.f32 1.442695, %v8786_v62 }
 0x3d0   : > { %7157 = vmatpush3.bf16.msra.mxu1 %v7154_v12 }
 0x3d1   : > { %v6414_v52 = vpop.f32.mrb[36].mxu1  ;;  %7703 = vpow2.f32 %v1028_v31  ;;  %v3092_v13 = vpop.trf.xlu1 }
 0x3d2   : > { %v3300_v10 = vmul.f32 %v6414_v52, %v9147_v37  ;;  %v1693_v63 = vpop.f32.mrb[37].mxu1  ;;  %6597 = vmatmul.mubr.msk.f32.gmra.mrb[76].mxu0 %vm1518_vm11, %v9084_v47  ;;  %v9165_v47 = vld [vmem:[#allocation7 + $0x70] sm:$0xff]  ;;  %v1009_v52 = vadd.f32 1.0, %v8770_v50 }
 0x3d3   : > { %v3299_v39 = vmul.f32 %v1693_v63, %v9149_v4  ;;  %6599 = vmatprep.mubr.msk.f32.mxu0 %vm1518_vm11, %v9096_v35 }
 0x3d5   : > { %v7158_v11 = vpack.c.bf16 %v3300_v10, %v3299_v39  ;;  %v1012_v39 = vadd.f32 1.0, %v8792_v6  ;;  %v3093_v6 = vpop.trf.xlu1 }
 0x3d6   : > { %6600 = vmatmul.mubr.msk.f32.gmra.mrb[78].mxu0 %vm1518_vm11, %v9106_v8  ;;  %v7700_v63 = vpop.eup %7699 }
 0x3d7   : > { %6602 = vmatprep.mubr.msk.f32.mxu0 %vm1518_vm11, %v3086_v34  ;;  %7159 = vmatprep.subr.bf16.mxu1 %v7158_v11  ;;  %v9182_v50 = vsel %vm993_vm3, %v1009_v52, %v7700_v63 }
 0x3d8   : > { %7161 = vmatpush3.bf16.msra.mxu1 %v7158_v11 }
 0x3d9   : > { %v6417_v60 = vpop.f32.mrb[38].mxu1 }
 0x3da   : > { %v3302_v35 = vmul.f32 %v6417_v60, %v9163_v54  ;;  %v1703_v40 = vpop.f32.mrb[39].mxu1  ;;  %6603 = vmatmul.mubr.msk.f32.gmra.mrb[80].mxu0 %vm1518_vm11, %v3087_v0  ;;  %v1010_v60 = vadd.f32 1.0, %v8786_v62 }
 0x3db   : > { %v3301_v12 = vmul.f32 %v1703_v40, %v9165_v47  ;;  %6605 = vmatprep.mubr.msk.f32.mxu0 %vm1518_vm11, %v3088_v32  ;;  %v7702_v32 = vpop.eup %7701 }
 0x3dc   : > { %v7704_v40 = vpop.eup %7703 }
 0x3dd   : > { %v7162_v8 = vpack.c.bf16 %v3302_v35, %v3301_v12  ;;  %v6452_v34 = vpop.f32.mrb[40].mxu1 }
 0x3de   : > { %v3320_v44 = vmul.f32 %v6452_v34, %v9073_v25  ;;  %v2083_v10 = vpop.f32.mrb[41].mxu1  ;;  %6606 = vmatmul.mubr.msk.f32.gmra.mrb[82].mxu0 %vm1518_vm11, %v3089_v58 }
 0x3df   : > { %v3319_v0 = vmul.f32 %v2083_v10, %v9075_v55  ;;  %6608 = vmatprep.mubr.msk.f32.mxu0 %vm1518_vm11, %v3090_v29  ;;  %7163 = vmatprep.subr.bf16.mxu1 %v7162_v8  ;;  %v9187_v29 = vsel %vm996_vm4, %v1012_v39, %v7702_v32 }
 0x3e0   : > { %7165 = vmatpush3.bf16.msra.mxu1 %v7162_v8 }
 0x3e1   : > { %v7198_v31 = vpack.c.bf16 %v3320_v44, %v3319_v0  ;;  %v6455_v11 = vpop.f32.mrb[42].mxu1  ;;  %v9193_v44 = vsel %vm994_vm5, %v1010_v60, %v7704_v40 }
 0x3e2   : > { %v3322_v58 = vmul.f32 %v6455_v11, %v9087_v45  ;;  %v2093_v35 = vpop.f32.mrb[43].mxu1  ;;  %6609 = vmatmul.mubr.msk.f32.gmra.mrb[84].mxu0 %vm1518_vm11, %v3091_v61 }
 0x3e3   : > { %v3321_v12 = vmul.f32 %v2093_v35, %v9089_v41  ;;  %6611 = vmatprep.mubr.msk.f32.mxu0 %vm1518_vm11, %v3092_v13  ;;  %6647 = vmatmul.mubr.f32.vlgmr.msra.gmra.mrb[88].mxu1 %v9182_v50 }
 0x3e4   : > { %7199 = vmatprep.subr.bf16.mxu1 %v7198_v31  ;;  %6716 = vmatprep.mubr.f32.mxu1 %v9187_v29 }
 0x3e5   : > { %v7202_v8 = vpack.c.bf16 %v3322_v58, %v3321_v12  ;;  %7201 = vmatpush3.bf16.msra.mxu1 %v7198_v31  ;;  %v6458_v61 = vpop.f32.mrb[44].mxu1  ;;  %v1034_v12 = vmul.f32 1.442695, %v8789_v5 }
 0x3e6   : > { %v3324_v34 = vmul.f32 %v6458_v61, %v9100_v30  ;;  %v2103_v52 = vpop.f32.mrb[45].mxu1  ;;  %6612 = vmatmul.mubr.msk.f32.gmra.mrb[86].mxu0 %vm1518_vm11, %v3093_v6  ;;  %v1040_v61 = vmul.f32 1.442695, %v8816_v43  ;;  %vm998_vm11 = vcmp.gt.f32.partialorder %v8808_v27, 0.0 }
 0x3e7   : > { %v3323_v13 = vmul.f32 %v2103_v52, %v9102_v33  ;;  %6681 = vmatprep.mubr.f32.mxu0 %v9193_v44  ;;  %7203 = vmatprep.subr.bf16.mxu1 %v7202_v8  ;;  %7705 = vpow2.f32 %v1034_v12  ;;  %v1013_v12 = vadd.f32 1.0, %v8789_v5 }
 0x3e8   : > { %7707 = vpow2.f32 %v1040_v61  ;;  %v1016_v61 = vadd.f32 1.0, %v8816_v43 }
 0x3e9   : > { %v7206_v10 = vpack.c.bf16 %v3324_v34, %v3323_v13  ;;  %7205 = vmatpush3.bf16.msra.mxu1 %v7202_v8  ;;  %v6461_v62 = vpop.f32.mrb[46].mxu1 }
 0x3ea   : > { %v3326_v63 = vmul.f32 %v6461_v62, %v9112_v18  ;;  %v2113_v39 = vpop.f32.mrb[47].mxu1 }
 0x3eb   : > { %v3325_v0 = vmul.f32 %v2113_v39, %v9114_v3  ;;  %7207 = vmatprep.subr.bf16.mxu1 %v7206_v10 }
 0x3ed   : > { %v7210_v32 = vpack.c.bf16 %v3326_v63, %v3325_v0  ;;  %7209 = vmatpush3.bf16.msra.mxu1 %v7206_v10  ;;  %v6464_v31 = vpop.f32.mrb[48].mxu1 }
 0x3ee   : > { %v3328_v11 = vmul.f32 %v6464_v31, %v9122_v24  ;;  %v2123_v60 = vpop.f32.mrb[49].mxu1 }
 0x3ef   : > { %v3327_v58 = vmul.f32 %v2123_v60, %v9124_v21  ;;  %7211 = vmatprep.subr.bf16.mxu1 %v7210_v32 }
 0x3f1   : > { %v7214_v35 = vpack.c.bf16 %v3328_v11, %v3327_v58  ;;  %7213 = vmatpush3.bf16.msra.mxu1 %v7210_v32  ;;  %v6467_v40 = vpop.f32.mrb[50].mxu1 }
 0x3f2   : > { %v3330_v6 = vmul.f32 %v6467_v40, %v9133_v51  ;;  %v2133_v8 = vpop.f32.mrb[51].mxu1 }
 0x3f3   : > { %v3329_v34 = vmul.f32 %v2133_v8, %v9135_v38  ;;  %7215 = vmatprep.subr.bf16.mxu1 %v7214_v35  ;;  %v7706_v8 = vpop.eup %7705 }
 0x3f5   : > { %v7218_v52 = vpack.c.bf16 %v3330_v6, %v3329_v34  ;;  %7217 = vmatpush3.bf16.msra.mxu1 %v7214_v35  ;;  %v6470_v13 = vpop.f32.mrb[52].mxu1  ;;  %v7708_v34 = vpop.eup %7707 }
 0x3f6   : > { %v3332_v10 = vmul.f32 %v6470_v13, %v9147_v37  ;;  %v2143_v62 = vpop.f32.mrb[53].mxu1 }
 0x3f7   : > { %v3331_v63 = vmul.f32 %v2143_v62, %v9149_v4  ;;  %7219 = vmatprep.subr.bf16.mxu1 %v7218_v52 }
 0x3f9   : > { %v7222_v39 = vpack.c.bf16 %v3332_v10, %v3331_v63  ;;  %7221 = vmatpush3.bf16.msra.mxu1 %v7218_v52  ;;  %v6473_v0 = vpop.f32.mrb[54].mxu1 }
 0x3fa   : > { %v3334_v32 = vmul.f32 %v6473_v0, %v9163_v54  ;;  %v2153_v31 = vpop.f32.mrb[55].mxu1  ;;  %v9220_v0 = vsel %vm1000_vm7, %v1016_v61, %v7708_v34 }
 0x3fb   : > { %v3333_v11 = vmul.f32 %v2153_v31, %v9165_v47  ;;  %7223 = vmatprep.subr.bf16.mxu1 %v7222_v39 }
 0x3fd   : > { %v7226_v60 = vpack.c.bf16 %v3334_v32, %v3333_v11  ;;  %7225 = vmatpush3.bf16.msra.mxu1 %v7222_v39  ;;  %v6508_v58 = vpop.f32.mrb[56].mxu1  ;;  %v9217_v39 = vsel %vm997_vm6, %v1013_v12, %v7706_v8 }
 0x3fe   : > { %v3352_v35 = vmul.f32 %v6508_v58, %v9073_v25  ;;  %v2533_v40 = vpop.f32.mrb[57].mxu1 }
 0x3ff   : > { %v3351_v6 = vmul.f32 %v2533_v40, %v9075_v55  ;;  %7227 = vmatprep.subr.bf16.mxu1 %v7226_v60 }
 0x401   : > { %v7262_v52 = vpack.c.bf16 %v3352_v35, %v3351_v6  ;;  %7229 = vmatpush3.bf16.msra.mxu1 %v7226_v60  ;;  %v6511_v13 = vpop.f32.mrb[58].mxu1 }
 0x402   : > { %v3354_v10 = vmul.f32 %v6511_v13, %v9087_v45  ;;  %v2543_v62 = vpop.f32.mrb[59].mxu1 }
 0x403   : > { %v3353_v63 = vmul.f32 %v2543_v62, %v9089_v41  ;;  %7263 = vmatprep.subr.bf16.mxu1 %v7262_v52  ;;  %v1042_v62 = vmul.f32 1.442695, %v8811_v28 }
 0x404   : > { %6717 = vmatmul.mubr.f32.vlgmr.msra.gmra.mrb[90].mxu1 %v9217_v39 }
 0x405   : > { %v7266_v5 = vpack.c.bf16 %v3354_v10, %v3353_v63  ;;  %7265 = vmatpush3.bf16.msra.mxu1 %v7262_v52  ;;  %6786 = vmatprep.mubr.f32.mxu1 %v9220_v0  ;;  %v6514_v32 = vpop.f32.mrb[60].mxu1  ;;  %7709 = vpow2.f32 %v1042_v62  ;;  %v1017_v62 = vadd.f32 1.0, %v8811_v28 }
 0x406   : > { %v3356_v31 = vmul.f32 %v6514_v32, %v9100_v30  ;;  %v2553_v43 = vpop.f32.mrb[61].mxu1  ;;  %v1048_v32 = vmul.f32 1.442695, %v8836_v14 }
 0x407   : > { %v3355_v11 = vmul.f32 %v2553_v43, %v9102_v33  ;;  %7267 = vmatprep.subr.bf16.mxu1 %v7266_v5 }
 0x408   : > { %7711 = vpow2.f32 %v1048_v32  ;;  %v1020_v32 = vadd.f32 1.0, %v8836_v14 }
 0x409   : > { %v7270_v60 = vpack.c.bf16 %v3356_v31, %v3355_v11  ;;  %7269 = vmatpush3.bf16.msra.mxu1 %v7266_v5  ;;  %v6517_v58 = vpop.f32.mrb[62].mxu1 }
 0x40a   : > { %v3358_v35 = vmul.f32 %v6517_v58, %v9112_v18  ;;  %v2563_v40 = vpop.f32.mrb[63].mxu1 }
 0x40b   : > { %v3357_v12 = vmul.f32 %v2563_v40, %v9114_v3  ;;  %7271 = vmatprep.subr.bf16.mxu1 %v7270_v60 }
 0x40d   : > { %v7274_v6 = vpack.c.bf16 %v3358_v35, %v3357_v12  ;;  %7273 = vmatpush3.bf16.msra.mxu1 %v7270_v60  ;;  %v6520_v8 = vpop.f32.mrb[64].mxu1 }
 0x40e   : > { %v3360_v61 = vmul.f32 %v6520_v8, %v9122_v24  ;;  %v2573_v34 = vpop.f32.mrb[65].mxu1 }
 0x40f   : > { %v3359_v52 = vmul.f32 %v2573_v34, %v9124_v21  ;;  %7275 = vmatprep.subr.bf16.mxu1 %v7274_v6 }
 0x411   : > { %v7278_v13 = vpack.c.bf16 %v3360_v61, %v3359_v52  ;;  %7277 = vmatpush3.bf16.msra.mxu1 %v7274_v6  ;;  %v6523_v10 = vpop.f32.mrb[66].mxu1 }
 0x412   : > { %v3362_v63 = vmul.f32 %v6523_v10, %v9133_v51  ;;  %v2583_v5 = vpop.f32.mrb[67].mxu1 }
 0x413   : > { %v3361_v31 = vmul.f32 %v2583_v5, %v9135_v38  ;;  %7279 = vmatprep.subr.bf16.mxu1 %v7278_v13  ;;  %v7710_v5 = vpop.eup %7709 }
 0x414   : > { %v9247_v28 = vsel %vm1001_vm8, %v1017_v62, %v7710_v5 }
 0x415   : > { %v7282_v43 = vpack.c.bf16 %v3362_v63, %v3361_v31  ;;  %7281 = vmatpush3.bf16.msra.mxu1 %v7278_v13  ;;  %v6526_v11 = vpop.f32.mrb[68].mxu1  ;;  %v7712_v31 = vpop.eup %7711 }
 0x416   : > { %v3364_v60 = vmul.f32 %v6526_v11, %v9147_v37  ;;  %v2593_v58 = vpop.f32.mrb[69].mxu1 }
 0x417   : > { %v3363_v35 = vmul.f32 %v2593_v58, %v9149_v4  ;;  %7283 = vmatprep.subr.bf16.mxu1 %v7282_v43 }
 0x419   : > { %v7286_v40 = vpack.c.bf16 %v3364_v60, %v3363_v35  ;;  %7285 = vmatpush3.bf16.msra.mxu1 %v7282_v43  ;;  %v6529_v12 = vpop.f32.mrb[70].mxu1 }
 0x41a   : > { %v3366_v6 = vmul.f32 %v6529_v12, %v9163_v54  ;;  %v2603_v8 = vpop.f32.mrb[71].mxu1 }
 0x41b   : > { %v3365_v61 = vmul.f32 %v2603_v8, %v9165_v47  ;;  %7287 = vmatprep.subr.bf16.mxu1 %v7286_v40 }
 0x41d   : > { %v7290_v34 = vpack.c.bf16 %v3366_v6, %v3365_v61  ;;  %7289 = vmatpush3.bf16.msra.mxu1 %v7286_v40  ;;  %v6564_v52 = vpop.f32.mrb[72].mxu1  ;;  %v9250_v61 = vsel %vm1004_vm9, %v1020_v32, %v7712_v31 }
 0x41e   : > { %v3384_v13 = vmul.f32 %v6564_v52, %v9073_v25  ;;  %v2983_v10 = vpop.f32.mrb[73].mxu1 }
 0x41f   : > { %v3383_v63 = vmul.f32 %v2983_v10, %v9075_v55  ;;  %7291 = vmatprep.subr.bf16.mxu1 %v7290_v34 }
 0x421   : > { %v7326_v43 = vpack.c.bf16 %v3384_v13, %v3383_v63  ;;  %7293 = vmatpush3.bf16.msra.mxu1 %v7290_v34  ;;  %v6424_v11 = vpop.f32.mrb[24].mxu0  ;;  %v6567_v60 = vpop.f32.mrb[74].mxu1 }
 0x422   : > { %v3304_v58 = vmul.f32 %v6424_v11, %v9073_v25  ;;  %v3386_v35 = vmul.f32 %v6567_v60, %v9087_v45  ;;  %v1858_v40 = vpop.f32.mrb[25].mxu0  ;;  %v2993_v12 = vpop.f32.mrb[75].mxu1 }
 0x423   : > { %v3303_v6 = vmul.f32 %v1858_v40, %v9075_v55  ;;  %v3385_v8 = vmul.f32 %v2993_v12, %v9089_v41  ;;  %7327 = vmatprep.subr.bf16.mxu1 %v7326_v43 }
 0x424   : > { %6787 = vmatmul.mubr.f32.vlgmr.msra.gmra.mrb[92].mxu1 %v9247_v28 }
 0x425   : > { %v7166_v34 = vpack.c.bf16 %v3304_v58, %v3303_v6  ;;  %v7330_v52 = vpack.c.bf16 %v3386_v35, %v3385_v8  ;;  %7329 = vmatpush3.bf16.msra.mxu1 %v7326_v43  ;;  %6856 = vmatprep.mubr.f32.mxu1 %v9250_v61  ;;  %v6570_v14 = vpop.f32.mrb[76].mxu1  ;;  %v4016_v58 = vrot.slane %v8800_v19, 4 }
 0x426   : > { %v3388_v13 = vmul.f32 %v6570_v14, %v9100_v30  ;;  %v3003_v10 = vpop.f32.mrb[77].mxu1 }
 0x427   : > { %v3387_v63 = vmul.f32 %v3003_v10, %v9102_v33  ;;  %7167 = vmatprep.subr.bf16.mxu0 %v7166_v34  ;;  %7331 = vmatprep.subr.bf16.mxu1 %v7330_v52  ;;  %v4017_v14 = vadd.f32 %v4016_v58, %v8800_v19 }
 0x428   : > { %7169 = vmatpush3.bf16.msra.mxu0 %v7166_v34 }
 0x429   : > { %v7334_v62 = vpack.c.bf16 %v3388_v13, %v3387_v63  ;;  %7333 = vmatpush3.bf16.msra.mxu1 %v7330_v52  ;;  %v6427_v5 = vpop.f32.mrb[26].mxu0  ;;  %v6573_v11 = vpop.f32.mrb[78].mxu1 }
 0x42a   : > { %v3306_v32 = vmul.f32 %v6427_v5, %v9087_v45  ;;  %v3390_v31 = vmul.f32 %v6573_v11, %v9112_v18  ;;  %v1868_v43 = vpop.f32.mrb[27].mxu0  ;;  %v3013_v60 = vpop.f32.mrb[79].mxu1 }
 0x42b   : > { %v3305_v35 = vmul.f32 %v1868_v43, %v9089_v41  ;;  %v3389_v40 = vmul.f32 %v3013_v60, %v9114_v3  ;;  %7335 = vmatprep.subr.bf16.mxu1 %v7334_v62  ;;  %v4018_v43 = vrot.slane %v4017_v14, 2 }
 0x42d   : > { %v7170_v12 = vpack.c.bf16 %v3306_v32, %v3305_v35  ;;  %v7338_v6 = vpack.c.bf16 %v3390_v31, %v3389_v40  ;;  %7337 = vmatpush3.bf16.msra.mxu1 %v7334_v62  ;;  %v6576_v8 = vpop.f32.mrb[80].mxu1 }
 0x42e   : > { %v3392_v34 = vmul.f32 %v6576_v8, %v9122_v24  ;;  %v3023_v52 = vpop.f32.mrb[81].mxu1  ;;  %v4019_v8 = vadd.f32 %v4018_v43, %v4017_v14 }
 0x42f   : > { %v3391_v13 = vmul.f32 %v3023_v52, %v9124_v21  ;;  %7171 = vmatprep.subr.bf16.mxu0 %v7170_v12  ;;  %7339 = vmatprep.subr.bf16.mxu1 %v7338_v6 }
 0x430   : > { %7173 = vmatpush3.bf16.msra.mxu0 %v7170_v12 }
 0x431   : > { %v7342_v10 = vpack.c.bf16 %v3392_v34, %v3391_v13  ;;  %7341 = vmatpush3.bf16.msra.mxu1 %v7338_v6  ;;  %v6430_v63 = vpop.f32.mrb[28].mxu0  ;;  %v6579_v5 = vpop.f32.mrb[82].mxu1 }
 0x432   : > { %v3308_v11 = vmul.f32 %v6430_v63, %v9100_v30  ;;  %v3394_v32 = vmul.f32 %v6579_v5, %v9133_v51  ;;  %v1878_v62 = vpop.f32.mrb[29].mxu0  ;;  %v3033_v31 = vpop.f32.mrb[83].mxu1 }
 0x433   : > { %v3307_v60 = vmul.f32 %v1878_v62, %v9102_v33  ;;  %v3393_v19 = vmul.f32 %v3033_v31, %v9135_v38  ;;  %7343 = vmatprep.subr.bf16.mxu1 %v7342_v10  ;;  %v4020_v62 = vrot.slane %v4019_v8, 1 }
 0x435   : > { %v7174_v58 = vpack.c.bf16 %v3308_v11, %v3307_v60  ;;  %v7346_v35 = vpack.c.bf16 %v3394_v32, %v3393_v19  ;;  %7345 = vmatpush3.bf16.msra.mxu1 %v7342_v10  ;;  %v6582_v40 = vpop.f32.mrb[84].mxu1  ;;  %v7390_v19 = vpack.c.bf16 %v9073_v25, %v9075_v55 }
 0x436   : > { %v3396_v12 = vmul.f32 %v6582_v40, %v9147_v37  ;;  %v3043_v6 = vpop.f32.mrb[85].mxu1 }
 0x437   : > { %v3395_v34 = vmul.f32 %v3043_v6, %v9149_v4  ;;  %7175 = vmatprep.subr.bf16.mxu0 %v7174_v58  ;;  %7347 = vmatprep.subr.bf16.mxu1 %v7346_v35  ;;  %v7394_v6 = vpack.c.bf16 %v9087_v45, %v9089_v41 }
 0x438   : > { %7177 = vmatpush3.bf16.msra.mxu0 %v7174_v58  ;;  %v9275_v58 = vadd.f32 %v4020_v62, %v4019_v8 }
 0x439   : > { %v7350_v52 = vpack.c.bf16 %v3396_v12, %v3395_v34  ;;  %7349 = vmatpush3.bf16.msra.mxu1 %v7346_v35  ;;  %v6433_v13 = vpop.f32.mrb[30].mxu0  ;;  %v6585_v63 = vpop.f32.mrb[86].mxu1 }
 0x43a   : > { %v3310_v5 = vmul.f32 %v6433_v13, %v9112_v18  ;;  %v3398_v11 = vmul.f32 %v6585_v63, %v9163_v54  ;;  %v1888_v32 = vpop.f32.mrb[31].mxu0  ;;  %v3053_v10 = vpop.f32.mrb[87].mxu1  ;;  %v4071_v34 = vmul.f32 %v9275_v58, %v9039_v17  ;;  %v7398_v13 = vpack.c.bf16 %v9100_v30, %v9102_v33 }
 0x43b   : > { %v3309_v31 = vmul.f32 %v1888_v32, %v9114_v3  ;;  %v3397_v14 = vmul.f32 %v3053_v10, %v9165_v47  ;;  %7351 = vmatprep.subr.bf16.mxu1 %v7350_v52  ;;  %v4022_v63 = vadd.f32 %v8892_v56, %v8888_v48  ;;  %v7406_v48 = vpack.c.bf16 %v9122_v24, %v9124_v21 }
 0x43d   : > { %v7178_v43 = vpack.c.bf16 %v3310_v5, %v3309_v31  ;;  %v7354_v60 = vpack.c.bf16 %v3398_v11, %v3397_v14  ;;  %7353 = vmatpush3.bf16.msra.mxu1 %v7350_v52  ;;  %v4023_v32 = vrot.slane %v4022_v63, 4  ;;  %v4030_v31 = vrot.slane %v8813_v42, 4 }
 0x43e   : > { %v4036_v14 = vadd.f32 %v8908_v16, %v8901_v1  ;;  %v4044_v16 = vrot.slane %v8832_v9, 4 }
 0x43f   : > { %7179 = vmatprep.subr.bf16.mxu0 %v7178_v43  ;;  %7355 = vmatprep.subr.bf16.mxu1 %v7354_v60  ;;  %v4024_v56 = vadd.f32 %v4023_v32, %v4022_v63  ;;  %v7414_v63 = vpack.c.bf16 %v9147_v37, %v9149_v4 }
 0x440   : > { %7181 = vmatpush3.bf16.msra.mxu0 %v7178_v43  ;;  %v1030_v43 = vmul.f32 1.442695, %v8782_v59 }
 0x441   : > { %7357 = vmatpush3.bf16.msra.mxu1 %v7354_v60  ;;  %v6436_v35 = vpop.f32.mrb[32].mxu0 }
 0x442   : > { %v3312_v40 = vmul.f32 %v6436_v35, %v9122_v24  ;;  %v1898_v12 = vpop.f32.mrb[33].mxu0  ;;  %7391 = vmatprep.subr.bf16.mxu1 %v7390_v19  ;;  %7713 = vpow2.f32 %v1030_v43  ;;  %v1044_v43 = vmul.f32 1.442695, %v8830_v7 }
 0x443   : > { %v3311_v52 = vmul.f32 %v1898_v12, %v9124_v21  ;;  %v7410_v12 = vpack.c.bf16 %v9133_v51, %v9135_v38 }
 0x444   : > { %6857 = vmatmul.mubr.f32.vlgmr.msra.gmra.mrb[94].mxu1 %v8859_v53  ;;  %v7402_v53 = vpack.c.bf16 %v9112_v18, %v9114_v3 }
 0x445   : > { %v7182_v8 = vpack.c.bf16 %v3312_v40, %v3311_v52  ;;  %7393 = vmatpush3.bf16.msra.mxu1 %v7390_v19  ;;  %6926 = vmatprep.mubr.f32.mxu1 %v4071_v34  ;;  %v4031_v19 = vadd.f32 %v4030_v31, %v8813_v42  ;;  %v4025_v34 = vrot.slane %v4024_v56, 2  ;;  %v4037_v52 = vrot.slane %v4036_v14, 4 }
 0x446   : > { %7395 = vmatprep.subr.bf16.mxu1 %v7394_v6  ;;  %v4050_v42 = vadd.f32 %v8952_v46, %v8946_v26  ;;  %v7418_v46 = vpack.c.bf16 %v9163_v54, %v9165_v47 }
 0x447   : > { %7183 = vmatprep.subr.bf16.mxu0 %v7182_v8 }
 0x448   : > { %7185 = vmatpush3.bf16.msra.mxu0 %v7182_v8 }
 0x449   : > { %7397 = vmatpush3.bf16.msra.mxu1 %v7394_v6  ;;  %v6439_v5 = vpop.f32.mrb[34].mxu0  ;;  %v1036_v6 = vmul.f32 1.442695, %v8808_v27 }
 0x44a   : > { %v3314_v17 = vmul.f32 %v6439_v5, %v9133_v51  ;;  %v1908_v11 = vpop.f32.mrb[35].mxu0  ;;  %7399 = vmatprep.subr.bf16.mxu1 %v7398_v13  ;;  %v4026_v5 = vadd.f32 %v4025_v34, %v4024_v56 }
 0x44b   : > { %v3313_v10 = vmul.f32 %v1908_v11, %v9135_v38  ;;  %7715 = vpow2.f32 %v1036_v6  ;;  %v1038_v11 = vmul.f32 1.442695, %v8805_v23 }
 0x44c   : > { %v4027_v56 = vrot.slane %v4026_v5, 1 }
 0x44d   : > { %v7186_v62 = vpack.c.bf16 %v3314_v17, %v3313_v10  ;;  %7401 = vmatpush3.bf16.msra.mxu1 %v7398_v13  ;;  %v4032_v13 = vrot.slane %v4031_v19, 2  ;;  %v4038_v17 = vadd.f32 %v4037_v52, %v4036_v14  ;;  %7717 = vpow2.f32 %v1038_v11  ;;  %v7714_v52 = vpop.eup %7713 }
 0x44e   : > { %7403 = vmatprep.subr.bf16.mxu1 %v7402_v53  ;;  %v1046_v11 = vmul.f32 1.442695, %v8827_v2  ;;  %7719 = vpow2.f32 %v1044_v43 }
 0x44f   : > { %7187 = vmatprep.subr.bf16.mxu0 %v7186_v62  ;;  %v4033_v10 = vadd.f32 %v4032_v13, %v4031_v19 }
 0x450   : > { %7189 = vmatpush3.bf16.msra.mxu0 %v7186_v62  ;;  %v4051_v62 = vrot.slane %v4050_v42, 4  ;;  %7721 = vpow2.f32 %v1046_v11  ;;  %v1018_v11 = vadd.f32 1.0, %v8830_v7  ;;  %v1022_v7 = vadd.f32 1.0, %v8847_v22 }
 0x451   : > { %7405 = vmatpush3.bf16.msra.mxu1 %v7402_v53  ;;  %v6442_v60 = vpop.f32.mrb[36].mxu0  ;;  %v4045_v53 = vadd.f32 %v4044_v16, %v8832_v9  ;;  %v4064_v16 = vadd.f32 %v8968_v36, %v8959_v57 }
 0x452   : > { %v3316_v35 = vmul.f32 %v6442_v60, %v9147_v37  ;;  %v1918_v40 = vpop.f32.mrb[37].mxu0  ;;  %7407 = vmatprep.subr.bf16.mxu1 %v7406_v48 }
 0x453   : > { %v3315_v1 = vmul.f32 %v1918_v40, %v9149_v4  ;;  %v4046_v9 = vrot.slane %v4045_v53, 2  ;;  %v4052_v40 = vadd.f32 %v4051_v62, %v4050_v42 }
 0x455   : > { %v7190_v8 = vpack.c.bf16 %v3316_v35, %v3315_v1  ;;  %7409 = vmatpush3.bf16.msra.mxu1 %v7406_v48  ;;  %v4039_v48 = vrot.slane %v4038_v17, 2  ;;  %v1011_v35 = vadd.f32 1.0, %v8782_v59  ;;  %v7716_v42 = vpop.eup %7715  ;;  %v4053_v57 = vrot.slane %v4052_v40, 2 }
 0x456   : > { %7411 = vmatprep.subr.bf16.mxu1 %v7410_v12 }
 0x457   : > { %7191 = vmatprep.subr.bf16.mxu0 %v7190_v8  ;;  %v4040_v1 = vadd.f32 %v4039_v48, %v4038_v17  ;;  %v7718_v43 = vpop.eup %7717 }
 0x458   : > { %7193 = vmatpush3.bf16.msra.mxu0 %v7190_v8  ;;  %v4028_v8 = vadd.f32 %v4027_v56, %v4026_v5 }
 0x459   : > { %7413 = vmatpush3.bf16.msra.mxu1 %v7410_v12  ;;  %v6445_v32 = vpop.f32.mrb[38].mxu0  ;;  %v4034_v12 = vrot.slane %v4033_v10, 1 }
 0x45a   : > { %v3318_v31 = vmul.f32 %v6445_v32, %v9163_v54  ;;  %v1928_v26 = vpop.f32.mrb[39].mxu0  ;;  %7415 = vmatprep.subr.bf16.mxu1 %v7414_v63  ;;  %v4047_v32 = vadd.f32 %v4046_v9, %v4045_v53  ;;  %v4073_v48 = vmul.f32 %v4028_v8, %v9193_v44  ;;  %v4054_v9 = vadd.f32 %v4053_v57, %v4052_v40 }
 0x45b   : > { %v3317_v14 = vmul.f32 %v1928_v26, %v9165_v47  ;;  %v4035_v36 = vadd.f32 %v4034_v12, %v4033_v10  ;;  %v4065_v26 = vrot.slane %v4064_v16, 4  ;;  %v1054_v12 = vmul.f32 1.442695, %v8839_v15 }
 0x45d   : > { %v7194_v60 = vpack.c.bf16 %v3318_v31, %v3317_v14  ;;  %7417 = vmatpush3.bf16.msra.mxu1 %v7414_v63  ;;  %v6480_v19 = vpop.f32.mrb[40].mxu0  ;;  %v1014_v63 = vadd.f32 1.0, %v8808_v27  ;;  %v1059_v31 = vsel %vm995_vm10, %v1011_v35, %v7714_v52  ;;  %v4075_v44 = vmul.f32 %v4035_v36, %v9187_v29 }
 0x45e   : > { %v3336_v6 = vmul.f32 %v6480_v19, %v9073_v25  ;;  %v2308_v34 = vpop.f32.mrb[41].mxu0  ;;  %7419 = vmatprep.subr.bf16.mxu1 %v7418_v46  ;;  %v4072_v25 = vmul.f32 %v9275_v58, %v9182_v50  ;;  %v4041_v50 = vrot.slane %v4040_v1, 1  ;;  %v1015_v58 = vadd.f32 1.0, %v8805_v23 }
 0x45f   : > { %v3335_v13 = vmul.f32 %v2308_v34, %v9075_v55  ;;  %7195 = vmatprep.subr.bf16.mxu0 %v7194_v60  ;;  %v1062_v27 = vsel %vm998_vm11, %v1014_v63, %v7716_v42  ;;  %v4074_v14 = vmul.f32 %v4028_v8, %v1059_v31  ;;  %v7720_v34 = vpop.eup %7719  ;;  %v4076_v40 = vmul.f32 %v4035_v36, %v9217_v39 }
 0x460   : > { %7197 = vmatpush3.bf16.msra.mxu0 %v7194_v60  ;;  %v4066_v60 = vadd.f32 %v4065_v26, %v4064_v16  ;;  %v4042_v19 = vadd.f32 %v4041_v50, %v4040_v1  ;;  %v9343_v1 = vsel %vm999_vm12, %v1015_v58, %v7718_v43  ;;  %v4055_v63 = vrot.slane %v4054_v9, 1 }
 0x461   : > { %v7230_v62 = vpack.c.bf16 %v3336_v6, %v3335_v13  ;;  %7421 = vmatpush3.bf16.msra.mxu1 %v7418_v46  ;;  %v6483_v17 = vpop.f32.mrb[42].mxu0  ;;  %v1019_v39 = vadd.f32 1.0, %v8827_v2 }
 0x462   : > { %v3338_v55 = vmul.f32 %v6483_v17, %v9087_v45  ;;  %v2318_v5 = vpop.f32.mrb[43].mxu0  ;;  %v1052_v45 = vmul.f32 1.442695, %v8847_v22  ;;  %v4077_v16 = vmul.f32 %v4042_v19, %v1062_v27  ;;  %v4056_v36 = vadd.f32 %v4055_v63, %v4054_v9  ;;  %v9383_v9 = vld [vmem:[#allocation7 + $0x8] sm:$0xff]  ;;  %v9401_v63 = vld [vmem:[#allocation7 + $0x20] sm:$0xff] }
 0x463   : > { %v3337_v53 = vmul.f32 %v2318_v5, %v9089_v41  ;;  %6682 = vmatmul.mubr.f32.vlgmr.msra.gmra.mrb[88].mxu0 %v1059_v31  ;;  %7231 = vmatprep.subr.bf16.mxu0 %v7230_v62  ;;  %v4048_v41 = vrot.slane %v4047_v32, 1 }
 0x464   : > { %6927 = vmatmul.mubr.f32.vlgmr.msra.gmra.mrb[96].mxu1 %v4072_v25  ;;  %7233 = vmatpush3.bf16.msra.mxu0 %v7230_v62  ;;  %7723 = vpow2.f32 %v1052_v45  ;;  %v4078_v25 = vmul.f32 %v4042_v19, %v9343_v1  ;;  %v1023_v45 = vadd.f32 1.0, %v8839_v15 }
 0x465   : > { %v7234_v59 = vpack.c.bf16 %v3338_v55, %v3337_v53  ;;  %6751 = vmatprep.mubr.f32.mxu0 %v1062_v27  ;;  %6929 = vmatprep.mubr.f32.mxu1 %v4073_v48  ;;  %v6486_v10 = vpop.f32.mrb[44].mxu0  ;;  %v4049_v52 = vadd.f32 %v4048_v41, %v4047_v32  ;;  %7725 = vpow2.f32 %v1054_v12  ;;  %v9356_v55 = vsel %vm1002_vm13, %v1018_v11, %v7720_v34 }
 0x466   : > { %v3340_v46 = vmul.f32 %v6486_v10, %v9100_v30  ;;  %v2328_v56 = vpop.f32.mrb[45].mxu0  ;;  %v4081_v2 = vmul.f32 %v4056_v36, %v9356_v55 }
 0x467   : > { %v3339_v35 = vmul.f32 %v2328_v56, %v9102_v33  ;;  %7235 = vmatprep.subr.bf16.mxu0 %v7234_v59  ;;  %v4067_v33 = vrot.slane %v4066_v60, 2  ;;  %v4079_v17 = vmul.f32 %v4049_v52, %v9220_v0  ;;  %v4080_v0 = vmul.f32 %v4049_v52, %v9247_v28  ;;  %v9393_v52 = vld [vmem:[#allocation7 + $0x10] sm:$0xff] }
 0x468   : > { %6930 = vmatmul.mubr.f32.gmra.mrb[98].mxu1 %v4074_v14  ;;  %7237 = vmatpush3.bf16.msra.mxu0 %v7234_v59  ;;  %v4083_v59 = vmul.f32 %v8857_v49, %v9250_v61 }
 0x469   : > { %v7238_v6 = vpack.c.bf16 %v3340_v46, %v3339_v35  ;;  %6932 = vmatprep.mubr.f32.mxu1 %v4075_v44  ;;  %v6489_v29 = vpop.f32.mrb[46].mxu0  ;;  %v4068_v62 = vadd.f32 %v4067_v33, %v4066_v60  ;;  %v9387_v35 = vld [vmem:[#allocation7] sm:$0xff]  ;;  %v9398_v33 = vld [vmem:[#allocation7 + $0x28] sm:$0xff] }
 0x46a   : > { %v3342_v30 = vmul.f32 %v6489_v29, %v9112_v18  ;;  %v2338_v8 = vpop.f32.mrb[47].mxu0 }
 0x46b   : > { %v3341_v13 = vmul.f32 %v2338_v8, %v9114_v3  ;;  %7239 = vmatprep.subr.bf16.mxu0 %v7238_v6  ;;  %v7722_v3 = vpop.eup %7721  ;;  %v4069_v50 = vrot.slane %v4068_v62, 1 }
 0x46c   : > { %6933 = vmatmul.mubr.f32.gmra.mrb[100].mxu1 %v4076_v40  ;;  %7241 = vmatpush3.bf16.msra.mxu0 %v7238_v6  ;;  %v9362_v53 = vsel %vm1003_vm14, %v1019_v39, %v7722_v3  ;;  %v9390_v6 = vld [vmem:[#allocation7 + $0x18] sm:$0xff] }
 0x46d   : > { %v7242_v18 = vpack.c.bf16 %v3342_v30, %v3341_v13  ;;  %6935 = vmatprep.mubr.f32.mxu1 %v4077_v16  ;;  %v6492_v42 = vpop.f32.mrb[48].mxu0  ;;  %v4070_v44 = vadd.f32 %v4069_v50, %v4068_v62 }
 0x46e   : > { %v3344_v23 = vmul.f32 %v6492_v42, %v9122_v24  ;;  %v2348_v32 = vpop.f32.mrb[49].mxu0  ;;  %v7724_v48 = vpop.eup %7723 }
 0x46f   : > { %v3343_v57 = vmul.f32 %v2348_v32, %v9124_v21  ;;  %7243 = vmatprep.subr.bf16.mxu0 %v7242_v18  ;;  %v7726_v41 = vpop.eup %7725  ;;  %v9407_v32 = vld [vmem:[#allocation7 + $0x30] sm:$0xff] }
 0x470   : > { %6936 = vmatmul.mubr.f32.gmra.mrb[102].mxu1 %v4078_v25  ;;  %7245 = vmatpush3.bf16.msra.mxu0 %v7242_v18  ;;  %v9380_v61 = vsel %vm1007_vm0, %v1023_v45, %v7726_v41 }
 0x471   : > { %v7246_v24 = vpack.c.bf16 %v3344_v23, %v3343_v57  ;;  %6938 = vmatprep.mubr.f32.mxu1 %v4079_v17  ;;  %v6495_v5 = vpop.f32.mrb[50].mxu0  ;;  %v9410_v17 = vld [vmem:[#allocation7 + $0x48] sm:$0xff] }
 0x472   : > { %v3346_v31 = vmul.f32 %v6495_v5, %v9133_v51  ;;  %v2358_v26 = vpop.f32.mrb[51].mxu0 }
 0x473   : > { %v3345_v21 = vmul.f32 %v2358_v26, %v9135_v38  ;;  %7247 = vmatprep.subr.bf16.mxu0 %v7246_v24  ;;  %v4082_v38 = vmul.f32 %v4056_v36, %v9362_v53  ;;  %v9416_v26 = vld [vmem:[#allocation7 + $0x58] sm:$0xff] }
 0x474   : > { %6939 = vmatmul.mubr.f32.gmra.mrb[104].mxu1 %v4080_v0  ;;  %7249 = vmatpush3.bf16.msra.mxu0 %v7246_v24 }
 0x475   : > { %v7250_v27 = vpack.c.bf16 %v3346_v31, %v3345_v21  ;;  %6941 = vmatprep.mubr.f32.mxu1 %v4081_v2  ;;  %v6498_v51 = vpop.f32.mrb[52].mxu0  ;;  %v9419_v21 = vld [vmem:[#allocation7 + $0x50] sm:$0xff] }
 0x476   : > { %v3348_v28 = vmul.f32 %v6498_v51, %v9147_v37  ;;  %v2368_v58 = vpop.f32.mrb[53].mxu0  ;;  %v9375_v37 = vsel %vm1006_vm15, %v1022_v7, %v7724_v48 }
 0x477   : > { %v3347_v10 = vmul.f32 %v2368_v58, %v9149_v4  ;;  %7251 = vmatprep.subr.bf16.mxu0 %v7250_v27  ;;  %v4085_v4 = vmul.f32 %v4070_v44, %v9375_v37  ;;  %v7836_v58 = vld [vmem:[#allocation7 + $0x60] sm:$0xff] }
 0x478   : > { %6942 = vmatmul.mubr.f32.gmra.mrb[106].mxu1 %v4082_v38  ;;  %7253 = vmatpush3.bf16.msra.mxu0 %v7250_v27  ;;  %v7835_v27 = vld [vmem:[#allocation7 + $0x68] sm:$0xff] }
 0x479   : > { %v7254_v46 = vpack.c.bf16 %v3348_v28, %v3347_v10  ;;  %6944 = vmatprep.mubr.f32.mxu1 %v4083_v59  ;;  %v6501_v56 = vpop.f32.mrb[54].mxu0  ;;  %v7837_v10 = vld [vmem:[#allocation7 + $0x78] sm:$0xff] }
 0x47a   : > { %v3350_v14 = vmul.f32 %v6501_v56, %v9163_v54  ;;  %v2378_v43 = vpop.f32.mrb[55].mxu0  ;;  %v4086_v54 = vmul.f32 %v4070_v44, %v9380_v61 }
 0x47b   : > { %v3349_v49 = vmul.f32 %v2378_v43, %v9165_v47  ;;  %7255 = vmatprep.subr.bf16.mxu0 %v7254_v46 }
 0x47c   : > { %6945 = vmatmul.mubr.f32.gmra.mrb[108].mxu1 %v8864_v20  ;;  %7257 = vmatpush3.bf16.msra.mxu0 %v7254_v46  ;;  %v9422_v46 = vld [vmem:[#allocation7 + $0x70] sm:$0xff] }
 0x47d   : > { %v7258_v15 = vpack.c.bf16 %v3350_v14, %v3349_v49  ;;  %6947 = vmatprep.mubr.f32.mxu1 %v4085_v4  ;;  %v6536_v22 = vpop.f32.mrb[56].mxu0 }
 0x47e   : > { %v3368_v60 = vmul.f32 %v9383_v9, %v6536_v22  ;;  %v2758_v19 = vpop.f32.mrb[57].mxu0 }
 0x47f   : > { %v3367_v47 = vmul.f32 %v9387_v35, %v2758_v19  ;;  %7259 = vmatprep.subr.bf16.mxu0 %v7258_v15 }
 0x480   : > { %6948 = vmatmul.mubr.f32.gmra.mrb[110].mxu1 %v4086_v54  ;;  %7261 = vmatpush3.bf16.msra.mxu0 %v7258_v15 }
 0x481   : > { %v7294_v12 = vpack.c.bf16 %v3368_v60, %v3367_v47  ;;  %v6539_v20 = vpop.f32.mrb[58].mxu0 }
 0x482   : > { %v3370_v29 = vmul.f32 %v9390_v6, %v6539_v20  ;;  %v2768_v34 = vpop.f32.mrb[59].mxu0 }
 0x483   : > { %v3369_v30 = vmul.f32 %v9393_v52, %v2768_v34  ;;  %6752 = vmatmul.mubr.f32.vlgmr.msra.gmra.mrb[90].mxu0 %v9343_v1  ;;  %7295 = vmatprep.subr.bf16.mxu0 %v7294_v12  ;;  %v9404_v1 = vld [vmem:[#allocation7 + $0x38] sm:$0xff] }
 0x484   : > { %7297 = vmatpush3.bf16.msra.mxu0 %v7294_v12  ;;  %6821 = vmatprep.mubr.f32.mxu0 %v9356_v55  ;;  %v9413_v55 = vld [vmem:[#allocation7 + $0x40] sm:$0xff] }
 0x485   : > { %v7298_v8 = vpack.c.bf16 %v3370_v29, %v3369_v30  ;;  %v6542_v40 = vpop.f32.mrb[60].mxu0 }
 0x486   : > { %v3372_v16 = vmul.f32 %v9398_v33, %v6542_v40  ;;  %v2778_v13 = vpop.f32.mrb[61].mxu0 }
 0x487   : > { %v3371_v11 = vmul.f32 %v9401_v63, %v2778_v13  ;;  %7299 = vmatprep.subr.bf16.mxu0 %v7298_v8 }
 0x488   : > { %7301 = vmatpush3.bf16.msra.mxu0 %v7298_v8 }
 0x489   : > { %v7302_v18 = vpack.c.bf16 %v3372_v16, %v3371_v11  ;;  %v6545_v42 = vpop.f32.mrb[62].mxu0 }
 0x48a   : > { %v3374_v39 = vmul.f32 %v9404_v1, %v6545_v42  ;;  %v2788_v23 = vpop.f32.mrb[63].mxu0 }
 0x48b   : > { %v3373_v25 = vmul.f32 %v9407_v32, %v2788_v23  ;;  %7303 = vmatprep.subr.bf16.mxu0 %v7302_v18 }
 0x48c   : > { %7305 = vmatpush3.bf16.msra.mxu0 %v7302_v18 }
 0x48d   : > { %v7306_v3 = vpack.c.bf16 %v3374_v39, %v3373_v25  ;;  %v6548_v62 = vpop.f32.mrb[64].mxu0 }
 0x48e   : > { %v3376_v57 = vmul.f32 %v9410_v17, %v6548_v62  ;;  %v2798_v36 = vpop.f32.mrb[65].mxu0 }
 0x48f   : > { %v3375_v24 = vmul.f32 %v9413_v55, %v2798_v36  ;;  %7307 = vmatprep.subr.bf16.mxu0 %v7306_v3 }
 0x490   : > { %7309 = vmatpush3.bf16.msra.mxu0 %v7306_v3 }
 0x491   : > { %v7310_v5 = vpack.c.bf16 %v3376_v57, %v3375_v24  ;;  %v6551_v31 = vpop.f32.mrb[66].mxu0  ;;  %v4264_v24 = vld [vmem:[#allocation13] sm:$0xff] }
 0x492   : > { %v3378_v0 = vmul.f32 %v9416_v26, %v6551_v31  ;;  %v2808_v48 = vpop.f32.mrb[67].mxu0 }
 0x493   : > { %v3377_v2 = vmul.f32 %v9419_v21, %v2808_v48  ;;  %7311 = vmatprep.subr.bf16.mxu0 %v7310_v5  ;;  %v4266_v48 = vld [vmem:[#allocation13 + $0x10] sm:$0xff] }
 0x494   : > { %7313 = vmatpush3.bf16.msra.mxu0 %v7310_v5  ;;  %v4265_v5 = vld [vmem:[#allocation13 + $0x8] sm:$0xff] }
 0x495   : > { %v7314_v50 = vpack.c.bf16 %v3378_v0, %v3377_v2  ;;  %v6554_v7 = vpop.f32.mrb[68].mxu0  ;;  %v7422_v0 = vpack.c.bf16 %v4265_v5, %v4264_v24 }
 0x496   : > { %v3380_v51 = vmul.f32 %v7835_v27, %v6554_v7  ;;  %v2818_v28 = vpop.f32.mrb[69].mxu0  ;;  %v4269_v7 = vld [vmem:[#allocation13 + $0x28] sm:$0xff] }
 0x497   : > { %v3379_v38 = vmul.f32 %v7836_v58, %v2818_v28  ;;  %7315 = vmatprep.subr.bf16.mxu0 %v7314_v50  ;;  %v4271_v28 = vld [vmem:[#allocation13 + $0x38] sm:$0xff] }
 0x498   : > { %7317 = vmatpush3.bf16.msra.mxu0 %v7314_v50  ;;  %v4268_v50 = vld [vmem:[#allocation13 + $0x20] sm:$0xff] }
 0x499   : > { %v7318_v45 = vpack.c.bf16 %v3380_v51, %v3379_v38  ;;  %v6557_v59 = vpop.f32.mrb[70].mxu0  ;;  %v4270_v51 = vld [vmem:[#allocation13 + $0x30] sm:$0xff]  ;;  %v4272_v38 = vld [vmem:[#allocation13 + $0x40] sm:$0xff] }
 0x49a   : > { %v3382_v44 = vmul.f32 %v7837_v10, %v6557_v59  ;;  %v2828_v41 = vpop.f32.mrb[71].mxu0 }
 0x49b   : > { %v3381_v56 = vmul.f32 %v9422_v46, %v2828_v41  ;;  %7319 = vmatprep.subr.bf16.mxu0 %v7318_v45 }
 0x49c   : > { %7321 = vmatpush3.bf16.msra.mxu0 %v7318_v45  ;;  %v4273_v45 = vld [vmem:[#allocation13 + $0x48] sm:$0xff] }
 0x49d   : > { %v7322_v14 = vpack.c.bf16 %v3382_v44, %v3381_v56  ;;  %v6592_v43 = vpop.f32.mrb[72].mxu0  ;;  %v7438_v59 = vpack.c.bf16 %v4273_v45, %v4272_v38  ;;  %v4275_v44 = vld [vmem:[#allocation13 + $0x58] sm:$0xff] }
 0x49e   : > { %v3400_v49 = vmul.f32 %v9383_v9, %v6592_v43  ;;  %v3208_v4 = vpop.f32.mrb[73].mxu0  ;;  %v4279_v43 = vld [vmem:[#allocation13 + $0x78] sm:$0xff] }
 0x49f   : > { %v3399_v15 = vmul.f32 %v9387_v35, %v3208_v4  ;;  %7323 = vmatprep.subr.bf16.mxu0 %v7322_v14 }
 0x4a0   : > { %7325 = vmatpush3.bf16.msra.mxu0 %v7322_v14  ;;  %v4278_v14 = vld [vmem:[#allocation13 + $0x70] sm:$0xff] }
 0x4a1   : > { %v7358_v22 = vpack.c.bf16 %v3400_v49, %v3399_v15  ;;  %v6595_v60 = vpop.f32.mrb[74].mxu0  ;;  %v7450_v15 = vpack.c.bf16 %v4279_v43, %v4278_v14 }
 0x4a2   : > { %v3402_v19 = vmul.f32 %v9390_v6, %v6595_v60  ;;  %v3218_v54 = vpop.f32.mrb[75].mxu0 }
 0x4a3   : > { %v3401_v47 = vmul.f32 %v9393_v52, %v3218_v54  ;;  %6822 = vmatmul.mubr.f32.vlgmr.msra.gmra.mrb[92].mxu0 %v9362_v53  ;;  %7359 = vmatprep.subr.bf16.mxu0 %v7358_v22 }
 0x4a4   : > { %7361 = vmatpush3.bf16.msra.mxu0 %v7358_v22  ;;  %6891 = vmatprep.mubr.f32.mxu0 %v9375_v37 }
 0x4a5   : > { %v7362_v12 = vpack.c.bf16 %v3402_v19, %v3401_v47  ;;  %v6598_v9 = vpop.f32.mrb[76].mxu0 }
 0x4a6   : > { %v3404_v20 = vmul.f32 %v9398_v33, %v6598_v9  ;;  %v3228_v35 = vpop.f32.mrb[77].mxu0 }
 0x4a7   : > { %v3403_v29 = vmul.f32 %v9401_v63, %v3228_v35  ;;  %7363 = vmatprep.subr.bf16.mxu0 %v7362_v12 }
 0x4a8   : > { %7365 = vmatpush3.bf16.msra.mxu0 %v7362_v12 }
 0x4a9   : > { %v7366_v34 = vpack.c.bf16 %v3404_v20, %v3403_v29  ;;  %v6601_v6 = vpop.f32.mrb[78].mxu0 }
 0x4aa   : > { %v3406_v30 = vmul.f32 %v9404_v1, %v6601_v6  ;;  %v3238_v52 = vpop.f32.mrb[79].mxu0 }
 0x4ab   : > { %v3405_v53 = vmul.f32 %v9407_v32, %v3238_v52  ;;  %7367 = vmatprep.subr.bf16.mxu0 %v7366_v34 }
 0x4ac   : > { %7369 = vmatpush3.bf16.msra.mxu0 %v7366_v34 }
 0x4ad   : > { %v7370_v8 = vpack.c.bf16 %v3406_v30, %v3405_v53  ;;  %v6604_v37 = vpop.f32.mrb[80].mxu0 }
 0x4ae   : > { %v3408_v40 = vmul.f32 %v9410_v17, %v6604_v37  ;;  %v3248_v16 = vpop.f32.mrb[81].mxu0 }
 0x4af   : > { %v3407_v33 = vmul.f32 %v9413_v55, %v3248_v16  ;;  %7371 = vmatprep.subr.bf16.mxu0 %v7370_v8 }
 0x4b0   : > { %7373 = vmatpush3.bf16.msra.mxu0 %v7370_v8 }
 0x4b1   : > { %v7374_v13 = vpack.c.bf16 %v3408_v40, %v3407_v33  ;;  %v6607_v63 = vpop.f32.mrb[82].mxu0 }
 0x4b2   : > { %v3410_v11 = vmul.f32 %v9416_v26, %v6607_v63  ;;  %v3258_v18 = vpop.f32.mrb[83].mxu0 }
 0x4b3   : > { %v3409_v42 = vmul.f32 %v9419_v21, %v3258_v18  ;;  %7375 = vmatprep.subr.bf16.mxu0 %v7374_v13  ;;  %v4267_v21 = vld [vmem:[#allocation13 + $0x18] sm:$0xff] }
 0x4b4   : > { %7377 = vmatpush3.bf16.msra.mxu0 %v7374_v13  ;;  %v7426_v2 = vpack.c.bf16 %v4267_v21, %v4266_v48 }
 0x4b5   : > { %v7378_v1 = vpack.c.bf16 %v3410_v11, %v3409_v42  ;;  %v6610_v39 = vpop.f32.mrb[84].mxu0 }
 0x4b6   : > { %v3412_v23 = vmul.f32 %v7835_v27, %v6610_v39  ;;  %v3268_v32 = vpop.f32.mrb[85].mxu0  ;;  %v9439_v25 = vpop.f32.mrb[88].mxu1  ;;  %v7430_v27 = vpack.c.bf16 %v4269_v7, %v4268_v50 }
 0x4b7   : > { %v3411_v3 = vmul.f32 %v7836_v58, %v3268_v32  ;;  %v9441_v62 = vpop.f32.mrb[89].mxu1  ;;  %7379 = vmatprep.subr.bf16.mxu0 %v7378_v1  ;;  %v7434_v58 = vpack.c.bf16 %v4271_v28, %v4270_v51 }
 0x4b8   : > { %7381 = vmatpush3.bf16.msra.mxu0 %v7378_v1 }
 0x4b9   : > { %v7382_v17 = vpack.c.bf16 %v3412_v23, %v3411_v3  ;;  %v6613_v57 = vpop.f32.mrb[86].mxu0 }
 0x4ba   : > { %v3414_v36 = vmul.f32 %v7837_v10, %v6613_v57  ;;  %v3278_v55 = vpop.f32.mrb[87].mxu0  ;;  %v4274_v10 = vld [vmem:[#allocation13 + $0x50] sm:$0xff] }
 0x4bb   : > { %v3413_v31 = vmul.f32 %v9422_v46, %v3278_v55  ;;  %7383 = vmatprep.subr.bf16.mxu0 %v7382_v17  ;;  %v7442_v41 = vpack.c.bf16 %v4275_v44, %v4274_v10  ;;  %v4276_v46 = vld [vmem:[#allocation13 + $0x60] sm:$0xff] }
 0x4bc   : > { %7385 = vmatpush3.bf16.msra.mxu0 %v7382_v17 }
 0x4bd   : > { %v7386_v26 = vpack.c.bf16 %v3414_v36, %v3413_v31 }
 0x4bf   : > { %7387 = vmatprep.subr.bf16.mxu0 %v7386_v26 }
 0x4c0   : > { %7389 = vmatpush3.bf16.msra.mxu0 %v7386_v26 }
 0x4c1   : > { %7423 = vmatprep.subr.bf16.mxu0 %v7422_v0 }
 0x4c3   : > { %6892 = vmatmul.mubr.f32.vlgmr.msra.gmra.mrb[94].mxu0 %v9380_v61  ;;  %v4277_v61 = vld [vmem:[#allocation13 + $0x68] sm:$0xff] }
 0x4c4   : > { %7425 = vmatpush3.bf16.msra.mxu0 %v7422_v0  ;;  %v7446_v56 = vpack.c.bf16 %v4277_v61, %v4276_v46 }
 0x4c5   : > { %7427 = vmatprep.subr.bf16.mxu0 %v7426_v2 }
 0x4c8   : > { %7429 = vmatpush3.bf16.msra.mxu0 %v7426_v2 }
 0x4c9   : > { %7431 = vmatprep.subr.bf16.mxu0 %v7430_v27 }
 0x4cc   : > { %7433 = vmatpush3.bf16.msra.mxu0 %v7430_v27 }
 0x4cd   : > { %7435 = vmatprep.subr.bf16.mxu0 %v7434_v58 }
 0x4d0   : > { %7437 = vmatpush3.bf16.msra.mxu0 %v7434_v58 }
 0x4d1   : > { %7439 = vmatprep.subr.bf16.mxu0 %v7438_v59 }
 0x4d4   : > { %7441 = vmatpush3.bf16.msra.mxu0 %v7438_v59 }
 0x4d5   : > { %7443 = vmatprep.subr.bf16.mxu0 %v7442_v41 }
 0x4d7   : > { %v6718_v49 = vpop.f32.mrb[90].mxu1 }
 0x4d8   : > { %v3631_v4 = vpop.f32.mrb[91].mxu1  ;;  %7445 = vmatpush3.bf16.msra.mxu0 %v7442_v41 }
 0x4d9   : > { %7447 = vmatprep.subr.bf16.mxu0 %v7446_v56 }
 0x4dc   : > { %7449 = vmatpush3.bf16.msra.mxu0 %v7446_v56 }
 0x4dd   : > { %7451 = vmatprep.subr.bf16.mxu0 %v7450_v15 }
 0x4e0   : > { %7453 = vmatpush3.bf16.msra.mxu0 %v7450_v15 }
 0x4f7   : > { %v9445_v22 = vpop.f32.mrb[92].mxu1 }
 0x4f8   : > { %v9447_v60 = vpop.f32.mrb[93].mxu1 }
 0x517   : > { %v9449_v19 = vpop.f32.mrb[94].mxu1 }
 0x518   : > { %v9451_v54 = vpop.f32.mrb[95].mxu1 }
 0x536   : > { %v6683_v47 = vpop.f32.mrb[88].mxu0 }
 0x537   : > { %v6928_v12 = vpop.f32.mrb[96].mxu1  ;;  %v3556_v9 = vpop.f32.mrb[89].mxu0 }
 0x538   : > { %v4159_v20 = vadd.f32 1e-06, %v6928_v12  ;;  %v4153_v35 = vpop.f32.mrb[97].mxu1 }
 0x539   : > { %v4154_v29 = vadd.f32 1e-06, %v4153_v35 }
 0x53a   : > { %7727 = vrcp.f32 %v4159_v20 }
 0x53b   : > { %7729 = vrcp.f32 %v4154_v29  ;;  %v6931_v34 = vpop.f32.mrb[98].mxu1 }
 0x53c   : > { %v4169_v6 = vadd.f32 1e-06, %v6931_v34  ;;  %v4163_v30 = vpop.f32.mrb[99].mxu1 }
 0x53d   : > { %v4164_v52 = vadd.f32 1e-06, %v4163_v30  ;;  %v9462_v30 = vld [vmem:[%s10162_s15] ss:$0 sm:$0xff]  ;;  %s10168_s15 = sld [smem:[#allocation43_spill]] }
 0x53e   : > { %7731 = vrcp.f32 %v4169_v6 }
 0x53f   : > { %7733 = vrcp.f32 %v4164_v52  ;;  %v6934_v53 = vpop.f32.mrb[100].mxu1 }
 0x540   : > { %v4179_v8 = vadd.f32 1e-06, %v6934_v53  ;;  %v4173_v37 = vpop.f32.mrb[101].mxu1 }
 0x541   : > { %v4174_v40 = vadd.f32 1e-06, %v4173_v37 }
 0x542   : > { %7735 = vrcp.f32 %v4179_v8 }
 0x543   : > { %7737 = vrcp.f32 %v4174_v40  ;;  %v6937_v16 = vpop.f32.mrb[102].mxu1  ;;  %v7839_v40 = vld [vmem:[%s8659_s28 + $0x8] sm:$0xff] }
 0x544   : > { %v7728_v33 = vpop.eup %7727  ;;  %v4183_v13 = vpop.f32.mrb[103].mxu1  ;;  %v4189_v39 = vadd.f32 1e-06, %v6937_v16 }
 0x545   : > { %v7730_v63 = vpop.eup %7729  ;;  %v4249_v11 = vmul.f32 %v7728_v33, %v9439_v25  ;;  %v4184_v17 = vadd.f32 1e-06, %v4183_v13  ;;  %v7840_v33 = vld [vmem:[%s8659_s28] sm:$0xff] }
 0x546   : > { %v4248_v18 = vmul.f32 %v7730_v63, %v9441_v62 }
 0x547   : > { %v6940_v42 = vpop.f32.mrb[104].mxu1 }
 0x548   : > { %v7732_v1 = vpop.eup %7731  ;;  %v4199_v23 = vadd.f32 1e-06, %v6940_v42  ;;  %v4193_v32 = vpop.f32.mrb[105].mxu1  ;;  %6982 = vmatprep.mubr.f32.mxu0 %v4248_v18 }
 0x549   : > { %v7734_v3 = vpop.eup %7733  ;;  %v4194_v57 = vadd.f32 1e-06, %v4193_v32  ;;  %6983 = vmatmul.mubr.f32.vlgmr.msra.gmra.mrb[96].mxu0 %v4249_v11  ;;  %v4251_v36 = vmul.f32 %v7732_v1, %v6683_v47  ;;  %v7841_v1 = vld [vmem:[%s8659_s28 + $0x10] sm:$0xff] }
 0x54a   : > { %7739 = vrcp.f32 %v4199_v23  ;;  %v4250_v55 = vmul.f32 %v7734_v3, %v3556_v9 }
 0x54b   : > { %7741 = vrcp.f32 %v4194_v57  ;;  %v6943_v24 = vpop.f32.mrb[106].mxu1 }
 0x54c   : > { %v7736_v5 = vpop.eup %7735  ;;  %7743 = vrcp.f32 %v4189_v39  ;;  %v4203_v25 = vpop.f32.mrb[107].mxu1  ;;  %6985 = vmatprep.mubr.f32.mxu0 %v4250_v55  ;;  %v4209_v43 = vadd.f32 1e-06, %v6943_v24  ;;  %v7843_v55 = vld [vmem:[%s8659_s28 + $0x20] sm:$0xff] }
 0x54d   : > { %v7738_v62 = vpop.eup %7737  ;;  %7745 = vrcp.f32 %v4184_v17  ;;  %6986 = vmatmul.mubr.f32.gmra.mrb[98].mxu0 %v4251_v36  ;;  %v4253_v31 = vmul.f32 %v7736_v5, %v6718_v49  ;;  %v4204_v49 = vadd.f32 1e-06, %v4203_v25  ;;  %v7842_v17 = vld [vmem:[%s8659_s28 + $0x18] sm:$0xff]  ;;  %v7844_v5 = vld [vmem:[%s8659_s28 + $0x28] sm:$0xff] }
 0x54e   : > { %v4252_v26 = vmul.f32 %v7738_v62, %v3631_v4 }
 0x54f   : > { %v6946_v0 = vpop.f32.mrb[108].mxu1 }
 0x550   : > { %v4219_v48 = vadd.f32 1e-06, %v6946_v0  ;;  %v4213_v21 = vpop.f32.mrb[109].mxu1  ;;  %6988 = vmatprep.mubr.f32.mxu0 %v4252_v26 }
 0x551   : > { %v4214_v2 = vadd.f32 1e-06, %v4213_v21  ;;  %6989 = vmatmul.mubr.f32.gmra.mrb[100].mxu0 %v4253_v31 }
 0x552   : > { %7747 = vrcp.f32 %v4219_v48  ;;  %v7845_v48 = vld [vmem:[%s8659_s28 + $0x38] sm:$0xff] }
 0x553   : > { %7749 = vrcp.f32 %v4214_v2  ;;  %v6949_v50 = vpop.f32.mrb[110].mxu1  ;;  %v7846_v2 = vld [vmem:[%s8659_s28 + $0x30] sm:$0xff] }
 0x554   : > { %v7740_v7 = vpop.eup %7739  ;;  %v4223_v27 = vpop.f32.mrb[111].mxu1  ;;  %7751 = vrcp.f32 %v4209_v43  ;;  %v4229_v9 = vadd.f32 1e-06, %v6949_v50 }
 0x555   : > { %v7742_v51 = vpop.eup %7741  ;;  %v4257_v28 = vmul.f32 %v7740_v7, %v9445_v22  ;;  %7753 = vrcp.f32 %v4204_v49  ;;  %v4224_v20 = vadd.f32 1e-06, %v4223_v27 }
 0x556   : > { %v7744_v58 = vpop.eup %7743  ;;  %v6753_v38 = vpop.f32.mrb[90].mxu0  ;;  %v4256_v45 = vmul.f32 %v7742_v51, %v9447_v60  ;;  %7755 = vrcp.f32 %v4229_v9 }
 0x557   : > { %v7746_v59 = vpop.eup %7745  ;;  %v4255_v10 = vmul.f32 %v7744_v58, %v6753_v38  ;;  %v3706_v44 = vpop.f32.mrb[91].mxu0  ;;  %7757 = vrcp.f32 %v4224_v20  ;;  %v7847_v58 = vld [vmem:[%s8659_s28 + $0x48] sm:$0xff] }
 0x558   : > { %v4254_v41 = vmul.f32 %v7746_v59, %v3706_v44 }
 0x55a   : > { %6991 = vmatprep.mubr.f32.mxu0 %v4254_v41 }
 0x55b   : > { %6992 = vmatmul.mubr.f32.gmra.mrb[102].mxu0 %v4255_v10 }
 0x55c   : > { %v7748_v46 = vpop.eup %7747  ;;  %6994 = vmatprep.mubr.f32.mxu0 %v4256_v45  ;;  %v7848_v45 = vld [vmem:[%s8659_s28 + $0x40] sm:$0xff] }
 0x55d   : > { %v7750_v61 = vpop.eup %7749  ;;  %v4261_v56 = vmul.f32 %v7748_v46, %v9449_v19 }
 0x55e   : > { %v4260_v14 = vmul.f32 %v7750_v61, %v9451_v54  ;;  %v7752_v4 = vpop.eup %7751  ;;  %v7849_v61 = vld [vmem:[%s8659_s28 + $0x58] sm:$0xff] }
 0x55f   : > { %6995 = vmatmul.mubr.f32.gmra.mrb[104].mxu0 %v4257_v28  ;;  %v7754_v22 = vpop.eup %7753 }
 0x560   : > { %v7756_v19 = vpop.eup %7755 }
 0x561   : > { %v7758_v35 = vpop.eup %7757 }
 0x576   : > { %v6823_v15 = vpop.f32.mrb[92].mxu0 }
 0x577   : > { %v4259_v60 = vmul.f32 %v7752_v4, %v6823_v15  ;;  %v3856_v47 = vpop.f32.mrb[93].mxu0 }
 0x578   : > { %v4258_v12 = vmul.f32 %v7754_v22, %v3856_v47 }
 0x57a   : > { %6997 = vmatprep.mubr.f32.mxu0 %v4258_v12  ;;  %v7852_v12 = vld [vmem:[%s8659_s28 + $0x60] sm:$0xff] }
 0x57b   : > { %6998 = vmatmul.mubr.f32.gmra.mrb[106].mxu0 %v4259_v60  ;;  %v7851_v60 = vld [vmem:[%s8659_s28 + $0x68] sm:$0xff] }
 0x57c   : > { %7000 = vmatprep.mubr.f32.mxu0 %v4260_v14  ;;  %v7850_v14 = vld [vmem:[%s8659_s28 + $0x50] sm:$0xff] }
 0x57f   : > { %7001 = vmatmul.mubr.f32.gmra.mrb[108].mxu0 %v4261_v56 }
 0x596   : > { %v6893_v54 = vpop.f32.mrb[94].mxu0 }
 0x597   : > { %v4263_v29 = vmul.f32 %v7756_v19, %v6893_v54  ;;  %v4006_v34 = vpop.f32.mrb[95].mxu0 }
 0x598   : > { %v4262_v6 = vmul.f32 %v7758_v35, %v4006_v34 }
 0x59a   : > { %7003 = vmatprep.mubr.f32.mxu0 %v4262_v6  ;;  %v7854_v6 = vld [vmem:[%s8659_s28 + $0x70] sm:$0xff] }
 0x59b   : > { %7004 = vmatmul.mubr.f32.gmra.mrb[110].mxu0 %v4263_v29  ;;  %v7853_v29 = vld [vmem:[%s8659_s28 + $0x78] sm:$0xff]  ;;  %s10169_s28 = sld [smem:[#allocation44_spill]] }
 0x61c   : > { %v6984_v52 = vpop.f32.mrb[96].mxu0 }
 0x61d   : > { %v4358_v53 = vadd.f32 %v6984_v52, %v9462_v30  ;;  %v4352_v8 = vpop.f32.mrb[97].mxu0 }
 0x61e   : > { %v4353_v37 = vadd.f32 %v9462_v30, %v4352_v8  ;;  %v4671_v8 = vld [vmem:[#allocation14 + $0x18] sm:$0xff] }
 0x61f   : > { %v9467_v16 = vadd.f32 %v7839_v40, %v4358_v53  ;;  %v4669_v53 = vld [vmem:[#allocation14 + $0x8] sm:$0xff] }
 0x620   : > { %v9470_v13 = vadd.f32 %v7840_v33, %v4353_v37  ;;  %v6987_v63 = vpop.f32.mrb[98].mxu0  ;;  %v4668_v37 = vld [vmem:[#allocation14] sm:$0xff]  ;;  %v7454_v40 = vpack.c.bf16 %v4671_v8, %v4669_v53  ;;  %v4670_v33 = vld [vmem:[#allocation14 + $0x10] sm:$0xff] }
 0x621   : > { %4449 = vadd.xlane.f32.xlu1 %v9467_v16  ;;  %v4362_v11 = vpop.f32.mrb[99].mxu0  ;;  %v4368_v42 = vadd.f32 %v6987_v63, %v9462_v30  ;;  %v4673_v63 = vld [vmem:[#allocation14 + $0x28] sm:$0xff] }
 0x622   : > { %v4363_v18 = vadd.f32 %v9462_v30, %v4362_v11  ;;  %4447 = vadd.xlane.f32.xlu0 %v9470_v13  ;;  %v4675_v11 = vld [vmem:[#allocation14 + $0x38] sm:$0xff]  ;;  %7455 = vmatprep.subr.bf16.mxu1 %v7454_v40 }
 0x623   : > { %v9482_v57 = vadd.f32 %v7842_v17, %v4368_v42  ;;  %v7458_v42 = vpack.c.bf16 %v4675_v11, %v4673_v63  ;;  %v4683_v40 = vld [vmem:[#allocation14 + $0x78] sm:$0xff]  ;;  %v4682_v11 = vld [vmem:[#allocation14 + $0x70] sm:$0xff] }
 0x624   : > { %v9477_v39 = vadd.f32 %v7841_v1, %v4363_v18  ;;  %v6990_v23 = vpop.f32.mrb[100].mxu0  ;;  %v7456_v18 = vpack.c.bf16 %v4670_v33, %v4668_v37  ;;  %v4674_v1 = vld [vmem:[#allocation14 + $0x30] sm:$0xff]  ;;  %v4681_v37 = vld [vmem:[#allocation14 + $0x68] sm:$0xff]  ;;  %v4680_v33 = vld [vmem:[#allocation14 + $0x60] sm:$0xff] }
 0x625   : > { %v4372_v32 = vpop.f32.mrb[101].mxu0  ;;  %v4378_v36 = vadd.f32 %v6990_v23, %v9462_v30  ;;  %v4677_v23 = vld [vmem:[#allocation14 + $0x48] sm:$0xff]  ;;  %v7466_v63 = vpack.c.bf16 %v4683_v40, %v4681_v37 }
 0x626   : > { %v4373_v3 = vadd.f32 %v9462_v30, %v4372_v32  ;;  %4451 = vadd.xlane.f32.xlu1 %v9477_v39  ;;  %v4679_v32 = vld [vmem:[#allocation14 + $0x58] sm:$0xff]  ;;  %7457 = vmatpush1.bf16.msra.mxu1 %v7456_v18 }
 0x627   : > { %v9491_v25 = vadd.f32 %v7844_v5, %v4378_v36  ;;  %7459 = vmatprep.subr.bf16.mxu1 %v7458_v42  ;;  %v7462_v17 = vpack.c.bf16 %v4679_v32, %v4677_v23  ;;  %v4676_v36 = vld [vmem:[#allocation14 + $0x40] sm:$0xff]  ;;  %v4687_v18 = vld [vmem:[#allocation14 + $0x98] sm:$0xff]  ;;  %v7468_v42 = vpack.c.bf16 %v4682_v11, %v4680_v33  ;;  %v4689_v23 = vld [vmem:[#allocation14 + $0xa8] sm:$0xff] }
 0x628   : > { %v9486_v24 = vadd.f32 %v7843_v55, %v4373_v3  ;;  %v4678_v55 = vld [vmem:[#allocation14 + $0x50] sm:$0xff]  ;;  %v4691_v32 = vld [vmem:[#allocation14 + $0xb8] sm:$0xff]  ;;  %v4921_v11 = vld [vmem:[#allocation16 + $0x88] sm:$0xff] }
 0x629   : > { %v7464_v5 = vpack.c.bf16 %v4678_v55, %v4676_v36  ;;  %v4688_v36 = vld [vmem:[#allocation14 + $0xa0] sm:$0xff]  ;;  %v4690_v55 = vld [vmem:[#allocation14 + $0xb0] sm:$0xff] }
 0x62a   : > { %4453 = vadd.xlane.f32.xlu1 %v9482_v57  ;;  %4455 = vadd.xlane.f32.xlu0 %v9486_v24 }
 0x62e   : > { %4457 = vadd.xlane.f32.xlu1 %v9491_v25  ;;  %v6993_v62 = vpop.f32.mrb[102].mxu0 }
 0x62f   : > { %v4388_v31 = vadd.f32 %v6993_v62, %v9462_v30  ;;  %v4382_v26 = vpop.f32.mrb[103].mxu0 }
 0x630   : > { %v4383_v0 = vadd.f32 %v9462_v30, %v4382_v26 }
 0x631   : > { %v9497_v21 = vadd.f32 %v7845_v48, %v4388_v31 }
 0x632   : > { %v9500_v50 = vadd.f32 %v7846_v2, %v4383_v0  ;;  %v6996_v7 = vpop.f32.mrb[104].mxu0 }
 0x633   : > { %v4398_v27 = vadd.f32 %v6996_v7, %v9462_v30  ;;  %v4392_v51 = vpop.f32.mrb[105].mxu0  ;;  %4461 = vadd.xlane.f32.xlu1 %v9497_v21 }
 0x634   : > { %v4393_v28 = vadd.f32 %v9462_v30, %v4392_v51  ;;  %4459 = vadd.xlane.f32.xlu0 %v9500_v50 }
 0x635   : > { %v9507_v38 = vadd.f32 %v7847_v58, %v4398_v27 }
 0x636   : > { %v9510_v59 = vadd.f32 %v7848_v45, %v4393_v28 }
 0x637   : > { %4465 = vadd.xlane.f32.xlu1 %v9507_v38 }
 0x638   : > { %4463 = vadd.xlane.f32.xlu0 %v9510_v59 }
 0x64e   : > { %v6999_v10 = vpop.f32.mrb[106].mxu0 }
 0x64f   : > { %v4408_v44 = vadd.f32 %v6999_v10, %v9462_v30  ;;  %v4402_v41 = vpop.f32.mrb[107].mxu0 }
 0x650   : > { %v4403_v46 = vadd.f32 %v9462_v30, %v4402_v41 }
 0x651   : > { %v9517_v56 = vadd.f32 %v7849_v61, %v4408_v44 }
 0x652   : > { %v9520_v43 = vadd.f32 %v7850_v14, %v4403_v46  ;;  %v7002_v49 = vpop.f32.mrb[108].mxu0 }
 0x653   : > { %v4418_v4 = vadd.f32 %v7002_v49, %v9462_v30  ;;  %v4412_v15 = vpop.f32.mrb[109].mxu0  ;;  %4469 = vadd.xlane.f32.xlu1 %v9517_v56 }
 0x654   : > { %v4413_v22 = vadd.f32 %v9462_v30, %v4412_v15  ;;  %4467 = vadd.xlane.f32.xlu0 %v9520_v43 }
 0x655   : > { %v9527_v47 = vadd.f32 %v7851_v60, %v4418_v4 }
 0x656   : > { %v9530_v9 = vadd.f32 %v7852_v12, %v4413_v22 }
 0x657   : > { %4473 = vadd.xlane.f32.xlu1 %v9527_v47 }
 0x658   : > { %4471 = vadd.xlane.f32.xlu0 %v9530_v9 }
 0x66e   : > { %v7005_v20 = vpop.f32.mrb[110].mxu0 }
 0x66f   : > { %v4428_v19 = vadd.f32 %v7005_v20, %v9462_v30  ;;  %v4422_v54 = vpop.f32.mrb[111].mxu0 }
 0x670   : > { %v4423_v35 = vadd.f32 %v9462_v30, %v4422_v54  ;;  %v4672_v30 = vld [vmem:[#allocation14 + $0x20] sm:$0xff] }
 0x671   : > { %v9537_v34 = vadd.f32 %v7853_v29, %v4428_v19  ;;  %v7460_v3 = vpack.c.bf16 %v4674_v1, %v4672_v30  ;;  %v4686_v1 = vld [vmem:[#allocation14 + $0x90] sm:$0xff] }
 0x672   : > { %v9540_v52 = vadd.f32 %v7854_v6, %v4423_v35 }
 0x673   : > { %4477 = vadd.xlane.f32.xlu1 %v9537_v34  ;;  %7461 = vmatpush1.bf16.msra.mxu1 %v7460_v3 }
 0x674   : > { %4475 = vadd.xlane.f32.xlu0 %v9540_v52  ;;  %7463 = vmatprep.subr.bf16.mxu1 %v7462_v17  ;;  %v7474_v17 = vpack.c.bf16 %v4691_v32, %v4689_v23  ;;  %v4906_v23 = vld [vmem:[#allocation16 + $0x10] sm:$0xff]  ;;  %v4924_v32 = vld [vmem:[#allocation16 + $0xa0] sm:$0xff] }
 0x677   : > { %7465 = vmatpush1.bf16.msra.mxu1 %v7464_v5  ;;  %v4693_v5 = vld [vmem:[#allocation14 + $0xc8] sm:$0xff] }
 0x678   : > { %7467 = vmatprep.subr.bf16.mxu1 %v7466_v63  ;;  %v4920_v63 = vld [vmem:[#allocation16 + $0x80] sm:$0xff] }
 0x67b   : > { %7469 = vmatpush1.bf16.msra.mxu1 %v7468_v42  ;;  %v4905_v42 = vld [vmem:[#allocation16 + $0x8] sm:$0xff] }
 0x6ae   : > { %v4450_v62 = vpop.xlane.xlu1 %4449 }
 0x6af   : > { %v4481_v31 = vmul.f32 0.0078125, %v4450_v62  ;;  %v4448_v26 = vpop.xlane.xlu0 %4447  ;;  %v4695_v62 = vld [vmem:[#allocation14 + $0xd8] sm:$0xff] }
 0x6b0   : > { %v4480_v0 = vmul.f32 0.0078125, %v4448_v26  ;;  %v8212_v26 = vmov 0.0  }
 0x6b1   : > { %v9545_v48 = vsub.f32 %v9467_v16, %v4481_v31  ;;  %v7476_v31 = vpack.c.bf16 %v4690_v55, %v4688_v36  ;;  %4775 = vmatprep.mubr.f32.mxu1 %v8212_v26  ;;  %v4908_v55 = vld [vmem:[#allocation16 + $0x20] sm:$0xff] }
 0x6b2   : > { %v9548_v2 = vsub.f32 %v9470_v13, %v4480_v0  ;;  %v7478_v0 = vpack.c.bf16 %v4695_v62, %v4693_v5  ;;  %v4909_v5 = vld [vmem:[#allocation16 + $0x28] sm:$0xff]  ;;  %v4926_v62 = vld [vmem:[#allocation16 + $0xb0] sm:$0xff] }
 0x6b3   : > { %v4452_v7 = vpop.xlane.xlu1 %4451  ;;  %v4513_v27 = vmul.f32 %v9545_v48, %v9545_v48 }
 0x6b4   : > { %v4482_v51 = vmul.f32 0.0078125, %v4452_v7  ;;  %v4512_v28 = vmul.f32 %v9548_v2, %v9548_v2  ;;  %v4692_v7 = vld [vmem:[#allocation14 + $0xc0] sm:$0xff] }
 0x6b5   : > { %4530 = vadd.xlane.f32.xlu1 %v4513_v27  ;;  %v4694_v27 = vld [vmem:[#allocation14 + $0xd0] sm:$0xff] }
 0x6b6   : > { %v9555_v58 = vsub.f32 %v9477_v39, %v4482_v51  ;;  %4528 = vadd.xlane.f32.xlu0 %v4512_v28  ;;  %v4697_v51 = vld [vmem:[#allocation14 + $0xe8] sm:$0xff]  ;;  %v4699_v28 = vld [vmem:[#allocation14 + $0xf8] sm:$0xff] }
 0x6b7   : > { %v4454_v45 = vpop.xlane.xlu1 %4453  ;;  %v4456_v10 = vpop.xlane.xlu0 %4455 }
 0x6b8   : > { %v4483_v16 = vmul.f32 0.0078125, %v4454_v45  ;;  %v4484_v44 = vmul.f32 0.0078125, %v4456_v10  ;;  %v4514_v13 = vmul.f32 %v9555_v58, %v9555_v58  ;;  %v7480_v45 = vpack.c.bf16 %v4694_v27, %v4692_v7  ;;  %v4910_v27 = vld [vmem:[#allocation16 + $0x30] sm:$0xff] }
 0x6ba   : > { %v9560_v41 = vsub.f32 %v9482_v57, %v4483_v16  ;;  %v9563_v46 = vsub.f32 %v9486_v24, %v4484_v44  ;;  %4532 = vadd.xlane.f32.xlu0 %v4514_v13  ;;  %v7482_v16 = vpack.c.bf16 %v4699_v28, %v4697_v51  ;;  %v4696_v44 = vld [vmem:[#allocation14 + $0xe0] sm:$0xff]  ;;  %v4698_v13 = vld [vmem:[#allocation14 + $0xf0] sm:$0xff]  ;;  %v4911_v51 = vld [vmem:[#allocation16 + $0x38] sm:$0xff] }
 0x6bb   : > { %v4458_v61 = vpop.xlane.xlu1 %4457  ;;  %v4928_v28 = vld [vmem:[#allocation16 + $0xc0] sm:$0xff] }
 0x6bc   : > { %v4485_v14 = vmul.f32 0.0078125, %v4458_v61  ;;  %v4515_v39 = vmul.f32 %v9560_v41, %v9560_v41  ;;  %v4516_v49 = vmul.f32 %v9563_v46, %v9563_v46 }
 0x6be   : > { %v9570_v4 = vsub.f32 %v9491_v25, %v4485_v14  ;;  %4534 = vadd.xlane.f32.xlu1 %v4515_v39  ;;  %4536 = vadd.xlane.f32.xlu0 %v4516_v49 }
 0x6c0   : > { %v4462_v15 = vpop.xlane.xlu1 %4461  ;;  %v4517_v57 = vmul.f32 %v9570_v4, %v9570_v4 }
 0x6c1   : > { %v4487_v24 = vmul.f32 0.0078125, %v4462_v15  ;;  %v4460_v22 = vpop.xlane.xlu0 %4459  ;;  %v7484_v15 = vpack.c.bf16 %v4698_v13, %v4696_v44  ;;  %v4912_v44 = vld [vmem:[#allocation16 + $0x40] sm:$0xff]  ;;  %v4913_v13 = vld [vmem:[#allocation16 + $0x48] sm:$0xff] }
 0x6c2   : > { %4538 = vadd.xlane.f32.xlu1 %v4517_v57  ;;  %v4486_v60 = vmul.f32 0.0078125, %v4460_v22 }
 0x6c3   : > { %v9575_v12 = vsub.f32 %v9497_v21, %v4487_v24 }
 0x6c4   : > { %v9578_v20 = vsub.f32 %v9500_v50, %v4486_v60  ;;  %v4466_v19 = vpop.xlane.xlu1 %4465 }
 0x6c5   : > { %v4489_v54 = vmul.f32 0.0078125, %v4466_v19  ;;  %v4464_v25 = vpop.xlane.xlu0 %4463  ;;  %v4519_v35 = vmul.f32 %v9575_v12, %v9575_v12 }
 0x6c6   : > { %v4488_v29 = vmul.f32 0.0078125, %v4464_v25  ;;  %v4518_v6 = vmul.f32 %v9578_v20, %v9578_v20 }
 0x6c7   : > { %v9585_v53 = vsub.f32 %v9507_v38, %v4489_v54  ;;  %4542 = vadd.xlane.f32.xlu1 %v4519_v35  ;;  %v4685_v38 = vld [vmem:[#allocation14 + $0x88] sm:$0xff] }
 0x6c8   : > { %v9588_v21 = vsub.f32 %v9510_v59, %v4488_v29  ;;  %4540 = vadd.xlane.f32.xlu0 %v4518_v6  ;;  %v7470_v30 = vpack.c.bf16 %v4687_v18, %v4685_v38  ;;  %v4684_v59 = vld [vmem:[#allocation14 + $0x80] sm:$0xff]  ;;  %v7486_v18 = vpack.c.bf16 %v4921_v11, %v4920_v63 }
 0x6c9   : > { %v4521_v50 = vmul.f32 %v9585_v53, %v9585_v53  ;;  %v7472_v3 = vpack.c.bf16 %v4686_v1, %v4684_v59  ;;  %v4904_v38 = vld [vmem:[#allocation16] sm:$0xff]  ;;  %v4923_v59 = vld [vmem:[#allocation16 + $0x98] sm:$0xff] }
 0x6ca   : > { %v4520_v8 = vmul.f32 %v9588_v21, %v9588_v21  ;;  %7471 = vmatprep.subr.bf16.mxu1 %v7470_v30  ;;  %v4922_v30 = vld [vmem:[#allocation16 + $0x90] sm:$0xff]  ;;  %7487 = vmatprep.subr.bf16.mxu0 %v7486_v18 }
 0x6cb   : > { %4546 = vadd.xlane.f32.xlu1 %v4521_v50  ;;  %7473 = vmatpush1.bf16.msra.mxu1 %v7472_v3  ;;  %v7490_v1 = vpack.c.bf16 %v4923_v59, %v4922_v30  ;;  %v4925_v3 = vld [vmem:[#allocation16 + $0xa8] sm:$0xff] }
 0x6cc   : > { %4544 = vadd.xlane.f32.xlu0 %v4520_v8  ;;  %7475 = vmatprep.subr.bf16.mxu1 %v7474_v17  ;;  %v7494_v36 = vpack.c.bf16 %v4925_v3, %v4924_v32  ;;  %v9628_v3 = vld [vmem:[%s10163_s22] ss:$0 sm:$0xff] }
 0x6cf   : > { %7477 = vmatpush1.bf16.msra.mxu1 %v7476_v31  ;;  %v4927_v31 = vld [vmem:[#allocation16 + $0xb8] sm:$0xff] }
 0x6d0   : > { %7479 = vmatprep.subr.bf16.mxu1 %v7478_v0  ;;  %v7496_v0 = vpack.c.bf16 %v4909_v5, %v4908_v55  ;;  %v7498_v7 = vpack.c.bf16 %v4927_v31, %v4926_v62  ;;  %v9635_v5 = vld [vmem:[%s10164_s23] ss:$0 sm:$0xff]  ;;  %s10030_s23 = scalar_lea.hbm %s10169_s28, %s5693_s17 }
 0x6d3   : > { %7481 = vmatpush1.bf16.msra.mxu1 %v7480_v45  ;;  %v4929_v45 = vld [vmem:[#allocation16 + $0xc8] sm:$0xff] }
 0x6d4   : > { %7483 = vmatprep.subr.bf16.mxu1 %v7482_v16  ;;  %v7502_v16 = vpack.c.bf16 %v4929_v45, %v4928_v28 }
 0x6d7   : > { %7485 = vmatpush1.bf16.msra.mxu1 %v7484_v15 }
 0x6e0   : > { %v4470_v10 = vpop.xlane.xlu1 %4469 }
 0x6e1   : > { %v4491_v61 = vmul.f32 0.0078125, %v4470_v10  ;;  %v4468_v14 = vpop.xlane.xlu0 %4467  ;;  %v7500_v10 = vpack.c.bf16 %v4911_v51, %v4910_v27 }
 0x6e2   : > { %v4490_v39 = vmul.f32 0.0078125, %v4468_v14  ;;  %v4931_v14 = vld [vmem:[#allocation16 + $0xd8] sm:$0xff] }
 0x6e3   : > { %v9596_v49 = vsub.f32 %v9517_v56, %v4491_v61  ;;  %v4930_v61 = vld [vmem:[#allocation16 + $0xd0] sm:$0xff] }
 0x6e4   : > { %v9599_v57 = vsub.f32 %v9520_v43, %v4490_v39  ;;  %v4474_v24 = vpop.xlane.xlu1 %4473  ;;  %v7504_v39 = vpack.c.bf16 %v4913_v13, %v4912_v44  ;;  %v7506_v15 = vpack.c.bf16 %v4931_v14, %v4930_v61 }
 0x6e5   : > { %v4493_v22 = vmul.f32 0.0078125, %v4474_v24  ;;  %v4472_v60 = vpop.xlane.xlu0 %4471  ;;  %v4523_v19 = vmul.f32 %v9596_v49, %v9596_v49  ;;  %v4914_v24 = vld [vmem:[#allocation16 + $0x50] sm:$0xff] }
 0x6e6   : > { %v4492_v54 = vmul.f32 0.0078125, %v4472_v60  ;;  %v4522_v25 = vmul.f32 %v9599_v57, %v9599_v57  ;;  %v4932_v60 = vld [vmem:[#allocation16 + $0xe0] sm:$0xff] }
 0x6e7   : > { %v9606_v35 = vsub.f32 %v9527_v47, %v4493_v22  ;;  %4550 = vadd.xlane.f32.xlu1 %v4523_v19  ;;  %v4915_v22 = vld [vmem:[#allocation16 + $0x58] sm:$0xff]  ;;  %v4933_v19 = vld [vmem:[#allocation16 + $0xe8] sm:$0xff] }
 0x6e8   : > { %v9609_v56 = vsub.f32 %v9530_v9, %v4492_v54  ;;  %4548 = vadd.xlane.f32.xlu0 %v4522_v25 }
 0x6e9   : > { %v4525_v43 = vmul.f32 %v9606_v35, %v9606_v35 }
 0x6ea   : > { %v4524_v29 = vmul.f32 %v9609_v56, %v9609_v56 }
 0x6eb   : > { %4554 = vadd.xlane.f32.xlu1 %v4525_v43 }
 0x6ec   : > { %4552 = vadd.xlane.f32.xlu0 %v4524_v29  ;;  %v7508_v29 = vpack.c.bf16 %v4915_v22, %v4914_v24 }
 0x700   : > { %v4478_v6 = vpop.xlane.xlu1 %4477 }
 0x701   : > { %v4495_v50 = vmul.f32 0.0078125, %v4478_v6  ;;  %v4476_v8 = vpop.xlane.xlu0 %4475 }
 0x702   : > { %v4494_v37 = vmul.f32 0.0078125, %v4476_v8 }
 0x703   : > { %v9616_v47 = vsub.f32 %v9537_v34, %v4495_v50  ;;  %v7488_v34 = vpack.c.bf16 %v4905_v42, %v4904_v38  ;;  %v7510_v50 = vpack.c.bf16 %v4933_v19, %v4932_v60 }
 0x704   : > { %v9619_v40 = vsub.f32 %v9540_v52, %v4494_v37  ;;  %v4907_v52 = vld [vmem:[#allocation16 + $0x18] sm:$0xff] }
 0x705   : > { %v4527_v9 = vmul.f32 %v9616_v47, %v9616_v47  ;;  %7489 = vmatpush3.bf16.msra.mxu0 %v7488_v34  ;;  %v7492_v17 = vpack.c.bf16 %v4907_v52, %v4906_v23 }
 0x706   : > { %v4526_v33 = vmul.f32 %v9619_v40, %v9619_v40  ;;  %7491 = vmatprep.subr.bf16.mxu0 %v7490_v1 }
 0x707   : > { %4558 = vadd.xlane.f32.xlu1 %v4527_v9 }
 0x708   : > { %4556 = vadd.xlane.f32.xlu0 %v4526_v33 }
 0x709   : > { %7493 = vmatpush3.bf16.msra.mxu0 %v7492_v17 }
 0x70a   : > { %7495 = vmatprep.subr.bf16.mxu0 %v7494_v36 }
 0x70d   : > { %7497 = vmatpush3.bf16.msra.mxu0 %v7496_v0 }
 0x70e   : > { %7499 = vmatprep.subr.bf16.mxu0 %v7498_v7 }
 0x711   : > { %7501 = vmatpush3.bf16.msra.mxu0 %v7500_v10 }
 0x712   : > { %7503 = vmatprep.subr.bf16.mxu0 %v7502_v16 }
 0x715   : > { %7505 = vmatpush3.bf16.msra.mxu0 %v7504_v39 }
 0x716   : > { %7507 = vmatprep.subr.bf16.mxu0 %v7506_v15 }
 0x719   : > { %7509 = vmatpush3.bf16.msra.mxu0 %v7508_v29 }
 0x71a   : > { %7511 = vmatprep.subr.bf16.mxu0 %v7510_v50 }
 0x742   : > { %v4531_v54 = vpop.xlane.xlu1 %4530 }
 0x743   : > { %v4561_v25 = vmul.f32 0.0078125, %v4531_v54  ;;  %v4529_v43 = vpop.xlane.xlu0 %4528 }
 0x744   : > { %v4560_v6 = vmul.f32 0.0078125, %v4529_v43 }
 0x745   : > { %v4577_v8 = vadd.f32 1e-05, %v4561_v25 }
 0x746   : > { %v4576_v37 = vadd.f32 1e-05, %v4560_v6 }
 0x747   : > { %7759 = vrsqrt.f32 %v4577_v8  ;;  %v4533_v9 = vpop.xlane.xlu0 %4532 }
 0x748   : > { %7761 = vrsqrt.f32 %v4576_v37  ;;  %v4562_v33 = vmul.f32 0.0078125, %v4533_v9 }
 0x74a   : > { %v4578_v63 = vadd.f32 1e-05, %v4562_v33 }
 0x74b   : > { %v4535_v11 = vpop.xlane.xlu1 %4534  ;;  %v4537_v38 = vpop.xlane.xlu0 %4536 }
 0x74c   : > { %7763 = vrsqrt.f32 %v4578_v63  ;;  %v4563_v18 = vmul.f32 0.0078125, %v4535_v11  ;;  %v4564_v42 = vmul.f32 0.0078125, %v4537_v38 }
 0x74e   : > { %v4579_v30 = vadd.f32 1e-05, %v4563_v18  ;;  %v4580_v59 = vadd.f32 1e-05, %v4564_v42 }
 0x74f   : > { %v4539_v34 = vpop.xlane.xlu1 %4538 }
 0x750   : > { %7765 = vrsqrt.f32 %v4579_v30  ;;  %v4565_v1 = vmul.f32 0.0078125, %v4539_v34 }
 0x751   : > { %v7760_v23 = vpop.eup %7759  ;;  %7767 = vrsqrt.f32 %v4580_v59 }
 0x752   : > { %v7762_v52 = vpop.eup %7761  ;;  %v4581_v32 = vadd.f32 1e-05, %v4565_v1  ;;  %v4609_v36 = vmul.f32 %v7760_v23, %v9545_v48 }
 0x753   : > { %v4608_v17 = vmul.f32 %v7762_v52, %v9548_v2 }
 0x754   : > { %v4543_v55 = vpop.xlane.xlu1 %4542  ;;  %7769 = vrsqrt.f32 %v4581_v32  ;;  %v4631_v2 = vmul.f32 %v9628_v3, %v4609_v36 }
 0x755   : > { %v4541_v62 = vpop.xlane.xlu0 %4540  ;;  %v4630_v31 = vmul.f32 %v9628_v3, %v4608_v17  ;;  %v4567_v7 = vmul.f32 0.0078125, %v4543_v55 }
 0x756   : > { %v7764_v0 = vpop.eup %7763  ;;  %v4566_v27 = vmul.f32 0.0078125, %v4541_v62  ;;  %v9646_v61 = vadd.f32 %v9635_v5, %v4631_v2 }
 0x757   : > { %v9639_v51 = vadd.f32 %v9635_v5, %v4630_v31  ;;  %v4610_v48 = vmul.f32 %v7764_v0, %v9555_v58  ;;  %v4583_v16 = vadd.f32 1e-05, %v4567_v7 }
 0x758   : > { %v4582_v28 = vadd.f32 1e-05, %v4566_v27  ;;  %v4547_v13 = vpop.xlane.xlu1 %4546 }
 0x759   : > { %4776 = vmatmul.mubr.f32.vlgmr.msra.gmra.mrb[112].mxu1 %v9639_v51  ;;  %v4545_v45 = vpop.xlane.xlu0 %4544  ;;  %v4632_v14 = vmul.f32 %v9628_v3, %v4610_v48  ;;  %v4569_v58 = vmul.f32 0.0078125, %v4547_v13 }
 0x75a   : > { %v7766_v10 = vpop.eup %7765  ;;  %7771 = vrsqrt.f32 %v4582_v28  ;;  %v4568_v44 = vmul.f32 0.0078125, %v4545_v45  ;;  %4781 = vmatprep.mubr.f32.mxu1 %v8212_v26 }
 0x75b   : > { %v4611_v39 = vmul.f32 %v7766_v10, %v9560_v41  ;;  %v7768_v15 = vpop.eup %7767  ;;  %7773 = vrsqrt.f32 %v4583_v16  ;;  %v9653_v22 = vadd.f32 %v9635_v5, %v4632_v14  ;;  %v4585_v25 = vadd.f32 1e-05, %v4569_v58 }
 0x75c   : > { %v4584_v24 = vadd.f32 1e-05, %v4568_v44  ;;  %v4612_v19 = vmul.f32 %v7768_v15, %v9563_v46 }
 0x75d   : > { %4782 = vmatmul.mubr.f32.gmra.mrb[114].mxu1 %v9646_v61  ;;  %v4633_v60 = vmul.f32 %v9628_v3, %v4611_v39 }
 0x75e   : > { %4787 = vmatprep.mubr.f32.mxu1 %v8212_v26  ;;  %v7770_v54 = vpop.eup %7769  ;;  %7775 = vrsqrt.f32 %v4584_v24  ;;  %v4634_v43 = vmul.f32 %v9628_v3, %v4612_v19 }
 0x75f   : > { %v9660_v41 = vadd.f32 %v9635_v5, %v4633_v60  ;;  %v4613_v29 = vmul.f32 %v7770_v54, %v9570_v4  ;;  %7777 = vrsqrt.f32 %v4585_v25 }
 0x760   : > { %v9667_v46 = vadd.f32 %v9635_v5, %v4634_v43 }
 0x761   : > { %4788 = vmatmul.mubr.f32.gmra.mrb[116].mxu1 %v9653_v22  ;;  %v4635_v50 = vmul.f32 %v9628_v3, %v4613_v29 }
 0x762   : > { %4793 = vmatprep.mubr.f32.mxu1 %v8212_v26 }
 0x763   : > { %v9674_v4 = vadd.f32 %v9635_v5, %v4635_v50 }
 0x764   : > { %v7772_v6 = vpop.eup %7771 }
 0x765   : > { %4794 = vmatmul.mubr.f32.gmra.mrb[118].mxu1 %v9660_v41  ;;  %v4614_v8 = vmul.f32 %v7772_v6, %v9578_v20  ;;  %v7774_v37 = vpop.eup %7773 }
 0x766   : > { %4799 = vmatprep.mubr.f32.mxu1 %v8212_v26  ;;  %v4615_v33 = vmul.f32 %v7774_v37, %v9575_v12 }
 0x767   : > { %v4636_v9 = vmul.f32 %v9628_v3, %v4614_v8 }
 0x768   : > { %v7776_v63 = vpop.eup %7775  ;;  %v4637_v20 = vmul.f32 %v9628_v3, %v4615_v33 }
 0x769   : > { %4800 = vmatmul.mubr.f32.gmra.mrb[120].mxu1 %v9667_v46  ;;  %v9681_v11 = vadd.f32 %v9635_v5, %v4636_v9  ;;  %v4616_v38 = vmul.f32 %v7776_v63, %v9588_v21  ;;  %v7778_v18 = vpop.eup %7777  ;;  %v4916_v63 = vld [vmem:[#allocation16 + $0x60] sm:$0xff] }
 0x76a   : > { %4805 = vmatprep.mubr.f32.mxu1 %v8212_v26  ;;  %v9688_v42 = vadd.f32 %v9635_v5, %v4637_v20  ;;  %v4617_v30 = vmul.f32 %v7778_v18, %v9585_v53 }
 0x76b   : > { %v4638_v12 = vmul.f32 %v9628_v3, %v4616_v38  ;;  %v4935_v38 = vld [vmem:[#allocation16 + $0xf8] sm:$0xff] }
 0x76c   : > { %v4639_v32 = vmul.f32 %v9628_v3, %v4617_v30  ;;  %v4919_v30 = vld [vmem:[#allocation16 + $0x78] sm:$0xff] }
 0x76d   : > { %4806 = vmatmul.mubr.f32.gmra.mrb[122].mxu1 %v9674_v4  ;;  %v9695_v52 = vadd.f32 %v9635_v5, %v4638_v12  ;;  %v4918_v12 = vld [vmem:[#allocation16 + $0x70] sm:$0xff] }
 0x76e   : > { %4811 = vmatprep.mubr.f32.mxu1 %v8212_v26  ;;  %v9701_v31 = vadd.f32 %v9635_v5, %v4639_v32 }
 0x771   : > { %4812 = vmatmul.mubr.f32.gmra.mrb[124].mxu1 %v9681_v11 }
 0x772   : > { %4817 = vmatprep.mubr.f32.mxu1 %v8212_v26 }
 0x774   : > { %v4551_v59 = vpop.xlane.xlu1 %4550 }
 0x775   : > { %v4571_v34 = vmul.f32 0.0078125, %v4551_v59  ;;  %4818 = vmatmul.mubr.f32.gmra.mrb[126].mxu1 %v9688_v42  ;;  %v4549_v1 = vpop.xlane.xlu0 %4548  ;;  %v4701_v59 = vlaneseq }
 0x776   : > { %v4570_v23 = vmul.f32 0.0078125, %v4549_v1  ;;  %4823 = vmatprep.mubr.f32.mxu1 %v8212_v26 }
 0x777   : > { %v4587_v21 = vadd.f32 1e-05, %v4571_v34  ;;  %v4702_v34 = vshrl.u32 %v4701_v59, 7 }
 0x778   : > { %v4586_v17 = vadd.f32 1e-05, %v4570_v23  ;;  %v4555_v36 = vpop.xlane.xlu1 %4554 }
 0x779   : > { %7779 = vrsqrt.f32 %v4587_v21  ;;  %v4573_v55 = vmul.f32 0.0078125, %v4555_v36  ;;  %4824 = vmatmul.mubr.f32.gmra.mrb[128].mxu1 %v9695_v52  ;;  %v4553_v53 = vpop.xlane.xlu0 %4552  ;;  %v4707_v1 = vsub.s32 1, %v4702_v34 }
 0x77a   : > { %7781 = vrsqrt.f32 %v4586_v17  ;;  %v4572_v62 = vmul.f32 0.0078125, %v4553_v53  ;;  %4829 = vmatprep.mubr.f32.mxu1 %v8212_v26 }
 0x77b   : > { %v4589_v0 = vadd.f32 1e-05, %v4573_v55 }
 0x77c   : > { %v4588_v7 = vadd.f32 1e-05, %v4572_v62 }
 0x77d   : > { %4830 = vmatmul.mubr.f32.gmra.mrb[130].mxu1 %v9701_v31 }
 0x77e   : > { %7783 = vrsqrt.f32 %v4588_v7  ;;  %4835 = vmatprep.mubr.f32.mxu1 %v8212_v26 }
 0x77f   : > { %7785 = vrsqrt.f32 %v4589_v0 }
 0x783   : > { %v7780_v27 = vpop.eup %7779 }
 0x784   : > { %v7782_v2 = vpop.eup %7781  ;;  %v4619_v28 = vmul.f32 %v7780_v27, %v9596_v49 }
 0x785   : > { %v4618_v48 = vmul.f32 %v7782_v2, %v9599_v57 }
 0x786   : > { %v4641_v44 = vmul.f32 %v9628_v3, %v4619_v28 }
 0x787   : > { %v4640_v45 = vmul.f32 %v9628_v3, %v4618_v48 }
 0x788   : > { %v7784_v10 = vpop.eup %7783  ;;  %v9716_v39 = vadd.f32 %v9635_v5, %v4641_v44 }
 0x789   : > { %v9709_v16 = vadd.f32 %v9635_v5, %v4640_v45  ;;  %v4620_v13 = vmul.f32 %v7784_v10, %v9609_v56  ;;  %v7786_v14 = vpop.eup %7785 }
 0x78a   : > { %v4621_v57 = vmul.f32 %v7786_v14, %v9606_v35 }
 0x78b   : > { %4836 = vmatmul.mubr.f32.gmra.mrb[132].mxu1 %v9709_v16  ;;  %v4642_v49 = vmul.f32 %v9628_v3, %v4620_v13 }
 0x78c   : > { %4841 = vmatprep.mubr.f32.mxu1 %v8212_v26  ;;  %v4643_v56 = vmul.f32 %v9628_v3, %v4621_v57 }
 0x78d   : > { %v9723_v15 = vadd.f32 %v9635_v5, %v4642_v49 }
 0x78e   : > { %v9729_v19 = vadd.f32 %v9635_v5, %v4643_v56 }
 0x78f   : > { %4842 = vmatmul.mubr.f32.gmra.mrb[134].mxu1 %v9716_v39 }
 0x790   : > { %4847 = vmatprep.mubr.f32.mxu1 %v8212_v26 }
 0x793   : > { %4848 = vmatmul.mubr.f32.gmra.mrb[136].mxu1 %v9723_v15 }
 0x794   : > { %v4559_v58 = vpop.xlane.xlu1 %4558  ;;  %4853 = vmatprep.mubr.f32.mxu1 %v8212_v26 }
 0x795   : > { %v4575_v24 = vmul.f32 0.0078125, %v4559_v58  ;;  %v4557_v60 = vpop.xlane.xlu0 %4556 }
 0x796   : > { %v4574_v35 = vmul.f32 0.0078125, %v4557_v60 }
 0x797   : > { %v4591_v54 = vadd.f32 1e-05, %v4575_v24  ;;  %4854 = vmatmul.mubr.f32.gmra.mrb[138].mxu1 %v9729_v19 }
 0x798   : > { %v4590_v25 = vadd.f32 1e-05, %v4574_v35  ;;  %4859 = vmatprep.mubr.f32.mxu1 %v8212_v26 }
 0x799   : > { %7787 = vrsqrt.f32 %v4591_v54 }
 0x79a   : > { %7789 = vrsqrt.f32 %v4590_v25 }
 0x7a3   : > { %v7788_v43 = vpop.eup %7787 }
 0x7a4   : > { %v7790_v29 = vpop.eup %7789  ;;  %v4623_v50 = vmul.f32 %v7788_v43, %v9616_v47  ;;  %v4934_v47 = vld [vmem:[#allocation16 + $0xf0] sm:$0xff] }
 0x7a5   : > { %v4622_v6 = vmul.f32 %v7790_v29, %v9619_v40  ;;  %v4917_v40 = vld [vmem:[#allocation16 + $0x68] sm:$0xff]  ;;  %v7514_v18 = vpack.c.bf16 %v4935_v38, %v4934_v47 }
 0x7a6   : > { %v4645_v9 = vmul.f32 %v9628_v3, %v4623_v50  ;;  %v7512_v20 = vpack.c.bf16 %v4917_v40, %v4916_v63 }
 0x7a7   : > { %v4644_v8 = vmul.f32 %v9628_v3, %v4622_v6  ;;  %v7516_v3 = vpack.c.bf16 %v4919_v30, %v4918_v12 }
 0x7a8   : > { %v9743_v33 = vadd.f32 %v9635_v5, %v4645_v9  ;;  %7513 = vmatpush3.bf16.msra.mxu0 %v7512_v20 }
 0x7a9   : > { %v9737_v37 = vadd.f32 %v9635_v5, %v4644_v8  ;;  %7515 = vmatprep.subr.bf16.mxu0 %v7514_v18  ;;  %v819_v5 = vld [vmem:[%s10165_s25] sm:$0x3]  ;;  %s8115_s25 = sshll.u32 %s8213_s2, 4  ;;  %s8116_s25 = int_to_ptr.vmem [resolvable:$false] %s8115_s25 }
 0x7aa   : > { %v9751_v21 = vrot.slane %v819_v5, %v4707_v1  ;;  %s8117_s26 = scalar_lea.vmem %s8116_s25, 4096  ;;  %p8118_p4 = scmp.lt.s32.totalorder %s10032_s29, %s8116_s25 }
 0x7ab   : > { %4860 = vmatmul.mubr.f32.gmra.mrb[140].mxu1 %v9737_v37  ;;  %p8119_p8 = scmp.lt.s32.totalorder %s8117_s26, %s8111_s14 }
 0x7ac   : > { %4865 = vmatprep.mubr.f32.mxu1 %v8212_v26  ;;  %7517 = vmatpush3.bf16.msra.mxu0 %v7516_v3  ;;  %v4703_v26 = vsub.s32 0, %v4702_v34 }
 0x7ad   : > { %p8120_p11 = por %p8119_p8, %p8118_p4 }
 0x7ae   : > { %v9749_v23 = vrot.slane %v819_v5, %v4703_v26 }
 0x7af   : > { %4866 = vmatmul.mubr.f32.gmra.mrb[142].mxu1 %v9743_v33  ;;  %p8121_p3 = pnand %p8120_p11, %p8114_p9 }
 0x82c   : > { %v4777_v32 = vpop.f32.mrb[112].mxu1 }
 0x82d   : > { %v4778_v17 = vadd.f32 %v4777_v32, %v9749_v23  ;;  %v4779_v36 = vpop.f32.mrb[113].mxu1 }
 0x82e   : > { %v4780_v55 = vadd.f32 %v4779_v36, %v9751_v21 }
 0x82f   : > { %v4872_v0 = vmax.f32 %v4778_v17, 0.0 }
 0x830   : > { %v4873_v53 = vmax.f32 %v4780_v55, 0.0  ;;  %v4783_v62 = vpop.f32.mrb[114].mxu1 }
 0x831   : > { %v4784_v7 = vadd.f32 %v4783_v62, %v9749_v23  ;;  %v4785_v27 = vpop.f32.mrb[115].mxu1 }
 0x832   : > { %v4786_v2 = vadd.f32 %v4785_v27, %v9751_v21  ;;  %5006 = vmatprep.mubr.f32.mxu0 %v4873_v53 }
 0x833   : > { %5007 = vmatmul.mubr.f32.vlgmr.msra.gmra.mrb[112].mxu0 %v4872_v0  ;;  %v4874_v45 = vmax.f32 %v4784_v7, 0.0 }
 0x834   : > { %v4875_v48 = vmax.f32 %v4786_v2, 0.0  ;;  %v4789_v28 = vpop.f32.mrb[116].mxu1 }
 0x835   : > { %v4790_v10 = vadd.f32 %v4789_v28, %v9749_v23  ;;  %v4791_v44 = vpop.f32.mrb[117].mxu1 }
 0x836   : > { %v4792_v13 = vadd.f32 %v4791_v44, %v9751_v21  ;;  %5011 = vmatprep.mubr.f32.mxu0 %v4875_v48 }
 0x837   : > { %5012 = vmatmul.mubr.f32.gmra.mrb[114].mxu0 %v4874_v45  ;;  %v4876_v57 = vmax.f32 %v4790_v10, 0.0 }
 0x838   : > { %v4877_v14 = vmax.f32 %v4792_v13, 0.0  ;;  %v4795_v49 = vpop.f32.mrb[118].mxu1 }
 0x839   : > { %v4796_v56 = vadd.f32 %v4795_v49, %v9749_v23  ;;  %v4797_v58 = vpop.f32.mrb[119].mxu1 }
 0x83a   : > { %v4798_v24 = vadd.f32 %v4797_v58, %v9751_v21  ;;  %5016 = vmatprep.mubr.f32.mxu0 %v4877_v14 }
 0x83b   : > { %5017 = vmatmul.mubr.f32.gmra.mrb[116].mxu0 %v4876_v57  ;;  %v4878_v54 = vmax.f32 %v4796_v56, 0.0 }
 0x83c   : > { %v4879_v60 = vmax.f32 %v4798_v24, 0.0  ;;  %v4801_v35 = vpop.f32.mrb[120].mxu1 }
 0x83d   : > { %v4802_v25 = vadd.f32 %v4801_v35, %v9749_v23  ;;  %v4803_v43 = vpop.f32.mrb[121].mxu1 }
 0x83e   : > { %v4804_v29 = vadd.f32 %v4803_v43, %v9751_v21  ;;  %5021 = vmatprep.mubr.f32.mxu0 %v4879_v60 }
 0x83f   : > { %5022 = vmatmul.mubr.f32.gmra.mrb[118].mxu0 %v4878_v54  ;;  %v4880_v8 = vmax.f32 %v4802_v25, 0.0 }
 0x840   : > { %v4881_v6 = vmax.f32 %v4804_v29, 0.0  ;;  %v4807_v50 = vpop.f32.mrb[122].mxu1 }
 0x841   : > { %v4808_v9 = vadd.f32 %v4807_v50, %v9749_v23  ;;  %v4809_v63 = vpop.f32.mrb[123].mxu1 }
 0x842   : > { %v4810_v40 = vadd.f32 %v4809_v63, %v9751_v21  ;;  %5026 = vmatprep.mubr.f32.mxu0 %v4881_v6 }
 0x843   : > { %5027 = vmatmul.mubr.f32.gmra.mrb[120].mxu0 %v4880_v8  ;;  %v4882_v38 = vmax.f32 %v4808_v9, 0.0 }
 0x844   : > { %v4883_v20 = vmax.f32 %v4810_v40, 0.0  ;;  %v4813_v47 = vpop.f32.mrb[124].mxu1 }
 0x845   : > { %v4814_v18 = vadd.f32 %v4813_v47, %v9749_v23  ;;  %v4815_v12 = vpop.f32.mrb[125].mxu1 }
 0x846   : > { %v4816_v30 = vadd.f32 %v4815_v12, %v9751_v21  ;;  %5031 = vmatprep.mubr.f32.mxu0 %v4883_v20 }
 0x847   : > { %5032 = vmatmul.mubr.f32.gmra.mrb[122].mxu0 %v4882_v38  ;;  %v4884_v34 = vmax.f32 %v4814_v18, 0.0 }
 0x848   : > { %v4885_v3 = vmax.f32 %v4816_v30, 0.0  ;;  %v4819_v59 = vpop.f32.mrb[126].mxu1 }
 0x849   : > { %v4820_v26 = vadd.f32 %v4819_v59, %v9749_v23  ;;  %v4821_v5 = vpop.f32.mrb[127].mxu1 }
 0x84a   : > { %v4822_v1 = vadd.f32 %v4821_v5, %v9751_v21  ;;  %5036 = vmatprep.mubr.f32.mxu0 %v4885_v3 }
 0x84b   : > { %5037 = vmatmul.mubr.f32.gmra.mrb[124].mxu0 %v4884_v34  ;;  %v4886_v36 = vmax.f32 %v4820_v26, 0.0 }
 0x84c   : > { %v4887_v32 = vmax.f32 %v4822_v1, 0.0  ;;  %v4825_v17 = vpop.f32.mrb[128].mxu1 }
 0x84d   : > { %v4826_v55 = vadd.f32 %v4825_v17, %v9749_v23  ;;  %v4827_v53 = vpop.f32.mrb[129].mxu1 }
 0x84e   : > { %v4828_v62 = vadd.f32 %v4827_v53, %v9751_v21  ;;  %5041 = vmatprep.mubr.f32.mxu0 %v4887_v32 }
 0x84f   : > { %5042 = vmatmul.mubr.f32.gmra.mrb[126].mxu0 %v4886_v36  ;;  %v4888_v27 = vmax.f32 %v4826_v55, 0.0 }
 0x850   : > { %v4889_v0 = vmax.f32 %v4828_v62, 0.0  ;;  %v4831_v7 = vpop.f32.mrb[130].mxu1  ;;  %v9788_v62 = vld [vmem:[%s10166_s27] ss:$0 sm:$0xff] }
 0x851   : > { %v4832_v2 = vadd.f32 %v4831_v7, %v9749_v23  ;;  %v4833_v48 = vpop.f32.mrb[131].mxu1 }
 0x852   : > { %v4834_v28 = vadd.f32 %v4833_v48, %v9751_v21  ;;  %5046 = vmatprep.mubr.f32.mxu0 %v4889_v0 }
 0x853   : > { %5047 = vmatmul.mubr.f32.gmra.mrb[128].mxu0 %v4888_v27  ;;  %v4890_v10 = vmax.f32 %v4832_v2, 0.0 }
 0x854   : > { %v4891_v45 = vmax.f32 %v4834_v28, 0.0 }
 0x856   : > { %5051 = vmatprep.mubr.f32.mxu0 %v4891_v45 }
 0x857   : > { %5052 = vmatmul.mubr.f32.gmra.mrb[130].mxu0 %v4890_v10 }
 0x85e   : > { %v4837_v44 = vpop.f32.mrb[132].mxu1 }
 0x85f   : > { %v4838_v13 = vadd.f32 %v4837_v44, %v9749_v23  ;;  %v4839_v14 = vpop.f32.mrb[133].mxu1 }
 0x860   : > { %v4840_v49 = vadd.f32 %v4839_v14, %v9751_v21 }
 0x861   : > { %v4892_v58 = vmax.f32 %v4838_v13, 0.0 }
 0x862   : > { %v4893_v57 = vmax.f32 %v4840_v49, 0.0  ;;  %v4843_v56 = vpop.f32.mrb[134].mxu1 }
 0x863   : > { %v4844_v24 = vadd.f32 %v4843_v56, %v9749_v23  ;;  %v4845_v60 = vpop.f32.mrb[135].mxu1 }
 0x864   : > { %v4846_v35 = vadd.f32 %v4845_v60, %v9751_v21  ;;  %5056 = vmatprep.mubr.f32.mxu0 %v4893_v57 }
 0x865   : > { %5057 = vmatmul.mubr.f32.gmra.mrb[132].mxu0 %v4892_v58  ;;  %v4894_v43 = vmax.f32 %v4844_v24, 0.0 }
 0x866   : > { %v4895_v54 = vmax.f32 %v4846_v35, 0.0  ;;  %v4849_v25 = vpop.f32.mrb[136].mxu1 }
 0x867   : > { %v4850_v29 = vadd.f32 %v4849_v25, %v9749_v23  ;;  %v4851_v6 = vpop.f32.mrb[137].mxu1 }
 0x868   : > { %v4852_v50 = vadd.f32 %v4851_v6, %v9751_v21  ;;  %5061 = vmatprep.mubr.f32.mxu0 %v4895_v54 }
 0x869   : > { %5062 = vmatmul.mubr.f32.gmra.mrb[134].mxu0 %v4894_v43  ;;  %v4896_v63 = vmax.f32 %v4850_v29, 0.0 }
 0x86a   : > { %v4897_v8 = vmax.f32 %v4852_v50, 0.0  ;;  %v4855_v9 = vpop.f32.mrb[138].mxu1 }
 0x86b   : > { %v4856_v40 = vadd.f32 %v4855_v9, %v9749_v23  ;;  %v4857_v20 = vpop.f32.mrb[139].mxu1 }
 0x86c   : > { %v4858_v47 = vadd.f32 %v4857_v20, %v9751_v21  ;;  %5066 = vmatprep.mubr.f32.mxu0 %v4897_v8 }
 0x86d   : > { %5067 = vmatmul.mubr.f32.gmra.mrb[136].mxu0 %v4896_v63  ;;  %v4898_v18 = vmax.f32 %v4856_v40, 0.0 }
 0x86e   : > { %v4899_v38 = vmax.f32 %v4858_v47, 0.0 }
 0x870   : > { %5071 = vmatprep.mubr.f32.mxu0 %v4899_v38 }
 0x871   : > { %5072 = vmatmul.mubr.f32.gmra.mrb[138].mxu0 %v4898_v18 }
 0x87e   : > { %v4861_v12 = vpop.f32.mrb[140].mxu1 }
 0x87f   : > { %v4862_v30 = vadd.f32 %v4861_v12, %v9749_v23  ;;  %v4863_v3 = vpop.f32.mrb[141].mxu1 }
 0x880   : > { %v4864_v59 = vadd.f32 %v4863_v3, %v9751_v21 }
 0x881   : > { %v4900_v5 = vmax.f32 %v4862_v30, 0.0 }
 0x882   : > { %v4901_v34 = vmax.f32 %v4864_v59, 0.0  ;;  %v4867_v26 = vpop.f32.mrb[142].mxu1 }
 0x883   : > { %v4868_v1 = vadd.f32 %v4867_v26, %v9749_v23  ;;  %v4869_v32 = vpop.f32.mrb[143].mxu1 }
 0x884   : > { %v4870_v17 = vadd.f32 %v4869_v32, %v9751_v21  ;;  %5076 = vmatprep.mubr.f32.mxu0 %v4901_v34 }
 0x885   : > { %5077 = vmatmul.mubr.f32.gmra.mrb[140].mxu0 %v4900_v5  ;;  %v4902_v55 = vmax.f32 %v4868_v1, 0.0 }
 0x886   : > { %v4903_v36 = vmax.f32 %v4870_v17, 0.0 }
 0x888   : > { %5081 = vmatprep.mubr.f32.mxu0 %v4903_v36 }
 0x889   : > { %5082 = vmatmul.mubr.f32.gmra.mrb[142].mxu0 %v4902_v55 }
 0x906   : > { %v6174_v53 = vpop.f32.mrb[112].mxu0 }
 0x907   : > { %v6175_v0 = vpop.f32.mrb[113].mxu0 }
 0x908   : > { %v6176_v7 = vadd.f32 %v6175_v0, %v6174_v53 }
 0x90a   : > { %v5009_v27 = vadd.f32 %v6176_v7, %v9788_v62  ;;  %v6177_v23 = vpop.f32.mrb[114].mxu0 }
 0x90b   : > { %v6178_v2 = vpop.f32.mrb[115].mxu0 }
 0x90c   : > { %v6179_v48 = vadd.f32 %v6178_v2, %v6177_v23  ;;  %v9792_v21 = vadd.f32 %v5009_v27, %v9639_v51 }
 0x90e   : > { %v5014_v28 = vadd.f32 %v6179_v48, %v9788_v62  ;;  %5103 = vadd.xlane.f32.xlu0 %v9792_v21  ;;  %v6180_v45 = vpop.f32.mrb[116].mxu0 }
 0x90f   : > { %v6181_v10 = vpop.f32.mrb[117].mxu0 }
 0x910   : > { %v6182_v44 = vadd.f32 %v6181_v10, %v6180_v45  ;;  %v9797_v13 = vadd.f32 %v5014_v28, %v9646_v61 }
 0x912   : > { %v5019_v14 = vadd.f32 %v6182_v44, %v9788_v62  ;;  %5105 = vadd.xlane.f32.xlu1 %v9797_v13  ;;  %v6183_v49 = vpop.f32.mrb[118].mxu0 }
 0x913   : > { %v6184_v57 = vpop.f32.mrb[119].mxu0 }
 0x914   : > { %v6185_v56 = vadd.f32 %v6184_v57, %v6183_v49  ;;  %v9802_v51 = vadd.f32 %v5019_v14, %v9653_v22 }
 0x916   : > { %v5024_v58 = vadd.f32 %v6185_v56, %v9788_v62  ;;  %5107 = vadd.xlane.f32.xlu0 %v9802_v51  ;;  %v6186_v24 = vpop.f32.mrb[120].mxu0 }
 0x917   : > { %v6187_v60 = vpop.f32.mrb[121].mxu0 }
 0x918   : > { %v6188_v35 = vadd.f32 %v6187_v60, %v6186_v24  ;;  %v9807_v61 = vadd.f32 %v5024_v58, %v9660_v41 }
 0x91a   : > { %v5029_v54 = vadd.f32 %v6188_v35, %v9788_v62  ;;  %5109 = vadd.xlane.f32.xlu1 %v9807_v61  ;;  %v6189_v25 = vpop.f32.mrb[122].mxu0 }
 0x91b   : > { %v6190_v43 = vpop.f32.mrb[123].mxu0 }
 0x91c   : > { %v6191_v29 = vadd.f32 %v6190_v43, %v6189_v25  ;;  %v9812_v22 = vadd.f32 %v5029_v54, %v9667_v46 }
 0x91e   : > { %v5034_v6 = vadd.f32 %v6191_v29, %v9788_v62  ;;  %5111 = vadd.xlane.f32.xlu0 %v9812_v22  ;;  %v6192_v50 = vpop.f32.mrb[124].mxu0 }
 0x91f   : > { %v6193_v8 = vpop.f32.mrb[125].mxu0 }
 0x920   : > { %v6194_v9 = vadd.f32 %v6193_v8, %v6192_v50  ;;  %v9817_v41 = vadd.f32 %v5034_v6, %v9674_v4 }
 0x922   : > { %v5039_v63 = vadd.f32 %v6194_v9, %v9788_v62  ;;  %5113 = vadd.xlane.f32.xlu1 %v9817_v41  ;;  %v6195_v40 = vpop.f32.mrb[126].mxu0 }
 0x923   : > { %v6196_v20 = vpop.f32.mrb[127].mxu0 }
 0x924   : > { %v6197_v47 = vadd.f32 %v6196_v20, %v6195_v40  ;;  %v9822_v46 = vadd.f32 %v5039_v63, %v9681_v11 }
 0x926   : > { %v5044_v38 = vadd.f32 %v6197_v47, %v9788_v62  ;;  %5115 = vadd.xlane.f32.xlu0 %v9822_v46  ;;  %v6198_v18 = vpop.f32.mrb[128].mxu0 }
 0x927   : > { %v6199_v12 = vpop.f32.mrb[129].mxu0 }
 0x928   : > { %v6200_v30 = vadd.f32 %v6199_v12, %v6198_v18  ;;  %v9827_v4 = vadd.f32 %v5044_v38, %v9688_v42 }
 0x92a   : > { %v5049_v3 = vadd.f32 %v6200_v30, %v9788_v62  ;;  %5117 = vadd.xlane.f32.xlu1 %v9827_v4  ;;  %v6201_v59 = vpop.f32.mrb[130].mxu0 }
 0x92b   : > { %v6202_v34 = vpop.f32.mrb[131].mxu0 }
 0x92c   : > { %v6203_v26 = vadd.f32 %v6202_v34, %v6201_v59  ;;  %v9832_v11 = vadd.f32 %v5049_v3, %v9695_v52 }
 0x92e   : > { %v5054_v5 = vadd.f32 %v6203_v26, %v9788_v62  ;;  %5119 = vadd.xlane.f32.xlu0 %v9832_v11 }
 0x930   : > { %v9837_v1 = vadd.f32 %v5054_v5, %v9701_v31 }
 0x932   : > { %5121 = vadd.xlane.f32.xlu1 %v9837_v1 }
 0x938   : > { %v6204_v42 = vpop.f32.mrb[132].mxu0 }
 0x939   : > { %v6205_v32 = vpop.f32.mrb[133].mxu0 }
 0x93a   : > { %v6206_v17 = vadd.f32 %v6205_v32, %v6204_v42 }
 0x93c   : > { %v5059_v36 = vadd.f32 %v6206_v17, %v9788_v62  ;;  %v6207_v55 = vpop.f32.mrb[134].mxu0 }
 0x93d   : > { %v6208_v53 = vpop.f32.mrb[135].mxu0 }
 0x93e   : > { %v6209_v0 = vadd.f32 %v6208_v53, %v6207_v55  ;;  %v9842_v52 = vadd.f32 %v5059_v36, %v9709_v16 }
 0x940   : > { %v5064_v7 = vadd.f32 %v6209_v0, %v9788_v62  ;;  %5123 = vadd.xlane.f32.xlu0 %v9842_v52  ;;  %v6210_v27 = vpop.f32.mrb[136].mxu0 }
 0x941   : > { %v6211_v31 = vpop.f32.mrb[137].mxu0 }
 0x942   : > { %v6212_v23 = vadd.f32 %v6211_v31, %v6210_v27  ;;  %v9847_v2 = vadd.f32 %v5064_v7, %v9716_v39 }
 0x944   : > { %v5069_v48 = vadd.f32 %v6212_v23, %v9788_v62  ;;  %5125 = vadd.xlane.f32.xlu1 %v9847_v2  ;;  %v6213_v28 = vpop.f32.mrb[138].mxu0 }
 0x945   : > { %v6214_v45 = vpop.f32.mrb[139].mxu0 }
 0x946   : > { %v6215_v10 = vadd.f32 %v6214_v45, %v6213_v28  ;;  %v9852_v16 = vadd.f32 %v5069_v48, %v9723_v15 }
 0x948   : > { %v5074_v44 = vadd.f32 %v6215_v10, %v9788_v62  ;;  %5127 = vadd.xlane.f32.xlu0 %v9852_v16 }
 0x94a   : > { %v9857_v14 = vadd.f32 %v5074_v44, %v9729_v19 }
 0x94c   : > { %5129 = vadd.xlane.f32.xlu1 %v9857_v14 }
 0x958   : > { %v6216_v39 = vpop.f32.mrb[140].mxu0 }
 0x959   : > { %v6217_v49 = vpop.f32.mrb[141].mxu0 }
 0x95a   : > { %v6218_v57 = vadd.f32 %v6217_v49, %v6216_v39 }
 0x95c   : > { %v5079_v56 = vadd.f32 %v6218_v57, %v9788_v62  ;;  %v6219_v58 = vpop.f32.mrb[142].mxu0 }
 0x95d   : > { %v6220_v24 = vpop.f32.mrb[143].mxu0 }
 0x95e   : > { %v6221_v60 = vadd.f32 %v6220_v24, %v6219_v58  ;;  %v9862_v15 = vadd.f32 %v5079_v56, %v9737_v37 }
 0x960   : > { %v5084_v35 = vadd.f32 %v6221_v60, %v9788_v62  ;;  %5131 = vadd.xlane.f32.xlu0 %v9862_v15 }
 0x962   : > { %v9867_v19 = vadd.f32 %v5084_v35, %v9743_v33 }
 0x964   : > { %5133 = vadd.xlane.f32.xlu1 %v9867_v19 }
 0x99b   : > { %v5104_v54 = vpop.xlane.xlu0 %5103 }
 0x99c   : > { %v5135_v25 = vmul.f32 0.0078125, %v5104_v54 }
 0x99e   : > { %v9871_v43 = vsub.f32 %v9792_v21, %v5135_v25 }
 0x99f   : > { %v5106_v29 = vpop.xlane.xlu1 %5105 }
 0x9a0   : > { %v5136_v6 = vmul.f32 0.0078125, %v5106_v29  ;;  %v5167_v37 = vmul.f32 %v9871_v43, %v9871_v43 }
 0x9a2   : > { %v9876_v50 = vsub.f32 %v9797_v13, %v5136_v6  ;;  %5183 = vadd.xlane.f32.xlu0 %v5167_v37 }
 0x9a3   : > { %v5108_v62 = vpop.xlane.xlu0 %5107 }
 0x9a4   : > { %v5137_v8 = vmul.f32 0.0078125, %v5108_v62  ;;  %v5168_v33 = vmul.f32 %v9876_v50, %v9876_v50 }
 0x9a6   : > { %v9881_v9 = vsub.f32 %v9802_v51, %v5137_v8  ;;  %5185 = vadd.xlane.f32.xlu1 %v5168_v33 }
 0x9a7   : > { %v5110_v21 = vpop.xlane.xlu1 %5109 }
 0x9a8   : > { %v5138_v63 = vmul.f32 0.0078125, %v5110_v21  ;;  %v5169_v40 = vmul.f32 %v9881_v9, %v9881_v9 }
 0x9aa   : > { %v9886_v20 = vsub.f32 %v9807_v61, %v5138_v63  ;;  %5187 = vadd.xlane.f32.xlu0 %v5169_v40 }
 0x9ab   : > { %v5112_v13 = vpop.xlane.xlu0 %5111 }
 0x9ac   : > { %v5139_v47 = vmul.f32 0.0078125, %v5112_v13  ;;  %v5170_v38 = vmul.f32 %v9886_v20, %v9886_v20 }
 0x9ae   : > { %v9891_v18 = vsub.f32 %v9812_v22, %v5139_v47  ;;  %5189 = vadd.xlane.f32.xlu1 %v5170_v38  ;;  %v9953_v47 = vld [vmem:[%s10167_s7] ss:$0 sm:$0xff] }
 0x9af   : > { %v5114_v51 = vpop.xlane.xlu1 %5113 }
 0x9b0   : > { %v5140_v12 = vmul.f32 0.0078125, %v5114_v51  ;;  %v5171_v30 = vmul.f32 %v9891_v18, %v9891_v18 }
 0x9b2   : > { %v9896_v3 = vsub.f32 %v9817_v41, %v5140_v12  ;;  %5191 = vadd.xlane.f32.xlu0 %v5171_v30  ;;  %v9959_v30 = vld [vmem:[%s10168_s15] ss:$0 sm:$0xff] }
 0x9b3   : > { %v5116_v61 = vpop.xlane.xlu0 %5115 }
 0x9b4   : > { %v5141_v59 = vmul.f32 0.0078125, %v5116_v61  ;;  %v5172_v34 = vmul.f32 %v9896_v3, %v9896_v3 }
 0x9b6   : > { %v9901_v26 = vsub.f32 %v9822_v46, %v5141_v59  ;;  %5193 = vadd.xlane.f32.xlu1 %v5172_v34 }
 0x9b7   : > { %v5118_v22 = vpop.xlane.xlu1 %5117 }
 0x9b8   : > { %v5142_v5 = vmul.f32 0.0078125, %v5118_v22  ;;  %v5173_v42 = vmul.f32 %v9901_v26, %v9901_v26 }
 0x9ba   : > { %v9906_v32 = vsub.f32 %v9827_v4, %v5142_v5  ;;  %5195 = vadd.xlane.f32.xlu0 %v5173_v42 }
 0x9bb   : > { %v5120_v41 = vpop.xlane.xlu0 %5119 }
 0x9bc   : > { %v5143_v17 = vmul.f32 0.0078125, %v5120_v41  ;;  %v5174_v36 = vmul.f32 %v9906_v32, %v9906_v32 }
 0x9be   : > { %v9911_v55 = vsub.f32 %v9832_v11, %v5143_v17  ;;  %5197 = vadd.xlane.f32.xlu1 %v5174_v36 }
 0x9bf   : > { %v5122_v46 = vpop.xlane.xlu1 %5121 }
 0x9c0   : > { %v5144_v53 = vmul.f32 0.0078125, %v5122_v46  ;;  %v5175_v0 = vmul.f32 %v9911_v55, %v9911_v55 }
 0x9c2   : > { %v9916_v7 = vsub.f32 %v9837_v1, %v5144_v53  ;;  %5199 = vadd.xlane.f32.xlu0 %v5175_v0 }
 0x9c4   : > { %v5176_v4 = vmul.f32 %v9916_v7, %v9916_v7 }
 0x9c6   : > { %5201 = vadd.xlane.f32.xlu1 %v5176_v4 }
 0x9cd   : > { %v5124_v27 = vpop.xlane.xlu0 %5123 }
 0x9ce   : > { %v5145_v31 = vmul.f32 0.0078125, %v5124_v27 }
 0x9d0   : > { %v9921_v23 = vsub.f32 %v9842_v52, %v5145_v31 }
 0x9d1   : > { %v5126_v11 = vpop.xlane.xlu1 %5125 }
 0x9d2   : > { %v5146_v48 = vmul.f32 0.0078125, %v5126_v11  ;;  %v5177_v28 = vmul.f32 %v9921_v23, %v9921_v23 }
 0x9d4   : > { %v9926_v45 = vsub.f32 %v9847_v2, %v5146_v48  ;;  %5203 = vadd.xlane.f32.xlu0 %v5177_v28 }
 0x9d5   : > { %v5128_v1 = vpop.xlane.xlu0 %5127 }
 0x9d6   : > { %v5147_v10 = vmul.f32 0.0078125, %v5128_v1  ;;  %v5178_v44 = vmul.f32 %v9926_v45, %v9926_v45 }
 0x9d8   : > { %v9931_v39 = vsub.f32 %v9852_v16, %v5147_v10  ;;  %5205 = vadd.xlane.f32.xlu1 %v5178_v44 }
 0x9d9   : > { %v5130_v52 = vpop.xlane.xlu1 %5129 }
 0x9da   : > { %v5148_v49 = vmul.f32 0.0078125, %v5130_v52  ;;  %v5179_v57 = vmul.f32 %v9931_v39, %v9931_v39 }
 0x9dc   : > { %v9936_v56 = vsub.f32 %v9857_v14, %v5148_v49  ;;  %5207 = vadd.xlane.f32.xlu0 %v5179_v57 }
 0x9de   : > { %v5180_v2 = vmul.f32 %v9936_v56, %v9936_v56 }
 0x9e0   : > { %5209 = vadd.xlane.f32.xlu1 %v5180_v2 }
 0x9ed   : > { %v5132_v58 = vpop.xlane.xlu0 %5131 }
 0x9ee   : > { %v5149_v24 = vmul.f32 0.0078125, %v5132_v58 }
 0x9f0   : > { %v9941_v60 = vsub.f32 %v9862_v15, %v5149_v24 }
 0x9f1   : > { %v5134_v16 = vpop.xlane.xlu1 %5133 }
 0x9f2   : > { %v5150_v35 = vmul.f32 0.0078125, %v5134_v16  ;;  %v5181_v54 = vmul.f32 %v9941_v60, %v9941_v60 }
 0x9f4   : > { %v9946_v25 = vsub.f32 %v9867_v19, %v5150_v35  ;;  %5211 = vadd.xlane.f32.xlu0 %v5181_v54 }
 0x9f6   : > { %v5182_v14 = vmul.f32 %v9946_v25, %v9946_v25 }
 0x9f8   : > { %5213 = vadd.xlane.f32.xlu1 %v5182_v14 }
 0xa2f   : > { %v5184_v29 = vpop.xlane.xlu0 %5183 }
 0xa30   : > { %v5215_v6 = vmul.f32 0.0078125, %v5184_v29 }
 0xa32   : > { %v5231_v37 = vadd.f32 1e-05, %v5215_v6 }
 0xa33   : > { %v5186_v62 = vpop.xlane.xlu1 %5185 }
 0xa34   : > { %7791 = vrsqrt.f32 %v5231_v37  ;;  %v5216_v15 = vmul.f32 0.0078125, %v5186_v62 }
 0xa36   : > { %v5232_v8 = vadd.f32 1e-05, %v5216_v15 }
 0xa37   : > { %v5188_v33 = vpop.xlane.xlu0 %5187 }
 0xa38   : > { %7793 = vrsqrt.f32 %v5232_v8  ;;  %v5217_v21 = vmul.f32 0.0078125, %v5188_v33 }
 0xa3a   : > { %v5233_v63 = vadd.f32 1e-05, %v5217_v21 }
 0xa3b   : > { %v5190_v40 = vpop.xlane.xlu1 %5189 }
 0xa3c   : > { %7795 = vrsqrt.f32 %v5233_v63  ;;  %v5218_v19 = vmul.f32 0.0078125, %v5190_v40 }
 0xa3e   : > { %v7792_v13 = vpop.eup %7791  ;;  %v5234_v38 = vadd.f32 1e-05, %v5218_v19 }
 0xa3f   : > { %v5263_v51 = vmul.f32 %v7792_v13, %v9871_v43  ;;  %v5192_v12 = vpop.xlane.xlu0 %5191 }
 0xa40   : > { %7797 = vrsqrt.f32 %v5234_v38  ;;  %v5219_v61 = vmul.f32 0.0078125, %v5192_v12 }
 0xa41   : > { %v5285_v59 = vmul.f32 %v9953_v47, %v5263_v51 }
 0xa42   : > { %v7794_v34 = vpop.eup %7793  ;;  %v5235_v22 = vadd.f32 1e-05, %v5219_v61 }
 0xa43   : > { %v5307_v5 = vadd.f32 %v9959_v30, %v5285_v59  ;;  %v5264_v42 = vmul.f32 %v7794_v34, %v9876_v50  ;;  %v5194_v41 = vpop.xlane.xlu1 %5193 }
 0xa44   : > { %7799 = vrsqrt.f32 %v5235_v22  ;;  %v5220_v17 = vmul.f32 0.0078125, %v5194_v41 }
 0xa45   : > { %5323 = vst [vmem:[%s9965_s16] sm:$0xff] %v5307_v5  ;;  %v5286_v43 = vmul.f32 %v9953_v47, %v5264_v42 }
 0xa46   : > { %v7796_v36 = vpop.eup %7795  ;;  %v5236_v46 = vadd.f32 1e-05, %v5220_v17 }
 0xa47   : > { %v5308_v53 = vadd.f32 %v9959_v30, %v5286_v43  ;;  %v5265_v0 = vmul.f32 %v7796_v36, %v9881_v9  ;;  %v5196_v4 = vpop.xlane.xlu0 %5195 }
 0xa48   : > { %7801 = vrsqrt.f32 %v5236_v46  ;;  %v5221_v50 = vmul.f32 0.0078125, %v5196_v4 }
 0xa49   : > { %5324 = vst [vmem:[%s9965_s16 + $0x8] sm:$0xff] %v5308_v53  ;;  %v5287_v27 = vmul.f32 %v9953_v47, %v5265_v0 }
 0xa4a   : > { %v7798_v31 = vpop.eup %7797  ;;  %v5237_v11 = vadd.f32 1e-05, %v5221_v50 }
 0xa4b   : > { %v5309_v48 = vadd.f32 %v9959_v30, %v5287_v27  ;;  %v5266_v28 = vmul.f32 %v7798_v31, %v9886_v20  ;;  %v5198_v1 = vpop.xlane.xlu1 %5197 }
 0xa4c   : > { %7803 = vrsqrt.f32 %v5237_v11  ;;  %v5222_v10 = vmul.f32 0.0078125, %v5198_v1 }
 0xa4d   : > { %5325 = vst [vmem:[%s9965_s16 + $0x10] sm:$0xff] %v5309_v48  ;;  %v5288_v44 = vmul.f32 %v9953_v47, %v5266_v28 }
 0xa4e   : > { %v7800_v9 = vpop.eup %7799  ;;  %v5238_v52 = vadd.f32 1e-05, %v5222_v10 }
 0xa4f   : > { %v5310_v49 = vadd.f32 %v9959_v30, %v5288_v44  ;;  %v5267_v57 = vmul.f32 %v7800_v9, %v9891_v18  ;;  %v5200_v2 = vpop.xlane.xlu0 %5199 }
 0xa50   : > { %7805 = vrsqrt.f32 %v5238_v52  ;;  %v5223_v58 = vmul.f32 0.0078125, %v5200_v2 }
 0xa51   : > { %5326 = vst [vmem:[%s9965_s16 + $0x18] sm:$0xff] %v5310_v49  ;;  %v5289_v20 = vmul.f32 %v9953_v47, %v5267_v57 }
 0xa52   : > { %v7802_v24 = vpop.eup %7801  ;;  %v5239_v16 = vadd.f32 1e-05, %v5223_v58 }
 0xa53   : > { %v5311_v35 = vadd.f32 %v9959_v30, %v5289_v20  ;;  %v5268_v54 = vmul.f32 %v7802_v24, %v9896_v3  ;;  %v5202_v14 = vpop.xlane.xlu1 %5201 }
 0xa54   : > { %7807 = vrsqrt.f32 %v5239_v16  ;;  %v5224_v29 = vmul.f32 0.0078125, %v5202_v14 }
 0xa55   : > { %5327 = vst [vmem:[%s9965_s16 + $0x20] sm:$0xff] %v5311_v35  ;;  %v5290_v18 = vmul.f32 %v9953_v47, %v5268_v54 }
 0xa56   : > { %v7804_v6 = vpop.eup %7803  ;;  %v5240_v37 = vadd.f32 1e-05, %v5224_v29 }
 0xa57   : > { %v5312_v62 = vadd.f32 %v9959_v30, %v5290_v18  ;;  %v5269_v15 = vmul.f32 %v7804_v6, %v9901_v26 }
 0xa58   : > { %7809 = vrsqrt.f32 %v5240_v37 }
 0xa59   : > { %5328 = vst [vmem:[%s9965_s16 + $0x28] sm:$0xff] %v5312_v62  ;;  %v5291_v8 = vmul.f32 %v9953_v47, %v5269_v15 }
 0xa5a   : > { %v7806_v33 = vpop.eup %7805 }
 0xa5b   : > { %v5313_v3 = vadd.f32 %v9959_v30, %v5291_v8  ;;  %v5270_v21 = vmul.f32 %v7806_v33, %v9906_v32 }
 0xa5d   : > { %5329 = vst [vmem:[%s9965_s16 + $0x30] sm:$0xff] %v5313_v3  ;;  %v5292_v63 = vmul.f32 %v9953_v47, %v5270_v21 }
 0xa5e   : > { %v7808_v40 = vpop.eup %7807 }
 0xa5f   : > { %v5314_v19 = vadd.f32 %v9959_v30, %v5292_v63  ;;  %v5271_v13 = vmul.f32 %v7808_v40, %v9911_v55 }
 0xa61   : > { %5330 = vst [vmem:[%s9965_s16 + $0x38] sm:$0xff] %v5314_v19  ;;  %v5293_v26 = vmul.f32 %v9953_v47, %v5271_v13  ;;  %v5204_v38 = vpop.xlane.xlu0 %5203 }
 0xa62   : > { %v7810_v51 = vpop.eup %7809  ;;  %v5225_v12 = vmul.f32 0.0078125, %v5204_v38 }
 0xa63   : > { %v5315_v61 = vadd.f32 %v9959_v30, %v5293_v26  ;;  %v5272_v59 = vmul.f32 %v7810_v51, %v9916_v7 }
 0xa64   : > { %v5241_v32 = vadd.f32 1e-05, %v5225_v12 }
 0xa65   : > { %5331 = vst [vmem:[%s9965_s16 + $0x40] sm:$0xff] %v5315_v61  ;;  %v5294_v34 = vmul.f32 %v9953_v47, %v5272_v59  ;;  %v5206_v22 = vpop.xlane.xlu1 %5205 }
 0xa66   : > { %7811 = vrsqrt.f32 %v5241_v32  ;;  %v5226_v5 = vmul.f32 0.0078125, %v5206_v22 }
 0xa67   : > { %v5316_v55 = vadd.f32 %v9959_v30, %v5294_v34 }
 0xa68   : > { %v5242_v42 = vadd.f32 1e-05, %v5226_v5 }
 0xa69   : > { %5332 = vst [vmem:[%s9965_s16 + $0x48] sm:$0xff] %v5316_v55  ;;  %v5208_v41 = vpop.xlane.xlu0 %5207 }
 0xa6a   : > { %7813 = vrsqrt.f32 %v5242_v42  ;;  %v5227_v17 = vmul.f32 0.0078125, %v5208_v41 }
 0xa6c   : > { %v5243_v43 = vadd.f32 1e-05, %v5227_v17 }
 0xa6d   : > { %v5210_v36 = vpop.xlane.xlu1 %5209 }
 0xa6e   : > { %7815 = vrsqrt.f32 %v5243_v43  ;;  %v5228_v7 = vmul.f32 0.0078125, %v5210_v36 }
 0xa70   : > { %v7812_v46 = vpop.eup %7811  ;;  %v5244_v53 = vadd.f32 1e-05, %v5228_v7 }
 0xa71   : > { %v5273_v0 = vmul.f32 %v7812_v46, %v9921_v23 }
 0xa72   : > { %7817 = vrsqrt.f32 %v5244_v53 }
 0xa73   : > { %v5295_v4 = vmul.f32 %v9953_v47, %v5273_v0 }
 0xa74   : > { %v7814_v50 = vpop.eup %7813 }
 0xa75   : > { %v5317_v27 = vadd.f32 %v9959_v30, %v5295_v4  ;;  %v5274_v31 = vmul.f32 %v7814_v50, %v9926_v45 }
 0xa77   : > { %5333 = vst [vmem:[%s9965_s16 + $0x50] sm:$0xff] %v5317_v27  ;;  %v5296_v11 = vmul.f32 %v9953_v47, %v5274_v31 }
 0xa78   : > { %v7816_v48 = vpop.eup %7815 }
 0xa79   : > { %v5318_v28 = vadd.f32 %v9959_v30, %v5296_v11  ;;  %v5275_v1 = vmul.f32 %v7816_v48, %v9931_v39 }
 0xa7b   : > { %5334 = vst [vmem:[%s9965_s16 + $0x58] sm:$0xff] %v5318_v28  ;;  %v5297_v23 = vmul.f32 %v9953_v47, %v5275_v1 }
 0xa7c   : > { %v7818_v10 = vpop.eup %7817 }
 0xa7d   : > { %v5319_v44 = vadd.f32 %v9959_v30, %v5297_v23  ;;  %v5276_v9 = vmul.f32 %v7818_v10, %v9936_v56 }
 0xa7f   : > { %5335 = vst [vmem:[%s9965_s16 + $0x60] sm:$0xff] %v5319_v44  ;;  %v5298_v45 = vmul.f32 %v9953_v47, %v5276_v9 }
 0xa81   : > { %v5320_v52 = vadd.f32 %v9959_v30, %v5298_v45  ;;  %v5212_v49 = vpop.xlane.xlu0 %5211 }
 0xa82   : > { %v5229_v57 = vmul.f32 0.0078125, %v5212_v49 }
 0xa83   : > { %5336 = vst [vmem:[%s9965_s16 + $0x68] sm:$0xff] %v5320_v52 }
 0xa84   : > { %v5245_v39 = vadd.f32 1e-05, %v5229_v57 }
 0xa85   : > { %v5214_v2 = vpop.xlane.xlu1 %5213 }
 0xa86   : > { %7819 = vrsqrt.f32 %v5245_v39  ;;  %v5230_v58 = vmul.f32 0.0078125, %v5214_v2 }
 0xa88   : > { %v5246_v20 = vadd.f32 1e-05, %v5230_v58 }
 0xa8a   : > { %7821 = vrsqrt.f32 %v5246_v20 }
 0xa90   : > { %v7820_v56 = vpop.eup %7819 }
 0xa91   : > { %v5277_v24 = vmul.f32 %v7820_v56, %v9941_v60 }
 0xa93   : > { %v5299_v16 = vmul.f32 %v9953_v47, %v5277_v24 }
 0xa94   : > { %v7822_v35 = vpop.eup %7821 }
 0xa95   : > { %v5321_v54 = vadd.f32 %v9959_v30, %v5299_v16  ;;  %v5278_v14 = vmul.f32 %v7822_v35, %v9946_v25 }
 0xa97   : > { %5337 = vst [vmem:[%s9965_s16 + $0x70] sm:$0xff] %v5321_v54  ;;  %v5300_v29 = vmul.f32 %v9953_v47, %v5278_v14 }
 0xa99   : > { %v5322_v60 = vadd.f32 %v9959_v30, %v5300_v29 }
 0xa9b   : > { %5338 = vst [vmem:[%s9965_s16 + $0x78] sm:$0xff] %v5322_v60 }
 0xa9c   : > { %8124 = shalt.err (!%p8121_p3)
}
 0xa9d   : > { %s8125_s13 = scalar_lea.hbm %s10030_s23, 2048  ;;  %s8129_s5 = scalar_lea.hbm %s10169_s28, 4096 }
 0xa9e   : > { %p8126_p12 = scmp.ne.s32.totalorder %s10030_s23, %s8125_s13  ;;  %p8130_p0 = scmp.lt.u32.totalorder %s10030_s23, %s10169_s28 }
 0xa9f   : > { %p8131_p7 = scmp.lt.u32.totalorder %s8129_s5, %s8125_s13  ;;  %p8133_p6 = scmp.lt.u32.totalorder %s8125_s13, %s10030_s23 }
 0xaa0   : > { %p8127_p1 = pnand %p8126_p12, %p10170_p10 }
 0xaa1   : > { %p8132_p2 = por %p8131_p7, %p8130_p0 }
 0xaa2   : > { %p8128_p13 = pneg %p8127_p1 }
 0xaa3   : > { %p8134_p5 = por %p8133_p6, %p8132_p2 }
 0xaa5   : > { %p8135_p9 = pnand %p8134_p5, %p8128_p13 }
 0xaa7   : > { %8138 = shalt.err (!%p8135_p9)
}
 0xaa8   : > { %s8214_s20 = smov 128   ;;  %s8215_s15 = smov 8  }
 0xaa9   : > { %7566 = dma.vmem_to_hbm [thread:$0]  (%p10170_p10), %s10032_s29, 2048, %s10030_s23, %s5340_s18, %s8214_s20, %s8214_s20, %s8215_s15  }
 0xaaa PF: > { %s5369_s16 = sand.u32 1, %s8185_s0   ;;  %p10171_p4 = scmp.ne.s32.totalorder %s10148_s10, 0 }
 0xaab   : > { %p10172_p8 = scmp.ge.s32.totalorder %s8197_s21, 2  ;;  %s5370_s17 = scalar_lea.sflag [#allocation4], %s5369_s16 }
 0xaad   : > { %p7598_p11 = pnand %p10172_p8, %p10171_p4 }
 0xaaf   : > { %8180 = dma.done.wait (!%p7598_p11), %s5370_s17, 2048  }
 0xab0   : > { %8182 = vsyncadd (!%p7598_p11), %s5370_s17, 4294965248  ;;  %s10173_s22 = sld [smem:[#allocation25_spill]]  ;;  %s10174_s20 = sld [smem:[#allocation26_spill]] }
 0xab1   : > { %p38_p3 = scmp.ge.s32.totalorder %s8535_s24, 4   ;;  %s10175_s0 = smov %s8189_s30 }
 0xab2   : > { %s10177_s21 = smov %s8535_s24 }
 0xab3   :  { %40 = sbr.rel (!%p38_p3) target bundleno = 29 (0x1d), region = 182 }
 0xab6   : > { %s10176_s30 = smov %s10173_s22 }
 0xaba   :  { %5375 = vsyncpa [#allocation3], 1 }
 0xabb   :  { %5377 = vsyncpa [#allocation3 + $0x1], 1 }
 0xabc   :  { %5378 = vsyncpa [#allocation6], 1 }
 0xabd   :  { %5380 = vsyncpa [#allocation6 + $0x1], 1 }
 0xabe   :  { %5381 = vsyncpa [#allocation9], 1 }
 0xabf   :  { %5382 = vsyncpa [#allocation12], 1 }
 0xac0   :  { %5383 = vsyncpa [#allocation15], 1 }
 0xac1   :  { %5384 = vsyncpa [#allocation4], 1 }
 0xac2   :  { %5386 = vsyncpa [#allocation4 + $0x1], 1 }

</bundles_post_ra>
